<compile_context>
chip_gen: v5e
topology: v5e:2x2
jax: 0.10.0
libtpu: 0.0.40
codegen_flags: <defaults>
</compile_context>

<pallas_src>
import functools

import jax
import jax.numpy as jnp
import numpy as np
from jax.experimental import pallas as pl
from jax.experimental.pallas import tpu as pltpu


# ----------------------------------------------------------------------------
# Host-side (numpy) constants
# ----------------------------------------------------------------------------
def np_resize_matrix(n_in: int, n_out: int) -> np.ndarray:
    """Dense (n_out, n_in) matrix M with M @ x == bilinear resize along that axis,
    align_corners=True (PyTorch semantics)."""
    if n_out == 1:
        src = np.zeros((1,), np.float64)
    else:
        src = np.arange(n_out, dtype=np.float64) * (n_in - 1) / (n_out - 1)
    i0 = np.clip(np.floor(src).astype(np.int64), 0, n_in - 1)
    i1 = np.clip(i0 + 1, 0, n_in - 1)
    w1 = (src - i0).astype(np.float32)
    w0 = 1.0 - w1
    m = np.zeros((n_out, n_in), np.float32)
    m[np.arange(n_out), i0] += w0
    m[np.arange(n_out), i1] += w1
    return m


def np_edge_masks(ho: int, wo: int) -> np.ndarray:
    """(2, Ho*Wo) masks that zero conv taps which would read across the left/right image
    edge in the flattened (row-major) layout. Row 0: kw-1 == -1, row 1: kw-1 == +1."""
    q = np.arange(ho * wo) % wo
    return np.stack([(q != 0), (q != wo - 1)]).astype(np.float32)


# ----------------------------------------------------------------------------
# Fused kernel: bilinear upsample -> 3x3 conv -> folded BatchNorm -> ReLU
# ----------------------------------------------------------------------------
def fused_upsample_conv_bn_relu_kernel(x_ref, rh_ref, rwt_ref, w_ref, scale_ref,
                                       shift_ref, mask_ref, o_ref, up_ref, col_ref):
    # x_ref:     (1, Cin*H, W)        one batch element, NCHW flattened over (C, H)
    # rh_ref:    (Ho, H)              height interpolation matrix
    # rwt_ref:   (W, Wo)              width interpolation matrix, transposed
    # w_ref:     (Cout, 9*Cin)        conv weights, columns ordered (kh, kw, cin)
    # scale/shift: (Cout, 1)          folded BatchNorm (inference)
    # mask_ref:  (2, Ho*Wo)           horizontal-edge masks for kw==0 / kw==2 taps
    # o_ref:     (1, Cout, Ho*Wo)     lane-dense output block
    # up_ref:    (Cin, 2*pad + Ho*Wo) VMEM scratch: flattened upsampled image + zero halo
    # col_ref:   (9*Cin, Ho*Wo)       VMEM scratch: im2col buffer
    ho, h = rh_ref.shape
    wo = rwt_ref.shape[1]
    cin = x_ref.shape[1] // h
    hw = o_ref.shape[2]
    pad = (up_ref.shape[1] - hw) // 2          # = Wo + 1 zero lanes on each side

    # ---- 1. zero the scratch so the vertical halo bands read as zeros ----
    up_ref[...] = jnp.zeros_like(up_ref)

    # ---- 2. bilinear upsample (align_corners=True) as two matmul stages ----
    # width resize for all channels in one matmul: (Cin*H, W) @ (W, Wo)
    t = jnp.dot(x_ref[0], rwt_ref[...], preferred_element_type=jnp.float32)   # (Cin*H, Wo)
    for c in range(cin):
        # height resize per channel: (Ho, H) @ (H, Wo)
        u_c = jnp.dot(rh_ref[...], t[c * h:(c + 1) * h, :],
                      preferred_element_type=jnp.float32)                     # (Ho, Wo)
        # Scatter the 2-D tile into the lane-major (flattened-spatial) scratch row by row.
        # This is the explicit, always-supported way to pay the (Ho, Wo) -> (Ho*Wo,) lane
        # relayout that the lane-dense conv matmul below needs.
        for p in range(ho):
            up_ref[c:c + 1, pad + p * wo: pad + (p + 1) * wo] = u_c[p:p + 1, :]

    # ---- 3. im2col in VMEM: 9 shifted windows of the flat image, edge-masked ----
    for kh in range(3):
        for kw in range(3):
            tidx = kh * 3 + kw
            start = pad + (kh - 1) * wo + (kw - 1)
            win = up_ref[:, start:start + hw]                                 # (Cin, Ho*Wo)
            if kw == 0:                      # tap reads column q-1 -> invalid at q == 0
                win = win * mask_ref[0:1, :]
            elif kw == 2:                    # tap reads column q+1 -> invalid at q == Wo-1
                win = win * mask_ref[1:2, :]
            col_ref[tidx * cin:(tidx + 1) * cin, :] = win

    # ---- 4. single conv matmul with K = 9*Cin, fused BN (inference) + ReLU ----
    y = jnp.dot(w_ref[...], col_ref[...], preferred_element_type=jnp.float32)  # (Cout, Ho*Wo)
    y = y * scale_ref[...] + shift_ref[...]
    o_ref[0] = jnp.maximum(y, 0.0).astype(o_ref.dtype)


# ----------------------------------------------------------------------------
# Wrapper
# ----------------------------------------------------------------------------
@functools.partial(jax.jit, static_argnames=("scale",))
def upsample_forward(x_nchw, conv_w_oihw, bn_gamma, bn_beta, bn_mean, bn_var,
                     *, scale=2, eps=1e-5):
    n, cin, h, w = x_nchw.shape
    cout = conv_w_oihw.shape[0]
    ho, wo = int(h * scale), int(w * scale)
    hw = ho * wo
    pad = wo + 1

    # host-precomputed constants (become literals in the traced graph)
    rh = jnp.asarray(np_resize_matrix(h, ho))          # (Ho, H)
    rwt = jnp.asarray(np_resize_matrix(w, wo).T)       # (W, Wo)
    masks = jnp.asarray(np_edge_masks(ho, wo))         # (2, Ho*Wo)

    # cheap, contiguous input reshape (stays NCHW; no transposes of big tensors anywhere)
    x_flat = x_nchw.reshape(n, cin * h, w).astype(jnp.float32)

    # conv weights: OIHW -> (Cout, kh*kw*Cin) matching the im2col row ordering (kh, kw, c)
    w_mat = jnp.transpose(conv_w_oihw, (0, 2, 3, 1)).reshape(cout, 9 * cin).astype(jnp.float32)

    # fold BatchNorm (inference) into a per-channel scale/shift
    inv_std = 1.0 / jnp.sqrt(bn_var + eps)
    bn_scale = (bn_gamma * inv_std).reshape(cout, 1).astype(jnp.float32)
    bn_shift = (bn_beta - bn_mean * bn_gamma * inv_std).reshape(cout, 1).astype(jnp.float32)

    out_flat = pl.pallas_call(
        fused_upsample_conv_bn_relu_kernel,
        out_shape=jax.ShapeDtypeStruct((n, cout, hw), jnp.float32),
        grid=(n,),
        in_specs=[
            pl.BlockSpec((1, cin * h, w), lambda b: (b, 0, 0)),
            pl.BlockSpec((ho, h), lambda b: (0, 0)),
            pl.BlockSpec((w, wo), lambda b: (0, 0)),
            pl.BlockSpec((cout, 9 * cin), lambda b: (0, 0)),
            pl.BlockSpec((cout, 1), lambda b: (0, 0)),
            pl.BlockSpec((cout, 1), lambda b: (0, 0)),
            pl.BlockSpec((2, hw), lambda b: (0, 0)),
        ],
        out_specs=pl.BlockSpec((1, cout, hw), lambda b: (b, 0, 0)),
        scratch_shapes=[
            pltpu.VMEM((cin, 2 * pad + hw), jnp.float32),   # flattened upsample + halo
            pltpu.VMEM((9 * cin, hw), jnp.float32),         # im2col buffer
        ],
        compiler_params=pltpu.CompilerParams(dimension_semantics=("parallel",)),
    )(x_flat, rh, rwt, w_mat, bn_scale, bn_shift, masks)

    # free contiguous reshape back to NCHW
    return out_flat.reshape(n, cout, ho, wo)


# ----------------------------------------------------------------------------
# Pure-JAX reference (same math, XLA ops) for a sanity check
# ----------------------------------------------------------------------------
def reference_forward(x_nchw, conv_w_oihw, bn_gamma, bn_beta, bn_mean, bn_var,
                      *, scale=2, eps=1e-5):
    n, cin, h, w = x_nchw.shape
    ho, wo = int(h * scale), int(w * scale)
    rh = jnp.asarray(np_resize_matrix(h, ho))
    rw = jnp.asarray(np_resize_matrix(w, wo))
    up = jnp.einsum('nchw,ph,qw->ncpq', x_nchw, rh, rw)            # bilinear align_corners
    up_nhwc = jnp.transpose(up, (0, 2, 3, 1))
    w_hwio = jnp.transpose(conv_w_oihw, (2, 3, 1, 0))
    conv = jax.lax.conv_general_dilated(
        up_nhwc, w_hwio, window_strides=(1, 1), padding='SAME',
        dimension_numbers=('NHWC', 'HWIO', 'NHWC'))
    inv_std = 1.0 / jnp.sqrt(bn_var + eps)
    y = (conv - bn_mean) * (bn_gamma * inv_std) + bn_beta
    y = jnp.maximum(y, 0.0)
    return jnp.transpose(y, (0, 3, 1, 2))


if __name__ == "__main__":
    key = jax.random.PRNGKey(0)
    k_x, k_w, k_g, k_b, k_m, k_v = jax.random.split(key, 6)

    N, IN_CH, OUT_CH, H, W, SCALE = 2, 4, 8, 16, 16, 2

    x = jax.random.normal(k_x, (N, IN_CH, H, W), jnp.float32)
    # Conv2d weight, PyTorch OIHW layout: (out_ch, in_ch, 3, 3)
    conv_w = jax.random.normal(k_w, (OUT_CH, IN_CH, 3, 3), jnp.float32) * 0.1
    # BatchNorm2d params (inference mode, deterministic synthetic stats)
    bn_gamma = 1.0 + 0.1 * jax.random.normal(k_g, (OUT_CH,), jnp.float32)
    bn_beta = 0.1 * jax.random.normal(k_b, (OUT_CH,), jnp.float32)
    bn_mean = 0.1 * jax.random.normal(k_m, (OUT_CH,), jnp.float32)
    bn_var = 1.0 + jnp.abs(jax.random.normal(k_v, (OUT_CH,), jnp.float32)) * 0.1

    out = upsample_forward(x, conv_w, bn_gamma, bn_beta, bn_mean, bn_var, scale=SCALE)
    out = jax.block_until_ready(out)
    assert out.shape == (N, OUT_CH, H * SCALE, W * SCALE), out.shape

    ref = reference_forward(x, conv_w, bn_gamma, bn_beta, bn_mean, bn_var, scale=SCALE)
    np.testing.assert_allclose(np.asarray(out), np.asarray(ref), rtol=1e-3, atol=1e-3)

    print("KERNEL_OK")
</pallas_src>

<mosaic_0001>
module attributes {stable_mosaic.version = 11 : i64} {
  func.func @fused_upsample_conv_bn_relu_kernel(%arg0: i32, %arg1: memref<1x64x16xf32, #tpu.memory_space<vmem>>, %arg2: memref<32x16xf32, #tpu.memory_space<vmem>>, %arg3: memref<16x32xf32, #tpu.memory_space<vmem>>, %arg4: memref<8x36xf32, #tpu.memory_space<vmem>>, %arg5: memref<8x1xf32, #tpu.memory_space<vmem>>, %arg6: memref<8x1xf32, #tpu.memory_space<vmem>>, %arg7: memref<2x1024xf32, #tpu.memory_space<vmem>>, %arg8: memref<1x8x1024xf32, #tpu.memory_space<vmem>>, %arg9: memref<4x1090xf32, #tpu.memory_space<vmem>>, %arg10: memref<36x1024xf32, #tpu.memory_space<vmem>>) attributes {dimension_semantics = [#tpu.dimension_semantics<parallel>], iteration_bounds = array<i64: 2>, scalar_prefetch = 0 : i64, scratch_operands = 2 : i64, tpu.core_type = #tpu.core_type<tc>, window_params = [{transform_indices = @transform_0, window_bounds = array<i64: 1, 64, 16>}, {pipeline_mode = #tpu.pipeline_mode<synchronous>, transform_indices = @transform_1, window_bounds = array<i64: 32, 16>}, {pipeline_mode = #tpu.pipeline_mode<synchronous>, transform_indices = @transform_2, window_bounds = array<i64: 16, 32>}, {pipeline_mode = #tpu.pipeline_mode<synchronous>, transform_indices = @transform_3, window_bounds = array<i64: 8, 36>}, {pipeline_mode = #tpu.pipeline_mode<synchronous>, transform_indices = @transform_4, window_bounds = array<i64: 8, 1>}, {pipeline_mode = #tpu.pipeline_mode<synchronous>, transform_indices = @transform_5, window_bounds = array<i64: 8, 1>}, {pipeline_mode = #tpu.pipeline_mode<synchronous>, transform_indices = @transform_6, window_bounds = array<i64: 2, 1024>}, {transform_indices = @transform_7, window_bounds = array<i64: 1, 8, 1024>}]} {
    %cst = arith.constant 0.000000e+00 : f32
    %0 = vector.broadcast %cst : f32 to vector<4x1090xf32>
    %c0 = arith.constant 0 : index
    %c0_0 = arith.constant 0 : index
    %1 = vector.load %arg9[%c0, %c0_0] : memref<4x1090xf32, #tpu.memory_space<vmem>>, vector<4x1090xf32>
    tpu.vector_store %arg9[%c0, %c0_0], %0 {strides = array<i32>} : memref<4x1090xf32, #tpu.memory_space<vmem>>, vector<4x1090xf32>,
    %c0_1 = arith.constant 0 : index
    %c0_2 = arith.constant 0 : index
    %c0_3 = arith.constant 0 : index
    %2 = vector.load %arg1[%c0_1, %c0_2, %c0_3] : memref<1x64x16xf32, #tpu.memory_space<vmem>>, vector<1x64x16xf32>
    %3 = vector.shape_cast %2 : vector<1x64x16xf32> to vector<64x16xf32>
    %c0_4 = arith.constant 0 : index
    %c0_5 = arith.constant 0 : index
    %4 = vector.load %arg3[%c0_4, %c0_5] : memref<16x32xf32, #tpu.memory_space<vmem>>, vector<16x32xf32>
    %cst_6 = arith.constant dense<0.000000e+00> : vector<64x32xf32>
    %5 = tpu.matmul %3, %4, %cst_6 {dimension_numbers = #tpu.dot_dimension_numbers<[1], [0], [0], [1], [0, 0, 1, 1], [], []>} : vector<64x16xf32>, vector<16x32xf32>, vector<64x32xf32> -> vector<64x32xf32>
    %c0_7 = arith.constant 0 : index
    %c0_8 = arith.constant 0 : index
    %6 = vector.load %arg2[%c0_7, %c0_8] : memref<32x16xf32, #tpu.memory_space<vmem>>, vector<32x16xf32>
    %7 = vector.extract_strided_slice %5 {offsets = [0, 0], sizes = [16, 32], strides = [1, 1]} : vector<64x32xf32> to vector<16x32xf32>
    %cst_9 = arith.constant dense<0.000000e+00> : vector<32x32xf32>
    %8 = tpu.matmul %6, %7, %cst_9 {dimension_numbers = #tpu.dot_dimension_numbers<[1], [0], [0], [1], [0, 0, 1, 1], [], []>} : vector<32x16xf32>, vector<16x32xf32>, vector<32x32xf32> -> vector<32x32xf32>
    %9 = vector.extract_strided_slice %8 {offsets = [0, 0], sizes = [1, 32], strides = [1, 1]} : vector<32x32xf32> to vector<1x32xf32>
    %c0_10 = arith.constant 0 : index
    %c33 = arith.constant 33 : index
    %10 = vector.load %arg9[%c0_10, %c33] : memref<4x1090xf32, #tpu.memory_space<vmem>>, vector<1x32xf32>
    tpu.vector_store %arg9[%c0_10, %c33], %9 {strides = array<i32>} : memref<4x1090xf32, #tpu.memory_space<vmem>>, vector<1x32xf32>,
    %11 = vector.extract_strided_slice %8 {offsets = [1, 0], sizes = [1, 32], strides = [1, 1]} : vector<32x32xf32> to vector<1x32xf32>
    %c0_11 = arith.constant 0 : index
    %c65 = arith.constant 65 : index
    %12 = vector.load %arg9[%c0_11, %c65] : memref<4x1090xf32, #tpu.memory_space<vmem>>, vector<1x32xf32>
    tpu.vector_store %arg9[%c0_11, %c65], %11 {strides = array<i32>} : memref<4x1090xf32, #tpu.memory_space<vmem>>, vector<1x32xf32>,
    %13 = vector.extract_strided_slice %8 {offsets = [2, 0], sizes = [1, 32], strides = [1, 1]} : vector<32x32xf32> to vector<1x32xf32>
    %c0_12 = arith.constant 0 : index
    %c97 = arith.constant 97 : index
    %14 = vector.load %arg9[%c0_12, %c97] : memref<4x1090xf32, #tpu.memory_space<vmem>>, vector<1x32xf32>
    tpu.vector_store %arg9[%c0_12, %c97], %13 {strides = array<i32>} : memref<4x1090xf32, #tpu.memory_space<vmem>>, vector<1x32xf32>,
    %15 = vector.extract_strided_slice %8 {offsets = [3, 0], sizes = [1, 32], strides = [1, 1]} : vector<32x32xf32> to vector<1x32xf32>
    %c0_13 = arith.constant 0 : index
    %c129 = arith.constant 129 : index
    %16 = vector.load %arg9[%c0_13, %c129] : memref<4x1090xf32, #tpu.memory_space<vmem>>, vector<1x32xf32>
    tpu.vector_store %arg9[%c0_13, %c129], %15 {strides = array<i32>} : memref<4x1090xf32, #tpu.memory_space<vmem>>, vector<1x32xf32>,
    %17 = vector.extract_strided_slice %8 {offsets = [4, 0], sizes = [1, 32], strides = [1, 1]} : vector<32x32xf32> to vector<1x32xf32>
    %c0_14 = arith.constant 0 : index
    %c161 = arith.constant 161 : index
    %18 = vector.load %arg9[%c0_14, %c161] : memref<4x1090xf32, #tpu.memory_space<vmem>>, vector<1x32xf32>
    tpu.vector_store %arg9[%c0_14, %c161], %17 {strides = array<i32>} : memref<4x1090xf32, #tpu.memory_space<vmem>>, vector<1x32xf32>,
    %19 = vector.extract_strided_slice %8 {offsets = [5, 0], sizes = [1, 32], strides = [1, 1]} : vector<32x32xf32> to vector<1x32xf32>
    %c0_15 = arith.constant 0 : index
    %c193 = arith.constant 193 : index
    %20 = vector.load %arg9[%c0_15, %c193] : memref<4x1090xf32, #tpu.memory_space<vmem>>, vector<1x32xf32>
    tpu.vector_store %arg9[%c0_15, %c193], %19 {strides = array<i32>} : memref<4x1090xf32, #tpu.memory_space<vmem>>, vector<1x32xf32>,
    %21 = vector.extract_strided_slice %8 {offsets = [6, 0], sizes = [1, 32], strides = [1, 1]} : vector<32x32xf32> to vector<1x32xf32>
    %c0_16 = arith.constant 0 : index
    %c225 = arith.constant 225 : index
    %22 = vector.load %arg9[%c0_16, %c225] : memref<4x1090xf32, #tpu.memory_space<vmem>>, vector<1x32xf32>
    tpu.vector_store %arg9[%c0_16, %c225], %21 {strides = array<i32>} : memref<4x1090xf32, #tpu.memory_space<vmem>>, vector<1x32xf32>,
    %23 = vector.extract_strided_slice %8 {offsets = [7, 0], sizes = [1, 32], strides = [1, 1]} : vector<32x32xf32> to vector<1x32xf32>
    %c0_17 = arith.constant 0 : index
    %c257 = arith.constant 257 : index
    %24 = vector.load %arg9[%c0_17, %c257] : memref<4x1090xf32, #tpu.memory_space<vmem>>, vector<1x32xf32>
    tpu.vector_store %arg9[%c0_17, %c257], %23 {strides = array<i32>} : memref<4x1090xf32, #tpu.memory_space<vmem>>, vector<1x32xf32>,
    %25 = vector.extract_strided_slice %8 {offsets = [8, 0], sizes = [1, 32], strides = [1, 1]} : vector<32x32xf32> to vector<1x32xf32>
    %c0_18 = arith.constant 0 : index
    %c289 = arith.constant 289 : index
    %26 = vector.load %arg9[%c0_18, %c289] : memref<4x1090xf32, #tpu.memory_space<vmem>>, vector<1x32xf32>
    tpu.vector_store %arg9[%c0_18, %c289], %25 {strides = array<i32>} : memref<4x1090xf32, #tpu.memory_space<vmem>>, vector<1x32xf32>,
    %27 = vector.extract_strided_slice %8 {offsets = [9, 0], sizes = [1, 32], strides = [1, 1]} : vector<32x32xf32> to vector<1x32xf32>
    %c0_19 = arith.constant 0 : index
    %c321 = arith.constant 321 : index
    %28 = vector.load %arg9[%c0_19, %c321] : memref<4x1090xf32, #tpu.memory_space<vmem>>, vector<1x32xf32>
    tpu.vector_store %arg9[%c0_19, %c321], %27 {strides = array<i32>} : memref<4x1090xf32, #tpu.memory_space<vmem>>, vector<1x32xf32>,
    %29 = vector.extract_strided_slice %8 {offsets = [10, 0], sizes = [1, 32], strides = [1, 1]} : vector<32x32xf32> to vector<1x32xf32>
    %c0_20 = arith.constant 0 : index
    %c353 = arith.constant 353 : index
    %30 = vector.load %arg9[%c0_20, %c353] : memref<4x1090xf32, #tpu.memory_space<vmem>>, vector<1x32xf32>
    tpu.vector_store %arg9[%c0_20, %c353], %29 {strides = array<i32>} : memref<4x1090xf32, #tpu.memory_space<vmem>>, vector<1x32xf32>,
    %31 = vector.extract_strided_slice %8 {offsets = [11, 0], sizes = [1, 32], strides = [1, 1]} : vector<32x32xf32> to vector<1x32xf32>
    %c0_21 = arith.constant 0 : index
    %c385 = arith.constant 385 : index
    %32 = vector.load %arg9[%c0_21, %c385] : memref<4x1090xf32, #tpu.memory_space<vmem>>, vector<1x32xf32>
    tpu.vector_store %arg9[%c0_21, %c385], %31 {strides = array<i32>} : memref<4x1090xf32, #tpu.memory_space<vmem>>, vector<1x32xf32>,
    %33 = vector.extract_strided_slice %8 {offsets = [12, 0], sizes = [1, 32], strides = [1, 1]} : vector<32x32xf32> to vector<1x32xf32>
    %c0_22 = arith.constant 0 : index
    %c417 = arith.constant 417 : index
    %34 = vector.load %arg9[%c0_22, %c417] : memref<4x1090xf32, #tpu.memory_space<vmem>>, vector<1x32xf32>
    tpu.vector_store %arg9[%c0_22, %c417], %33 {strides = array<i32>} : memref<4x1090xf32, #tpu.memory_space<vmem>>, vector<1x32xf32>,
    %35 = vector.extract_strided_slice %8 {offsets = [13, 0], sizes = [1, 32], strides = [1, 1]} : vector<32x32xf32> to vector<1x32xf32>
    %c0_23 = arith.constant 0 : index
    %c449 = arith.constant 449 : index
    %36 = vector.load %arg9[%c0_23, %c449] : memref<4x1090xf32, #tpu.memory_space<vmem>>, vector<1x32xf32>
    tpu.vector_store %arg9[%c0_23, %c449], %35 {strides = array<i32>} : memref<4x1090xf32, #tpu.memory_space<vmem>>, vector<1x32xf32>,
    %37 = vector.extract_strided_slice %8 {offsets = [14, 0], sizes = [1, 32], strides = [1, 1]} : vector<32x32xf32> to vector<1x32xf32>
    %c0_24 = arith.constant 0 : index
    %c481 = arith.constant 481 : index
    %38 = vector.load %arg9[%c0_24, %c481] : memref<4x1090xf32, #tpu.memory_space<vmem>>, vector<1x32xf32>
    tpu.vector_store %arg9[%c0_24, %c481], %37 {strides = array<i32>} : memref<4x1090xf32, #tpu.memory_space<vmem>>, vector<1x32xf32>,
    %39 = vector.extract_strided_slice %8 {offsets = [15, 0], sizes = [1, 32], strides = [1, 1]} : vector<32x32xf32> to vector<1x32xf32>
    %c0_25 = arith.constant 0 : index
    %c513 = arith.constant 513 : index
    %40 = vector.load %arg9[%c0_25, %c513] : memref<4x1090xf32, #tpu.memory_space<vmem>>, vector<1x32xf32>
    tpu.vector_store %arg9[%c0_25, %c513], %39 {strides = array<i32>} : memref<4x1090xf32, #tpu.memory_space<vmem>>, vector<1x32xf32>,
    %41 = vector.extract_strided_slice %8 {offsets = [16, 0], sizes = [1, 32], strides = [1, 1]} : vector<32x32xf32> to vector<1x32xf32>
    %c0_26 = arith.constant 0 : index
    %c545 = arith.constant 545 : index
    %42 = vector.load %arg9[%c0_26, %c545] : memref<4x1090xf32, #tpu.memory_space<vmem>>, vector<1x32xf32>
    tpu.vector_store %arg9[%c0_26, %c545], %41 {strides = array<i32>} : memref<4x1090xf32, #tpu.memory_space<vmem>>, vector<1x32xf32>,
    %43 = vector.extract_strided_slice %8 {offsets = [17, 0], sizes = [1, 32], strides = [1, 1]} : vector<32x32xf32> to vector<1x32xf32>
    %c0_27 = arith.constant 0 : index
    %c577 = arith.constant 577 : index
    %44 = vector.load %arg9[%c0_27, %c577] : memref<4x1090xf32, #tpu.memory_space<vmem>>, vector<1x32xf32>
    tpu.vector_store %arg9[%c0_27, %c577], %43 {strides = array<i32>} : memref<4x1090xf32, #tpu.memory_space<vmem>>, vector<1x32xf32>,
    %45 = vector.extract_strided_slice %8 {offsets = [18, 0], sizes = [1, 32], strides = [1, 1]} : vector<32x32xf32> to vector<1x32xf32>
    %c0_28 = arith.constant 0 : index
    %c609 = arith.constant 609 : index
    %46 = vector.load %arg9[%c0_28, %c609] : memref<4x1090xf32, #tpu.memory_space<vmem>>, vector<1x32xf32>
    tpu.vector_store %arg9[%c0_28, %c609], %45 {strides = array<i32>} : memref<4x1090xf32, #tpu.memory_space<vmem>>, vector<1x32xf32>,
    %47 = vector.extract_strided_slice %8 {offsets = [19, 0], sizes = [1, 32], strides = [1, 1]} : vector<32x32xf32> to vector<1x32xf32>
    %c0_29 = arith.constant 0 : index
    %c641 = arith.constant 641 : index
    %48 = vector.load %arg9[%c0_29, %c641] : memref<4x1090xf32, #tpu.memory_space<vmem>>, vector<1x32xf32>
    tpu.vector_store %arg9[%c0_29, %c641], %47 {strides = array<i32>} : memref<4x1090xf32, #tpu.memory_space<vmem>>, vector<1x32xf32>,
    %49 = vector.extract_strided_slice %8 {offsets = [20, 0], sizes = [1, 32], strides = [1, 1]} : vector<32x32xf32> to vector<1x32xf32>
    %c0_30 = arith.constant 0 : index
    %c673 = arith.constant 673 : index
    %50 = vector.load %arg9[%c0_30, %c673] : memref<4x1090xf32, #tpu.memory_space<vmem>>, vector<1x32xf32>
    tpu.vector_store %arg9[%c0_30, %c673], %49 {strides = array<i32>} : memref<4x1090xf32, #tpu.memory_space<vmem>>, vector<1x32xf32>,
    %51 = vector.extract_strided_slice %8 {offsets = [21, 0], sizes = [1, 32], strides = [1, 1]} : vector<32x32xf32> to vector<1x32xf32>
    %c0_31 = arith.constant 0 : index
    %c705 = arith.constant 705 : index
    %52 = vector.load %arg9[%c0_31, %c705] : memref<4x1090xf32, #tpu.memory_space<vmem>>, vector<1x32xf32>
    tpu.vector_store %arg9[%c0_31, %c705], %51 {strides = array<i32>} : memref<4x1090xf32, #tpu.memory_space<vmem>>, vector<1x32xf32>,
    %53 = vector.extract_strided_slice %8 {offsets = [22, 0], sizes = [1, 32], strides = [1, 1]} : vector<32x32xf32> to vector<1x32xf32>
    %c0_32 = arith.constant 0 : index
    %c737 = arith.constant 737 : index
    %54 = vector.load %arg9[%c0_32, %c737] : memref<4x1090xf32, #tpu.memory_space<vmem>>, vector<1x32xf32>
    tpu.vector_store %arg9[%c0_32, %c737], %53 {strides = array<i32>} : memref<4x1090xf32, #tpu.memory_space<vmem>>, vector<1x32xf32>,
    %55 = vector.extract_strided_slice %8 {offsets = [23, 0], sizes = [1, 32], strides = [1, 1]} : vector<32x32xf32> to vector<1x32xf32>
    %c0_33 = arith.constant 0 : index
    %c769 = arith.constant 769 : index
    %56 = vector.load %arg9[%c0_33, %c769] : memref<4x1090xf32, #tpu.memory_space<vmem>>, vector<1x32xf32>
    tpu.vector_store %arg9[%c0_33, %c769], %55 {strides = array<i32>} : memref<4x1090xf32, #tpu.memory_space<vmem>>, vector<1x32xf32>,
    %57 = vector.extract_strided_slice %8 {offsets = [24, 0], sizes = [1, 32], strides = [1, 1]} : vector<32x32xf32> to vector<1x32xf32>
    %c0_34 = arith.constant 0 : index
    %c801 = arith.constant 801 : index
    %58 = vector.load %arg9[%c0_34, %c801] : memref<4x1090xf32, #tpu.memory_space<vmem>>, vector<1x32xf32>
    tpu.vector_store %arg9[%c0_34, %c801], %57 {strides = array<i32>} : memref<4x1090xf32, #tpu.memory_space<vmem>>, vector<1x32xf32>,
    %59 = vector.extract_strided_slice %8 {offsets = [25, 0], sizes = [1, 32], strides = [1, 1]} : vector<32x32xf32> to vector<1x32xf32>
    %c0_35 = arith.constant 0 : index
    %c833 = arith.constant 833 : index
    %60 = vector.load %arg9[%c0_35, %c833] : memref<4x1090xf32, #tpu.memory_space<vmem>>, vector<1x32xf32>
    tpu.vector_store %arg9[%c0_35, %c833], %59 {strides = array<i32>} : memref<4x1090xf32, #tpu.memory_space<vmem>>, vector<1x32xf32>,
    %61 = vector.extract_strided_slice %8 {offsets = [26, 0], sizes = [1, 32], strides = [1, 1]} : vector<32x32xf32> to vector<1x32xf32>
    %c0_36 = arith.constant 0 : index
    %c865 = arith.constant 865 : index
    %62 = vector.load %arg9[%c0_36, %c865] : memref<4x1090xf32, #tpu.memory_space<vmem>>, vector<1x32xf32>
    tpu.vector_store %arg9[%c0_36, %c865], %61 {strides = array<i32>} : memref<4x1090xf32, #tpu.memory_space<vmem>>, vector<1x32xf32>,
    %63 = vector.extract_strided_slice %8 {offsets = [27, 0], sizes = [1, 32], strides = [1, 1]} : vector<32x32xf32> to vector<1x32xf32>
    %c0_37 = arith.constant 0 : index
    %c897 = arith.constant 897 : index
    %64 = vector.load %arg9[%c0_37, %c897] : memref<4x1090xf32, #tpu.memory_space<vmem>>, vector<1x32xf32>
    tpu.vector_store %arg9[%c0_37, %c897], %63 {strides = array<i32>} : memref<4x1090xf32, #tpu.memory_space<vmem>>, vector<1x32xf32>,
    %65 = vector.extract_strided_slice %8 {offsets = [28, 0], sizes = [1, 32], strides = [1, 1]} : vector<32x32xf32> to vector<1x32xf32>
    %c0_38 = arith.constant 0 : index
    %c929 = arith.constant 929 : index
    %66 = vector.load %arg9[%c0_38, %c929] : memref<4x1090xf32, #tpu.memory_space<vmem>>, vector<1x32xf32>
    tpu.vector_store %arg9[%c0_38, %c929], %65 {strides = array<i32>} : memref<4x1090xf32, #tpu.memory_space<vmem>>, vector<1x32xf32>,
    %67 = vector.extract_strided_slice %8 {offsets = [29, 0], sizes = [1, 32], strides = [1, 1]} : vector<32x32xf32> to vector<1x32xf32>
    %c0_39 = arith.constant 0 : index
    %c961 = arith.constant 961 : index
    %68 = vector.load %arg9[%c0_39, %c961] : memref<4x1090xf32, #tpu.memory_space<vmem>>, vector<1x32xf32>
    tpu.vector_store %arg9[%c0_39, %c961], %67 {strides = array<i32>} : memref<4x1090xf32, #tpu.memory_space<vmem>>, vector<1x32xf32>,
    %69 = vector.extract_strided_slice %8 {offsets = [30, 0], sizes = [1, 32], strides = [1, 1]} : vector<32x32xf32> to vector<1x32xf32>
    %c0_40 = arith.constant 0 : index
    %c993 = arith.constant 993 : index
    %70 = vector.load %arg9[%c0_40, %c993] : memref<4x1090xf32, #tpu.memory_space<vmem>>, vector<1x32xf32>
    tpu.vector_store %arg9[%c0_40, %c993], %69 {strides = array<i32>} : memref<4x1090xf32, #tpu.memory_space<vmem>>, vector<1x32xf32>,
    %71 = vector.extract_strided_slice %8 {offsets = [31, 0], sizes = [1, 32], strides = [1, 1]} : vector<32x32xf32> to vector<1x32xf32>
    %c0_41 = arith.constant 0 : index
    %c1025 = arith.constant 1025 : index
    %72 = vector.load %arg9[%c0_41, %c1025] : memref<4x1090xf32, #tpu.memory_space<vmem>>, vector<1x32xf32>
    tpu.vector_store %arg9[%c0_41, %c1025], %71 {strides = array<i32>} : memref<4x1090xf32, #tpu.memory_space<vmem>>, vector<1x32xf32>,
    %c0_42 = arith.constant 0 : index
    %c0_43 = arith.constant 0 : index
    %73 = vector.load %arg2[%c0_42, %c0_43] : memref<32x16xf32, #tpu.memory_space<vmem>>, vector<32x16xf32>
    %74 = vector.extract_strided_slice %5 {offsets = [16, 0], sizes = [16, 32], strides = [1, 1]} : vector<64x32xf32> to vector<16x32xf32>
    %cst_44 = arith.constant dense<0.000000e+00> : vector<32x32xf32>
    %75 = tpu.matmul %73, %74, %cst_44 {dimension_numbers = #tpu.dot_dimension_numbers<[1], [0], [0], [1], [0, 0, 1, 1], [], []>} : vector<32x16xf32>, vector<16x32xf32>, vector<32x32xf32> -> vector<32x32xf32>
    %76 = vector.extract_strided_slice %75 {offsets = [0, 0], sizes = [1, 32], strides = [1, 1]} : vector<32x32xf32> to vector<1x32xf32>
    %c1 = arith.constant 1 : index
    %c33_45 = arith.constant 33 : index
    %77 = vector.load %arg9[%c1, %c33_45] : memref<4x1090xf32, #tpu.memory_space<vmem>>, vector<1x32xf32>
    tpu.vector_store %arg9[%c1, %c33_45], %76 {strides = array<i32>} : memref<4x1090xf32, #tpu.memory_space<vmem>>, vector<1x32xf32>,
    %78 = vector.extract_strided_slice %75 {offsets = [1, 0], sizes = [1, 32], strides = [1, 1]} : vector<32x32xf32> to vector<1x32xf32>
    %c1_46 = arith.constant 1 : index
    %c65_47 = arith.constant 65 : index
    %79 = vector.load %arg9[%c1_46, %c65_47] : memref<4x1090xf32, #tpu.memory_space<vmem>>, vector<1x32xf32>
    tpu.vector_store %arg9[%c1_46, %c65_47], %78 {strides = array<i32>} : memref<4x1090xf32, #tpu.memory_space<vmem>>, vector<1x32xf32>,
    %80 = vector.extract_strided_slice %75 {offsets = [2, 0], sizes = [1, 32], strides = [1, 1]} : vector<32x32xf32> to vector<1x32xf32>
    %c1_48 = arith.constant 1 : index
    %c97_49 = arith.constant 97 : index
    %81 = vector.load %arg9[%c1_48, %c97_49] : memref<4x1090xf32, #tpu.memory_space<vmem>>, vector<1x32xf32>
    tpu.vector_store %arg9[%c1_48, %c97_49], %80 {strides = array<i32>} : memref<4x1090xf32, #tpu.memory_space<vmem>>, vector<1x32xf32>,
    %82 = vector.extract_strided_slice %75 {offsets = [3, 0], sizes = [1, 32], strides = [1, 1]} : vector<32x32xf32> to vector<1x32xf32>
    %c1_50 = arith.constant 1 : index
    %c129_51 = arith.constant 129 : index
    %83 = vector.load %arg9[%c1_50, %c129_51] : memref<4x1090xf32, #tpu.memory_space<vmem>>, vector<1x32xf32>
    tpu.vector_store %arg9[%c1_50, %c129_51], %82 {strides = array<i32>} : memref<4x1090xf32, #tpu.memory_space<vmem>>, vector<1x32xf32>,
    %84 = vector.extract_strided_slice %75 {offsets = [4, 0], sizes = [1, 32], strides = [1, 1]} : vector<32x32xf32> to vector<1x32xf32>
    %c1_52 = arith.constant 1 : index
    %c161_53 = arith.constant 161 : index
    %85 = vector.load %arg9[%c1_52, %c161_53] : memref<4x1090xf32, #tpu.memory_space<vmem>>, vector<1x32xf32>
    tpu.vector_store %arg9[%c1_52, %c161_53], %84 {strides = array<i32>} : memref<4x1090xf32, #tpu.memory_space<vmem>>, vector<1x32xf32>,
    %86 = vector.extract_strided_slice %75 {offsets = [5, 0], sizes = [1, 32], strides = [1, 1]} : vector<32x32xf32> to vector<1x32xf32>
    %c1_54 = arith.constant 1 : index
    %c193_55 = arith.constant 193 : index
    %87 = vector.load %arg9[%c1_54, %c193_55] : memref<4x1090xf32, #tpu.memory_space<vmem>>, vector<1x32xf32>
    tpu.vector_store %arg9[%c1_54, %c193_55], %86 {strides = array<i32>} : memref<4x1090xf32, #tpu.memory_space<vmem>>, vector<1x32xf32>,
    %88 = vector.extract_strided_slice %75 {offsets = [6, 0], sizes = [1, 32], strides = [1, 1]} : vector<32x32xf32> to vector<1x32xf32>
    %c1_56 = arith.constant 1 : index
    %c225_57 = arith.constant 225 : index
    %89 = vector.load %arg9[%c1_56, %c225_57] : memref<4x1090xf32, #tpu.memory_space<vmem>>, vector<1x32xf32>
    tpu.vector_store %arg9[%c1_56, %c225_57], %88 {strides = array<i32>} : memref<4x1090xf32, #tpu.memory_space<vmem>>, vector<1x32xf32>,
    %90 = vector.extract_strided_slice %75 {offsets = [7, 0], sizes = [1, 32], strides = [1, 1]} : vector<32x32xf32> to vector<1x32xf32>
    %c1_58 = arith.constant 1 : index
    %c257_59 = arith.constant 257 : index
    %91 = vector.load %arg9[%c1_58, %c257_59] : memref<4x1090xf32, #tpu.memory_space<vmem>>, vector<1x32xf32>
    tpu.vector_store %arg9[%c1_58, %c257_59], %90 {strides = array<i32>} : memref<4x1090xf32, #tpu.memory_space<vmem>>, vector<1x32xf32>,
    %92 = vector.extract_strided_slice %75 {offsets = [8, 0], sizes = [1, 32], strides = [1, 1]} : vector<32x32xf32> to vector<1x32xf32>
    %c1_60 = arith.constant 1 : index
    %c289_61 = arith.constant 289 : index
    %93 = vector.load %arg9[%c1_60, %c289_61] : memref<4x1090xf32, #tpu.memory_space<vmem>>, vector<1x32xf32>
    tpu.vector_store %arg9[%c1_60, %c289_61], %92 {strides = array<i32>} : memref<4x1090xf32, #tpu.memory_space<vmem>>, vector<1x32xf32>,
    %94 = vector.extract_strided_slice %75 {offsets = [9, 0], sizes = [1, 32], strides = [1, 1]} : vector<32x32xf32> to vector<1x32xf32>
    %c1_62 = arith.constant 1 : index
    %c321_63 = arith.constant 321 : index
    %95 = vector.load %arg9[%c1_62, %c321_63] : memref<4x1090xf32, #tpu.memory_space<vmem>>, vector<1x32xf32>
    tpu.vector_store %arg9[%c1_62, %c321_63], %94 {strides = array<i32>} : memref<4x1090xf32, #tpu.memory_space<vmem>>, vector<1x32xf32>,
    %96 = vector.extract_strided_slice %75 {offsets = [10, 0], sizes = [1, 32], strides = [1, 1]} : vector<32x32xf32> to vector<1x32xf32>
    %c1_64 = arith.constant 1 : index
    %c353_65 = arith.constant 353 : index
    %97 = vector.load %arg9[%c1_64, %c353_65] : memref<4x1090xf32, #tpu.memory_space<vmem>>, vector<1x32xf32>
    tpu.vector_store %arg9[%c1_64, %c353_65], %96 {strides = array<i32>} : memref<4x1090xf32, #tpu.memory_space<vmem>>, vector<1x32xf32>,
    %98 = vector.extract_strided_slice %75 {offsets = [11, 0], sizes = [1, 32], strides = [1, 1]} : vector<32x32xf32> to vector<1x32xf32>
    %c1_66 = arith.constant 1 : index
    %c385_67 = arith.constant 385 : index
    %99 = vector.load %arg9[%c1_66, %c385_67] : memref<4x1090xf32, #tpu.memory_space<vmem>>, vector<1x32xf32>
    tpu.vector_store %arg9[%c1_66, %c385_67], %98 {strides = array<i32>} : memref<4x1090xf32, #tpu.memory_space<vmem>>, vector<1x32xf32>,
    %100 = vector.extract_strided_slice %75 {offsets = [12, 0], sizes = [1, 32], strides = [1, 1]} : vector<32x32xf32> to vector<1x32xf32>
    %c1_68 = arith.constant 1 : index
    %c417_69 = arith.constant 417 : index
    %101 = vector.load %arg9[%c1_68, %c417_69] : memref<4x1090xf32, #tpu.memory_space<vmem>>, vector<1x32xf32>
    tpu.vector_store %arg9[%c1_68, %c417_69], %100 {strides = array<i32>} : memref<4x1090xf32, #tpu.memory_space<vmem>>, vector<1x32xf32>,
    %102 = vector.extract_strided_slice %75 {offsets = [13, 0], sizes = [1, 32], strides = [1, 1]} : vector<32x32xf32> to vector<1x32xf32>
    %c1_70 = arith.constant 1 : index
    %c449_71 = arith.constant 449 : index
    %103 = vector.load %arg9[%c1_70, %c449_71] : memref<4x1090xf32, #tpu.memory_space<vmem>>, vector<1x32xf32>
    tpu.vector_store %arg9[%c1_70, %c449_71], %102 {strides = array<i32>} : memref<4x1090xf32, #tpu.memory_space<vmem>>, vector<1x32xf32>,
    %104 = vector.extract_strided_slice %75 {offsets = [14, 0], sizes = [1, 32], strides = [1, 1]} : vector<32x32xf32> to vector<1x32xf32>
    %c1_72 = arith.constant 1 : index
    %c481_73 = arith.constant 481 : index
    %105 = vector.load %arg9[%c1_72, %c481_73] : memref<4x1090xf32, #tpu.memory_space<vmem>>, vector<1x32xf32>
    tpu.vector_store %arg9[%c1_72, %c481_73], %104 {strides = array<i32>} : memref<4x1090xf32, #tpu.memory_space<vmem>>, vector<1x32xf32>,
    %106 = vector.extract_strided_slice %75 {offsets = [15, 0], sizes = [1, 32], strides = [1, 1]} : vector<32x32xf32> to vector<1x32xf32>
    %c1_74 = arith.constant 1 : index
    %c513_75 = arith.constant 513 : index
    %107 = vector.load %arg9[%c1_74, %c513_75] : memref<4x1090xf32, #tpu.memory_space<vmem>>, vector<1x32xf32>
    tpu.vector_store %arg9[%c1_74, %c513_75], %106 {strides = array<i32>} : memref<4x1090xf32, #tpu.memory_space<vmem>>, vector<1x32xf32>,
    %108 = vector.extract_strided_slice %75 {offsets = [16, 0], sizes = [1, 32], strides = [1, 1]} : vector<32x32xf32> to vector<1x32xf32>
    %c1_76 = arith.constant 1 : index
    %c545_77 = arith.constant 545 : index
    %109 = vector.load %arg9[%c1_76, %c545_77] : memref<4x1090xf32, #tpu.memory_space<vmem>>, vector<1x32xf32>
    tpu.vector_store %arg9[%c1_76, %c545_77], %108 {strides = array<i32>} : memref<4x1090xf32, #tpu.memory_space<vmem>>, vector<1x32xf32>,
    %110 = vector.extract_strided_slice %75 {offsets = [17, 0], sizes = [1, 32], strides = [1, 1]} : vector<32x32xf32> to vector<1x32xf32>
    %c1_78 = arith.constant 1 : index
    %c577_79 = arith.constant 577 : index
    %111 = vector.load %arg9[%c1_78, %c577_79] : memref<4x1090xf32, #tpu.memory_space<vmem>>, vector<1x32xf32>
    tpu.vector_store %arg9[%c1_78, %c577_79], %110 {strides = array<i32>} : memref<4x1090xf32, #tpu.memory_space<vmem>>, vector<1x32xf32>,
    %112 = vector.extract_strided_slice %75 {offsets = [18, 0], sizes = [1, 32], strides = [1, 1]} : vector<32x32xf32> to vector<1x32xf32>
    %c1_80 = arith.constant 1 : index
    %c609_81 = arith.constant 609 : index
    %113 = vector.load %arg9[%c1_80, %c609_81] : memref<4x1090xf32, #tpu.memory_space<vmem>>, vector<1x32xf32>
    tpu.vector_store %arg9[%c1_80, %c609_81], %112 {strides = array<i32>} : memref<4x1090xf32, #tpu.memory_space<vmem>>, vector<1x32xf32>,
    %114 = vector.extract_strided_slice %75 {offsets = [19, 0], sizes = [1, 32], strides = [1, 1]} : vector<32x32xf32> to vector<1x32xf32>
    %c1_82 = arith.constant 1 : index
    %c641_83 = arith.constant 641 : index
    %115 = vector.load %arg9[%c1_82, %c641_83] : memref<4x1090xf32, #tpu.memory_space<vmem>>, vector<1x32xf32>
    tpu.vector_store %arg9[%c1_82, %c641_83], %114 {strides = array<i32>} : memref<4x1090xf32, #tpu.memory_space<vmem>>, vector<1x32xf32>,
    %116 = vector.extract_strided_slice %75 {offsets = [20, 0], sizes = [1, 32], strides = [1, 1]} : vector<32x32xf32> to vector<1x32xf32>
    %c1_84 = arith.constant 1 : index
    %c673_85 = arith.constant 673 : index
    %117 = vector.load %arg9[%c1_84, %c673_85] : memref<4x1090xf32, #tpu.memory_space<vmem>>, vector<1x32xf32>
    tpu.vector_store %arg9[%c1_84, %c673_85], %116 {strides = array<i32>} : memref<4x1090xf32, #tpu.memory_space<vmem>>, vector<1x32xf32>,
    %118 = vector.extract_strided_slice %75 {offsets = [21, 0], sizes = [1, 32], strides = [1, 1]} : vector<32x32xf32> to vector<1x32xf32>
    %c1_86 = arith.constant 1 : index
    %c705_87 = arith.constant 705 : index
    %119 = vector.load %arg9[%c1_86, %c705_87] : memref<4x1090xf32, #tpu.memory_space<vmem>>, vector<1x32xf32>
    tpu.vector_store %arg9[%c1_86, %c705_87], %118 {strides = array<i32>} : memref<4x1090xf32, #tpu.memory_space<vmem>>, vector<1x32xf32>,
    %120 = vector.extract_strided_slice %75 {offsets = [22, 0], sizes = [1, 32], strides = [1, 1]} : vector<32x32xf32> to vector<1x32xf32>
    %c1_88 = arith.constant 1 : index
    %c737_89 = arith.constant 737 : index
    %121 = vector.load %arg9[%c1_88, %c737_89] : memref<4x1090xf32, #tpu.memory_space<vmem>>, vector<1x32xf32>
    tpu.vector_store %arg9[%c1_88, %c737_89], %120 {strides = array<i32>} : memref<4x1090xf32, #tpu.memory_space<vmem>>, vector<1x32xf32>,
    %122 = vector.extract_strided_slice %75 {offsets = [23, 0], sizes = [1, 32], strides = [1, 1]} : vector<32x32xf32> to vector<1x32xf32>
    %c1_90 = arith.constant 1 : index
    %c769_91 = arith.constant 769 : index
    %123 = vector.load %arg9[%c1_90, %c769_91] : memref<4x1090xf32, #tpu.memory_space<vmem>>, vector<1x32xf32>
    tpu.vector_store %arg9[%c1_90, %c769_91], %122 {strides = array<i32>} : memref<4x1090xf32, #tpu.memory_space<vmem>>, vector<1x32xf32>,
    %124 = vector.extract_strided_slice %75 {offsets = [24, 0], sizes = [1, 32], strides = [1, 1]} : vector<32x32xf32> to vector<1x32xf32>
    %c1_92 = arith.constant 1 : index
    %c801_93 = arith.constant 801 : index
    %125 = vector.load %arg9[%c1_92, %c801_93] : memref<4x1090xf32, #tpu.memory_space<vmem>>, vector<1x32xf32>
    tpu.vector_store %arg9[%c1_92, %c801_93], %124 {strides = array<i32>} : memref<4x1090xf32, #tpu.memory_space<vmem>>, vector<1x32xf32>,
    %126 = vector.extract_strided_slice %75 {offsets = [25, 0], sizes = [1, 32], strides = [1, 1]} : vector<32x32xf32> to vector<1x32xf32>
    %c1_94 = arith.constant 1 : index
    %c833_95 = arith.constant 833 : index
    %127 = vector.load %arg9[%c1_94, %c833_95] : memref<4x1090xf32, #tpu.memory_space<vmem>>, vector<1x32xf32>
    tpu.vector_store %arg9[%c1_94, %c833_95], %126 {strides = array<i32>} : memref<4x1090xf32, #tpu.memory_space<vmem>>, vector<1x32xf32>,
    %128 = vector.extract_strided_slice %75 {offsets = [26, 0], sizes = [1, 32], strides = [1, 1]} : vector<32x32xf32> to vector<1x32xf32>
    %c1_96 = arith.constant 1 : index
    %c865_97 = arith.constant 865 : index
    %129 = vector.load %arg9[%c1_96, %c865_97] : memref<4x1090xf32, #tpu.memory_space<vmem>>, vector<1x32xf32>
    tpu.vector_store %arg9[%c1_96, %c865_97], %128 {strides = array<i32>} : memref<4x1090xf32, #tpu.memory_space<vmem>>, vector<1x32xf32>,
    %130 = vector.extract_strided_slice %75 {offsets = [27, 0], sizes = [1, 32], strides = [1, 1]} : vector<32x32xf32> to vector<1x32xf32>
    %c1_98 = arith.constant 1 : index
    %c897_99 = arith.constant 897 : index
    %131 = vector.load %arg9[%c1_98, %c897_99] : memref<4x1090xf32, #tpu.memory_space<vmem>>, vector<1x32xf32>
    tpu.vector_store %arg9[%c1_98, %c897_99], %130 {strides = array<i32>} : memref<4x1090xf32, #tpu.memory_space<vmem>>, vector<1x32xf32>,
    %132 = vector.extract_strided_slice %75 {offsets = [28, 0], sizes = [1, 32], strides = [1, 1]} : vector<32x32xf32> to vector<1x32xf32>
    %c1_100 = arith.constant 1 : index
    %c929_101 = arith.constant 929 : index
    %133 = vector.load %arg9[%c1_100, %c929_101] : memref<4x1090xf32, #tpu.memory_space<vmem>>, vector<1x32xf32>
    tpu.vector_store %arg9[%c1_100, %c929_101], %132 {strides = array<i32>} : memref<4x1090xf32, #tpu.memory_space<vmem>>, vector<1x32xf32>,
    %134 = vector.extract_strided_slice %75 {offsets = [29, 0], sizes = [1, 32], strides = [1, 1]} : vector<32x32xf32> to vector<1x32xf32>
    %c1_102 = arith.constant 1 : index
    %c961_103 = arith.constant 961 : index
    %135 = vector.load %arg9[%c1_102, %c961_103] : memref<4x1090xf32, #tpu.memory_space<vmem>>, vector<1x32xf32>
    tpu.vector_store %arg9[%c1_102, %c961_103], %134 {strides = array<i32>} : memref<4x1090xf32, #tpu.memory_space<vmem>>, vector<1x32xf32>,
    %136 = vector.extract_strided_slice %75 {offsets = [30, 0], sizes = [1, 32], strides = [1, 1]} : vector<32x32xf32> to vector<1x32xf32>
    %c1_104 = arith.constant 1 : index
    %c993_105 = arith.constant 993 : index
    %137 = vector.load %arg9[%c1_104, %c993_105] : memref<4x1090xf32, #tpu.memory_space<vmem>>, vector<1x32xf32>
    tpu.vector_store %arg9[%c1_104, %c993_105], %136 {strides = array<i32>} : memref<4x1090xf32, #tpu.memory_space<vmem>>, vector<1x32xf32>,
    %138 = vector.extract_strided_slice %75 {offsets = [31, 0], sizes = [1, 32], strides = [1, 1]} : vector<32x32xf32> to vector<1x32xf32>
    %c1_106 = arith.constant 1 : index
    %c1025_107 = arith.constant 1025 : index
    %139 = vector.load %arg9[%c1_106, %c1025_107] : memref<4x1090xf32, #tpu.memory_space<vmem>>, vector<1x32xf32>
    tpu.vector_store %arg9[%c1_106, %c1025_107], %138 {strides = array<i32>} : memref<4x1090xf32, #tpu.memory_space<vmem>>, vector<1x32xf32>,
    %c0_108 = arith.constant 0 : index
    %c0_109 = arith.constant 0 : index
    %140 = vector.load %arg2[%c0_108, %c0_109] : memref<32x16xf32, #tpu.memory_space<vmem>>, vector<32x16xf32>
    %141 = vector.extract_strided_slice %5 {offsets = [32, 0], sizes = [16, 32], strides = [1, 1]} : vector<64x32xf32> to vector<16x32xf32>
    %cst_110 = arith.constant dense<0.000000e+00> : vector<32x32xf32>
    %142 = tpu.matmul %140, %141, %cst_110 {dimension_numbers = #tpu.dot_dimension_numbers<[1], [0], [0], [1], [0, 0, 1, 1], [], []>} : vector<32x16xf32>, vector<16x32xf32>, vector<32x32xf32> -> vector<32x32xf32>
    %143 = vector.extract_strided_slice %142 {offsets = [0, 0], sizes = [1, 32], strides = [1, 1]} : vector<32x32xf32> to vector<1x32xf32>
    %c2 = arith.constant 2 : index
    %c33_111 = arith.constant 33 : index
    %144 = vector.load %arg9[%c2, %c33_111] : memref<4x1090xf32, #tpu.memory_space<vmem>>, vector<1x32xf32>
    tpu.vector_store %arg9[%c2, %c33_111], %143 {strides = array<i32>} : memref<4x1090xf32, #tpu.memory_space<vmem>>, vector<1x32xf32>,
    %145 = vector.extract_strided_slice %142 {offsets = [1, 0], sizes = [1, 32], strides = [1, 1]} : vector<32x32xf32> to vector<1x32xf32>
    %c2_112 = arith.constant 2 : index
    %c65_113 = arith.constant 65 : index
    %146 = vector.load %arg9[%c2_112, %c65_113] : memref<4x1090xf32, #tpu.memory_space<vmem>>, vector<1x32xf32>
    tpu.vector_store %arg9[%c2_112, %c65_113], %145 {strides = array<i32>} : memref<4x1090xf32, #tpu.memory_space<vmem>>, vector<1x32xf32>,
    %147 = vector.extract_strided_slice %142 {offsets = [2, 0], sizes = [1, 32], strides = [1, 1]} : vector<32x32xf32> to vector<1x32xf32>
    %c2_114 = arith.constant 2 : index
    %c97_115 = arith.constant 97 : index
    %148 = vector.load %arg9[%c2_114, %c97_115] : memref<4x1090xf32, #tpu.memory_space<vmem>>, vector<1x32xf32>
    tpu.vector_store %arg9[%c2_114, %c97_115], %147 {strides = array<i32>} : memref<4x1090xf32, #tpu.memory_space<vmem>>, vector<1x32xf32>,
    %149 = vector.extract_strided_slice %142 {offsets = [3, 0], sizes = [1, 32], strides = [1, 1]} : vector<32x32xf32> to vector<1x32xf32>
    %c2_116 = arith.constant 2 : index
    %c129_117 = arith.constant 129 : index
    %150 = vector.load %arg9[%c2_116, %c129_117] : memref<4x1090xf32, #tpu.memory_space<vmem>>, vector<1x32xf32>
    tpu.vector_store %arg9[%c2_116, %c129_117], %149 {strides = array<i32>} : memref<4x1090xf32, #tpu.memory_space<vmem>>, vector<1x32xf32>,
    %151 = vector.extract_strided_slice %142 {offsets = [4, 0], sizes = [1, 32], strides = [1, 1]} : vector<32x32xf32> to vector<1x32xf32>
    %c2_118 = arith.constant 2 : index
    %c161_119 = arith.constant 161 : index
    %152 = vector.load %arg9[%c2_118, %c161_119] : memref<4x1090xf32, #tpu.memory_space<vmem>>, vector<1x32xf32>
    tpu.vector_store %arg9[%c2_118, %c161_119], %151 {strides = array<i32>} : memref<4x1090xf32, #tpu.memory_space<vmem>>, vector<1x32xf32>,
    %153 = vector.extract_strided_slice %142 {offsets = [5, 0], sizes = [1, 32], strides = [1, 1]} : vector<32x32xf32> to vector<1x32xf32>
    %c2_120 = arith.constant 2 : index
    %c193_121 = arith.constant 193 : index
    %154 = vector.load %arg9[%c2_120, %c193_121] : memref<4x1090xf32, #tpu.memory_space<vmem>>, vector<1x32xf32>
    tpu.vector_store %arg9[%c2_120, %c193_121], %153 {strides = array<i32>} : memref<4x1090xf32, #tpu.memory_space<vmem>>, vector<1x32xf32>,
    %155 = vector.extract_strided_slice %142 {offsets = [6, 0], sizes = [1, 32], strides = [1, 1]} : vector<32x32xf32> to vector<1x32xf32>
    %c2_122 = arith.constant 2 : index
    %c225_123 = arith.constant 225 : index
    %156 = vector.load %arg9[%c2_122, %c225_123] : memref<4x1090xf32, #tpu.memory_space<vmem>>, vector<1x32xf32>
    tpu.vector_store %arg9[%c2_122, %c225_123], %155 {strides = array<i32>} : memref<4x1090xf32, #tpu.memory_space<vmem>>, vector<1x32xf32>,
    %157 = vector.extract_strided_slice %142 {offsets = [7, 0], sizes = [1, 32], strides = [1, 1]} : vector<32x32xf32> to vector<1x32xf32>
    %c2_124 = arith.constant 2 : index
    %c257_125 = arith.constant 257 : index
    %158 = vector.load %arg9[%c2_124, %c257_125] : memref<4x1090xf32, #tpu.memory_space<vmem>>, vector<1x32xf32>
    tpu.vector_store %arg9[%c2_124, %c257_125], %157 {strides = array<i32>} : memref<4x1090xf32, #tpu.memory_space<vmem>>, vector<1x32xf32>,
    %159 = vector.extract_strided_slice %142 {offsets = [8, 0], sizes = [1, 32], strides = [1, 1]} : vector<32x32xf32> to vector<1x32xf32>
    %c2_126 = arith.constant 2 : index
    %c289_127 = arith.constant 289 : index
    %160 = vector.load %arg9[%c2_126, %c289_127] : memref<4x1090xf32, #tpu.memory_space<vmem>>, vector<1x32xf32>
    tpu.vector_store %arg9[%c2_126, %c289_127], %159 {strides = array<i32>} : memref<4x1090xf32, #tpu.memory_space<vmem>>, vector<1x32xf32>,
    %161 = vector.extract_strided_slice %142 {offsets = [9, 0], sizes = [1, 32], strides = [1, 1]} : vector<32x32xf32> to vector<1x32xf32>
    %c2_128 = arith.constant 2 : index
    %c321_129 = arith.constant 321 : index
    %162 = vector.load %arg9[%c2_128, %c321_129] : memref<4x1090xf32, #tpu.memory_space<vmem>>, vector<1x32xf32>
    tpu.vector_store %arg9[%c2_128, %c321_129], %161 {strides = array<i32>} : memref<4x1090xf32, #tpu.memory_space<vmem>>, vector<1x32xf32>,
    %163 = vector.extract_strided_slice %142 {offsets = [10, 0], sizes = [1, 32], strides = [1, 1]} : vector<32x32xf32> to vector<1x32xf32>
    %c2_130 = arith.constant 2 : index
    %c353_131 = arith.constant 353 : index
    %164 = vector.load %arg9[%c2_130, %c353_131] : memref<4x1090xf32, #tpu.memory_space<vmem>>, vector<1x32xf32>
    tpu.vector_store %arg9[%c2_130, %c353_131], %163 {strides = array<i32>} : memref<4x1090xf32, #tpu.memory_space<vmem>>, vector<1x32xf32>,
    %165 = vector.extract_strided_slice %142 {offsets = [11, 0], sizes = [1, 32], strides = [1, 1]} : vector<32x32xf32> to vector<1x32xf32>
    %c2_132 = arith.constant 2 : index
    %c385_133 = arith.constant 385 : index
    %166 = vector.load %arg9[%c2_132, %c385_133] : memref<4x1090xf32, #tpu.memory_space<vmem>>, vector<1x32xf32>
    tpu.vector_store %arg9[%c2_132, %c385_133], %165 {strides = array<i32>} : memref<4x1090xf32, #tpu.memory_space<vmem>>, vector<1x32xf32>,
    %167 = vector.extract_strided_slice %142 {offsets = [12, 0], sizes = [1, 32], strides = [1, 1]} : vector<32x32xf32> to vector<1x32xf32>
    %c2_134 = arith.constant 2 : index
    %c417_135 = arith.constant 417 : index
    %168 = vector.load %arg9[%c2_134, %c417_135] : memref<4x1090xf32, #tpu.memory_space<vmem>>, vector<1x32xf32>
    tpu.vector_store %arg9[%c2_134, %c417_135], %167 {strides = array<i32>} : memref<4x1090xf32, #tpu.memory_space<vmem>>, vector<1x32xf32>,
    %169 = vector.extract_strided_slice %142 {offsets = [13, 0], sizes = [1, 32], strides = [1, 1]} : vector<32x32xf32> to vector<1x32xf32>
    %c2_136 = arith.constant 2 : index
    %c449_137 = arith.constant 449 : index
    %170 = vector.load %arg9[%c2_136, %c449_137] : memref<4x1090xf32, #tpu.memory_space<vmem>>, vector<1x32xf32>
    tpu.vector_store %arg9[%c2_136, %c449_137], %169 {strides = array<i32>} : memref<4x1090xf32, #tpu.memory_space<vmem>>, vector<1x32xf32>,
    %171 = vector.extract_strided_slice %142 {offsets = [14, 0], sizes = [1, 32], strides = [1, 1]} : vector<32x32xf32> to vector<1x32xf32>
    %c2_138 = arith.constant 2 : index
    %c481_139 = arith.constant 481 : index
    %172 = vector.load %arg9[%c2_138, %c481_139] : memref<4x1090xf32, #tpu.memory_space<vmem>>, vector<1x32xf32>
    tpu.vector_store %arg9[%c2_138, %c481_139], %171 {strides = array<i32>} : memref<4x1090xf32, #tpu.memory_space<vmem>>, vector<1x32xf32>,
    %173 = vector.extract_strided_slice %142 {offsets = [15, 0], sizes = [1, 32], strides = [1, 1]} : vector<32x32xf32> to vector<1x32xf32>
    %c2_140 = arith.constant 2 : index
    %c513_141 = arith.constant 513 : index
    %174 = vector.load %arg9[%c2_140, %c513_141] : memref<4x1090xf32, #tpu.memory_space<vmem>>, vector<1x32xf32>
    tpu.vector_store %arg9[%c2_140, %c513_141], %173 {strides = array<i32>} : memref<4x1090xf32, #tpu.memory_space<vmem>>, vector<1x32xf32>,
    %175 = vector.extract_strided_slice %142 {offsets = [16, 0], sizes = [1, 32], strides = [1, 1]} : vector<32x32xf32> to vector<1x32xf32>
    %c2_142 = arith.constant 2 : index
    %c545_143 = arith.constant 545 : index
    %176 = vector.load %arg9[%c2_142, %c545_143] : memref<4x1090xf32, #tpu.memory_space<vmem>>, vector<1x32xf32>
    tpu.vector_store %arg9[%c2_142, %c545_143], %175 {strides = array<i32>} : memref<4x1090xf32, #tpu.memory_space<vmem>>, vector<1x32xf32>,
    %177 = vector.extract_strided_slice %142 {offsets = [17, 0], sizes = [1, 32], strides = [1, 1]} : vector<32x32xf32> to vector<1x32xf32>
    %c2_144 = arith.constant 2 : index
    %c577_145 = arith.constant 577 : index
    %178 = vector.load %arg9[%c2_144, %c577_145] : memref<4x1090xf32, #tpu.memory_space<vmem>>, vector<1x32xf32>
    tpu.vector_store %arg9[%c2_144, %c577_145], %177 {strides = array<i32>} : memref<4x1090xf32, #tpu.memory_space<vmem>>, vector<1x32xf32>,
    %179 = vector.extract_strided_slice %142 {offsets = [18, 0], sizes = [1, 32], strides = [1, 1]} : vector<32x32xf32> to vector<1x32xf32>
    %c2_146 = arith.constant 2 : index
    %c609_147 = arith.constant 609 : index
    %180 = vector.load %arg9[%c2_146, %c609_147] : memref<4x1090xf32, #tpu.memory_space<vmem>>, vector<1x32xf32>
    tpu.vector_store %arg9[%c2_146, %c609_147], %179 {strides = array<i32>} : memref<4x1090xf32, #tpu.memory_space<vmem>>, vector<1x32xf32>,
    %181 = vector.extract_strided_slice %142 {offsets = [19, 0], sizes = [1, 32], strides = [1, 1]} : vector<32x32xf32> to vector<1x32xf32>
    %c2_148 = arith.constant 2 : index
    %c641_149 = arith.constant 641 : index
    %182 = vector.load %arg9[%c2_148, %c641_149] : memref<4x1090xf32, #tpu.memory_space<vmem>>, vector<1x32xf32>
    tpu.vector_store %arg9[%c2_148, %c641_149], %181 {strides = array<i32>} : memref<4x1090xf32, #tpu.memory_space<vmem>>, vector<1x32xf32>,
    %183 = vector.extract_strided_slice %142 {offsets = [20, 0], sizes = [1, 32], strides = [1, 1]} : vector<32x32xf32> to vector<1x32xf32>
    %c2_150 = arith.constant 2 : index
    %c673_151 = arith.constant 673 : index
    %184 = vector.load %arg9[%c2_150, %c673_151] : memref<4x1090xf32, #tpu.memory_space<vmem>>, vector<1x32xf32>
    tpu.vector_store %arg9[%c2_150, %c673_151], %183 {strides = array<i32>} : memref<4x1090xf32, #tpu.memory_space<vmem>>, vector<1x32xf32>,
    %185 = vector.extract_strided_slice %142 {offsets = [21, 0], sizes = [1, 32], strides = [1, 1]} : vector<32x32xf32> to vector<1x32xf32>
    %c2_152 = arith.constant 2 : index
    %c705_153 = arith.constant 705 : index
    %186 = vector.load %arg9[%c2_152, %c705_153] : memref<4x1090xf32, #tpu.memory_space<vmem>>, vector<1x32xf32>
    tpu.vector_store %arg9[%c2_152, %c705_153], %185 {strides = array<i32>} : memref<4x1090xf32, #tpu.memory_space<vmem>>, vector<1x32xf32>,
    %187 = vector.extract_strided_slice %142 {offsets = [22, 0], sizes = [1, 32], strides = [1, 1]} : vector<32x32xf32> to vector<1x32xf32>
    %c2_154 = arith.constant 2 : index
    %c737_155 = arith.constant 737 : index
    %188 = vector.load %arg9[%c2_154, %c737_155] : memref<4x1090xf32, #tpu.memory_space<vmem>>, vector<1x32xf32>
    tpu.vector_store %arg9[%c2_154, %c737_155], %187 {strides = array<i32>} : memref<4x1090xf32, #tpu.memory_space<vmem>>, vector<1x32xf32>,
    %189 = vector.extract_strided_slice %142 {offsets = [23, 0], sizes = [1, 32], strides = [1, 1]} : vector<32x32xf32> to vector<1x32xf32>
    %c2_156 = arith.constant 2 : index
    %c769_157 = arith.constant 769 : index
    %190 = vector.load %arg9[%c2_156, %c769_157] : memref<4x1090xf32, #tpu.memory_space<vmem>>, vector<1x32xf32>
    tpu.vector_store %arg9[%c2_156, %c769_157], %189 {strides = array<i32>} : memref<4x1090xf32, #tpu.memory_space<vmem>>, vector<1x32xf32>,
    %191 = vector.extract_strided_slice %142 {offsets = [24, 0], sizes = [1, 32], strides = [1, 1]} : vector<32x32xf32> to vector<1x32xf32>
    %c2_158 = arith.constant 2 : index
    %c801_159 = arith.constant 801 : index
    %192 = vector.load %arg9[%c2_158, %c801_159] : memref<4x1090xf32, #tpu.memory_space<vmem>>, vector<1x32xf32>
    tpu.vector_store %arg9[%c2_158, %c801_159], %191 {strides = array<i32>} : memref<4x1090xf32, #tpu.memory_space<vmem>>, vector<1x32xf32>,
    %193 = vector.extract_strided_slice %142 {offsets = [25, 0], sizes = [1, 32], strides = [1, 1]} : vector<32x32xf32> to vector<1x32xf32>
    %c2_160 = arith.constant 2 : index
    %c833_161 = arith.constant 833 : index
    %194 = vector.load %arg9[%c2_160, %c833_161] : memref<4x1090xf32, #tpu.memory_space<vmem>>, vector<1x32xf32>
    tpu.vector_store %arg9[%c2_160, %c833_161], %193 {strides = array<i32>} : memref<4x1090xf32, #tpu.memory_space<vmem>>, vector<1x32xf32>,
    %195 = vector.extract_strided_slice %142 {offsets = [26, 0], sizes = [1, 32], strides = [1, 1]} : vector<32x32xf32> to vector<1x32xf32>
    %c2_162 = arith.constant 2 : index
    %c865_163 = arith.constant 865 : index
    %196 = vector.load %arg9[%c2_162, %c865_163] : memref<4x1090xf32, #tpu.memory_space<vmem>>, vector<1x32xf32>
    tpu.vector_store %arg9[%c2_162, %c865_163], %195 {strides = array<i32>} : memref<4x1090xf32, #tpu.memory_space<vmem>>, vector<1x32xf32>,
    %197 = vector.extract_strided_slice %142 {offsets = [27, 0], sizes = [1, 32], strides = [1, 1]} : vector<32x32xf32> to vector<1x32xf32>
    %c2_164 = arith.constant 2 : index
    %c897_165 = arith.constant 897 : index
    %198 = vector.load %arg9[%c2_164, %c897_165] : memref<4x1090xf32, #tpu.memory_space<vmem>>, vector<1x32xf32>
    tpu.vector_store %arg9[%c2_164, %c897_165], %197 {strides = array<i32>} : memref<4x1090xf32, #tpu.memory_space<vmem>>, vector<1x32xf32>,
    %199 = vector.extract_strided_slice %142 {offsets = [28, 0], sizes = [1, 32], strides = [1, 1]} : vector<32x32xf32> to vector<1x32xf32>
    %c2_166 = arith.constant 2 : index
    %c929_167 = arith.constant 929 : index
    %200 = vector.load %arg9[%c2_166, %c929_167] : memref<4x1090xf32, #tpu.memory_space<vmem>>, vector<1x32xf32>
    tpu.vector_store %arg9[%c2_166, %c929_167], %199 {strides = array<i32>} : memref<4x1090xf32, #tpu.memory_space<vmem>>, vector<1x32xf32>,
    %201 = vector.extract_strided_slice %142 {offsets = [29, 0], sizes = [1, 32], strides = [1, 1]} : vector<32x32xf32> to vector<1x32xf32>
    %c2_168 = arith.constant 2 : index
    %c961_169 = arith.constant 961 : index
    %202 = vector.load %arg9[%c2_168, %c961_169] : memref<4x1090xf32, #tpu.memory_space<vmem>>, vector<1x32xf32>
    tpu.vector_store %arg9[%c2_168, %c961_169], %201 {strides = array<i32>} : memref<4x1090xf32, #tpu.memory_space<vmem>>, vector<1x32xf32>,
    %203 = vector.extract_strided_slice %142 {offsets = [30, 0], sizes = [1, 32], strides = [1, 1]} : vector<32x32xf32> to vector<1x32xf32>
    %c2_170 = arith.constant 2 : index
    %c993_171 = arith.constant 993 : index
    %204 = vector.load %arg9[%c2_170, %c993_171] : memref<4x1090xf32, #tpu.memory_space<vmem>>, vector<1x32xf32>
    tpu.vector_store %arg9[%c2_170, %c993_171], %203 {strides = array<i32>} : memref<4x1090xf32, #tpu.memory_space<vmem>>, vector<1x32xf32>,
    %205 = vector.extract_strided_slice %142 {offsets = [31, 0], sizes = [1, 32], strides = [1, 1]} : vector<32x32xf32> to vector<1x32xf32>
    %c2_172 = arith.constant 2 : index
    %c1025_173 = arith.constant 1025 : index
    %206 = vector.load %arg9[%c2_172, %c1025_173] : memref<4x1090xf32, #tpu.memory_space<vmem>>, vector<1x32xf32>
    tpu.vector_store %arg9[%c2_172, %c1025_173], %205 {strides = array<i32>} : memref<4x1090xf32, #tpu.memory_space<vmem>>, vector<1x32xf32>,
    %c0_174 = arith.constant 0 : index
    %c0_175 = arith.constant 0 : index
    %207 = vector.load %arg2[%c0_174, %c0_175] : memref<32x16xf32, #tpu.memory_space<vmem>>, vector<32x16xf32>
    %208 = vector.extract_strided_slice %5 {offsets = [48, 0], sizes = [16, 32], strides = [1, 1]} : vector<64x32xf32> to vector<16x32xf32>
    %cst_176 = arith.constant dense<0.000000e+00> : vector<32x32xf32>
    %209 = tpu.matmul %207, %208, %cst_176 {dimension_numbers = #tpu.dot_dimension_numbers<[1], [0], [0], [1], [0, 0, 1, 1], [], []>} : vector<32x16xf32>, vector<16x32xf32>, vector<32x32xf32> -> vector<32x32xf32>
    %210 = vector.extract_strided_slice %209 {offsets = [0, 0], sizes = [1, 32], strides = [1, 1]} : vector<32x32xf32> to vector<1x32xf32>
    %c3 = arith.constant 3 : index
    %c33_177 = arith.constant 33 : index
    %211 = vector.load %arg9[%c3, %c33_177] : memref<4x1090xf32, #tpu.memory_space<vmem>>, vector<1x32xf32>
    tpu.vector_store %arg9[%c3, %c33_177], %210 {strides = array<i32>} : memref<4x1090xf32, #tpu.memory_space<vmem>>, vector<1x32xf32>,
    %212 = vector.extract_strided_slice %209 {offsets = [1, 0], sizes = [1, 32], strides = [1, 1]} : vector<32x32xf32> to vector<1x32xf32>
    %c3_178 = arith.constant 3 : index
    %c65_179 = arith.constant 65 : index
    %213 = vector.load %arg9[%c3_178, %c65_179] : memref<4x1090xf32, #tpu.memory_space<vmem>>, vector<1x32xf32>
    tpu.vector_store %arg9[%c3_178, %c65_179], %212 {strides = array<i32>} : memref<4x1090xf32, #tpu.memory_space<vmem>>, vector<1x32xf32>,
    %214 = vector.extract_strided_slice %209 {offsets = [2, 0], sizes = [1, 32], strides = [1, 1]} : vector<32x32xf32> to vector<1x32xf32>
    %c3_180 = arith.constant 3 : index
    %c97_181 = arith.constant 97 : index
    %215 = vector.load %arg9[%c3_180, %c97_181] : memref<4x1090xf32, #tpu.memory_space<vmem>>, vector<1x32xf32>
    tpu.vector_store %arg9[%c3_180, %c97_181], %214 {strides = array<i32>} : memref<4x1090xf32, #tpu.memory_space<vmem>>, vector<1x32xf32>,
    %216 = vector.extract_strided_slice %209 {offsets = [3, 0], sizes = [1, 32], strides = [1, 1]} : vector<32x32xf32> to vector<1x32xf32>
    %c3_182 = arith.constant 3 : index
    %c129_183 = arith.constant 129 : index
    %217 = vector.load %arg9[%c3_182, %c129_183] : memref<4x1090xf32, #tpu.memory_space<vmem>>, vector<1x32xf32>
    tpu.vector_store %arg9[%c3_182, %c129_183], %216 {strides = array<i32>} : memref<4x1090xf32, #tpu.memory_space<vmem>>, vector<1x32xf32>,
    %218 = vector.extract_strided_slice %209 {offsets = [4, 0], sizes = [1, 32], strides = [1, 1]} : vector<32x32xf32> to vector<1x32xf32>
    %c3_184 = arith.constant 3 : index
    %c161_185 = arith.constant 161 : index
    %219 = vector.load %arg9[%c3_184, %c161_185] : memref<4x1090xf32, #tpu.memory_space<vmem>>, vector<1x32xf32>
    tpu.vector_store %arg9[%c3_184, %c161_185], %218 {strides = array<i32>} : memref<4x1090xf32, #tpu.memory_space<vmem>>, vector<1x32xf32>,
    %220 = vector.extract_strided_slice %209 {offsets = [5, 0], sizes = [1, 32], strides = [1, 1]} : vector<32x32xf32> to vector<1x32xf32>
    %c3_186 = arith.constant 3 : index
    %c193_187 = arith.constant 193 : index
    %221 = vector.load %arg9[%c3_186, %c193_187] : memref<4x1090xf32, #tpu.memory_space<vmem>>, vector<1x32xf32>
    tpu.vector_store %arg9[%c3_186, %c193_187], %220 {strides = array<i32>} : memref<4x1090xf32, #tpu.memory_space<vmem>>, vector<1x32xf32>,
    %222 = vector.extract_strided_slice %209 {offsets = [6, 0], sizes = [1, 32], strides = [1, 1]} : vector<32x32xf32> to vector<1x32xf32>
    %c3_188 = arith.constant 3 : index
    %c225_189 = arith.constant 225 : index
    %223 = vector.load %arg9[%c3_188, %c225_189] : memref<4x1090xf32, #tpu.memory_space<vmem>>, vector<1x32xf32>
    tpu.vector_store %arg9[%c3_188, %c225_189], %222 {strides = array<i32>} : memref<4x1090xf32, #tpu.memory_space<vmem>>, vector<1x32xf32>,
    %224 = vector.extract_strided_slice %209 {offsets = [7, 0], sizes = [1, 32], strides = [1, 1]} : vector<32x32xf32> to vector<1x32xf32>
    %c3_190 = arith.constant 3 : index
    %c257_191 = arith.constant 257 : index
    %225 = vector.load %arg9[%c3_190, %c257_191] : memref<4x1090xf32, #tpu.memory_space<vmem>>, vector<1x32xf32>
    tpu.vector_store %arg9[%c3_190, %c257_191], %224 {strides = array<i32>} : memref<4x1090xf32, #tpu.memory_space<vmem>>, vector<1x32xf32>,
    %226 = vector.extract_strided_slice %209 {offsets = [8, 0], sizes = [1, 32], strides = [1, 1]} : vector<32x32xf32> to vector<1x32xf32>
    %c3_192 = arith.constant 3 : index
    %c289_193 = arith.constant 289 : index
    %227 = vector.load %arg9[%c3_192, %c289_193] : memref<4x1090xf32, #tpu.memory_space<vmem>>, vector<1x32xf32>
    tpu.vector_store %arg9[%c3_192, %c289_193], %226 {strides = array<i32>} : memref<4x1090xf32, #tpu.memory_space<vmem>>, vector<1x32xf32>,
    %228 = vector.extract_strided_slice %209 {offsets = [9, 0], sizes = [1, 32], strides = [1, 1]} : vector<32x32xf32> to vector<1x32xf32>
    %c3_194 = arith.constant 3 : index
    %c321_195 = arith.constant 321 : index
    %229 = vector.load %arg9[%c3_194, %c321_195] : memref<4x1090xf32, #tpu.memory_space<vmem>>, vector<1x32xf32>
    tpu.vector_store %arg9[%c3_194, %c321_195], %228 {strides = array<i32>} : memref<4x1090xf32, #tpu.memory_space<vmem>>, vector<1x32xf32>,
    %230 = vector.extract_strided_slice %209 {offsets = [10, 0], sizes = [1, 32], strides = [1, 1]} : vector<32x32xf32> to vector<1x32xf32>
    %c3_196 = arith.constant 3 : index
    %c353_197 = arith.constant 353 : index
    %231 = vector.load %arg9[%c3_196, %c353_197] : memref<4x1090xf32, #tpu.memory_space<vmem>>, vector<1x32xf32>
    tpu.vector_store %arg9[%c3_196, %c353_197], %230 {strides = array<i32>} : memref<4x1090xf32, #tpu.memory_space<vmem>>, vector<1x32xf32>,
    %232 = vector.extract_strided_slice %209 {offsets = [11, 0], sizes = [1, 32], strides = [1, 1]} : vector<32x32xf32> to vector<1x32xf32>
    %c3_198 = arith.constant 3 : index
    %c385_199 = arith.constant 385 : index
    %233 = vector.load %arg9[%c3_198, %c385_199] : memref<4x1090xf32, #tpu.memory_space<vmem>>, vector<1x32xf32>
    tpu.vector_store %arg9[%c3_198, %c385_199], %232 {strides = array<i32>} : memref<4x1090xf32, #tpu.memory_space<vmem>>, vector<1x32xf32>,
    %234 = vector.extract_strided_slice %209 {offsets = [12, 0], sizes = [1, 32], strides = [1, 1]} : vector<32x32xf32> to vector<1x32xf32>
    %c3_200 = arith.constant 3 : index
    %c417_201 = arith.constant 417 : index
    %235 = vector.load %arg9[%c3_200, %c417_201] : memref<4x1090xf32, #tpu.memory_space<vmem>>, vector<1x32xf32>
    tpu.vector_store %arg9[%c3_200, %c417_201], %234 {strides = array<i32>} : memref<4x1090xf32, #tpu.memory_space<vmem>>, vector<1x32xf32>,
    %236 = vector.extract_strided_slice %209 {offsets = [13, 0], sizes = [1, 32], strides = [1, 1]} : vector<32x32xf32> to vector<1x32xf32>
    %c3_202 = arith.constant 3 : index
    %c449_203 = arith.constant 449 : index
    %237 = vector.load %arg9[%c3_202, %c449_203] : memref<4x1090xf32, #tpu.memory_space<vmem>>, vector<1x32xf32>
    tpu.vector_store %arg9[%c3_202, %c449_203], %236 {strides = array<i32>} : memref<4x1090xf32, #tpu.memory_space<vmem>>, vector<1x32xf32>,
    %238 = vector.extract_strided_slice %209 {offsets = [14, 0], sizes = [1, 32], strides = [1, 1]} : vector<32x32xf32> to vector<1x32xf32>
    %c3_204 = arith.constant 3 : index
    %c481_205 = arith.constant 481 : index
    %239 = vector.load %arg9[%c3_204, %c481_205] : memref<4x1090xf32, #tpu.memory_space<vmem>>, vector<1x32xf32>
    tpu.vector_store %arg9[%c3_204, %c481_205], %238 {strides = array<i32>} : memref<4x1090xf32, #tpu.memory_space<vmem>>, vector<1x32xf32>,
    %240 = vector.extract_strided_slice %209 {offsets = [15, 0], sizes = [1, 32], strides = [1, 1]} : vector<32x32xf32> to vector<1x32xf32>
    %c3_206 = arith.constant 3 : index
    %c513_207 = arith.constant 513 : index
    %241 = vector.load %arg9[%c3_206, %c513_207] : memref<4x1090xf32, #tpu.memory_space<vmem>>, vector<1x32xf32>
    tpu.vector_store %arg9[%c3_206, %c513_207], %240 {strides = array<i32>} : memref<4x1090xf32, #tpu.memory_space<vmem>>, vector<1x32xf32>,
    %242 = vector.extract_strided_slice %209 {offsets = [16, 0], sizes = [1, 32], strides = [1, 1]} : vector<32x32xf32> to vector<1x32xf32>
    %c3_208 = arith.constant 3 : index
    %c545_209 = arith.constant 545 : index
    %243 = vector.load %arg9[%c3_208, %c545_209] : memref<4x1090xf32, #tpu.memory_space<vmem>>, vector<1x32xf32>
    tpu.vector_store %arg9[%c3_208, %c545_209], %242 {strides = array<i32>} : memref<4x1090xf32, #tpu.memory_space<vmem>>, vector<1x32xf32>,
    %244 = vector.extract_strided_slice %209 {offsets = [17, 0], sizes = [1, 32], strides = [1, 1]} : vector<32x32xf32> to vector<1x32xf32>
    %c3_210 = arith.constant 3 : index
    %c577_211 = arith.constant 577 : index
    %245 = vector.load %arg9[%c3_210, %c577_211] : memref<4x1090xf32, #tpu.memory_space<vmem>>, vector<1x32xf32>
    tpu.vector_store %arg9[%c3_210, %c577_211], %244 {strides = array<i32>} : memref<4x1090xf32, #tpu.memory_space<vmem>>, vector<1x32xf32>,
    %246 = vector.extract_strided_slice %209 {offsets = [18, 0], sizes = [1, 32], strides = [1, 1]} : vector<32x32xf32> to vector<1x32xf32>
    %c3_212 = arith.constant 3 : index
    %c609_213 = arith.constant 609 : index
    %247 = vector.load %arg9[%c3_212, %c609_213] : memref<4x1090xf32, #tpu.memory_space<vmem>>, vector<1x32xf32>
    tpu.vector_store %arg9[%c3_212, %c609_213], %246 {strides = array<i32>} : memref<4x1090xf32, #tpu.memory_space<vmem>>, vector<1x32xf32>,
    %248 = vector.extract_strided_slice %209 {offsets = [19, 0], sizes = [1, 32], strides = [1, 1]} : vector<32x32xf32> to vector<1x32xf32>
    %c3_214 = arith.constant 3 : index
    %c641_215 = arith.constant 641 : index
    %249 = vector.load %arg9[%c3_214, %c641_215] : memref<4x1090xf32, #tpu.memory_space<vmem>>, vector<1x32xf32>
    tpu.vector_store %arg9[%c3_214, %c641_215], %248 {strides = array<i32>} : memref<4x1090xf32, #tpu.memory_space<vmem>>, vector<1x32xf32>,
    %250 = vector.extract_strided_slice %209 {offsets = [20, 0], sizes = [1, 32], strides = [1, 1]} : vector<32x32xf32> to vector<1x32xf32>
    %c3_216 = arith.constant 3 : index
    %c673_217 = arith.constant 673 : index
    %251 = vector.load %arg9[%c3_216, %c673_217] : memref<4x1090xf32, #tpu.memory_space<vmem>>, vector<1x32xf32>
    tpu.vector_store %arg9[%c3_216, %c673_217], %250 {strides = array<i32>} : memref<4x1090xf32, #tpu.memory_space<vmem>>, vector<1x32xf32>,
    %252 = vector.extract_strided_slice %209 {offsets = [21, 0], sizes = [1, 32], strides = [1, 1]} : vector<32x32xf32> to vector<1x32xf32>
    %c3_218 = arith.constant 3 : index
    %c705_219 = arith.constant 705 : index
    %253 = vector.load %arg9[%c3_218, %c705_219] : memref<4x1090xf32, #tpu.memory_space<vmem>>, vector<1x32xf32>
    tpu.vector_store %arg9[%c3_218, %c705_219], %252 {strides = array<i32>} : memref<4x1090xf32, #tpu.memory_space<vmem>>, vector<1x32xf32>,
    %254 = vector.extract_strided_slice %209 {offsets = [22, 0], sizes = [1, 32], strides = [1, 1]} : vector<32x32xf32> to vector<1x32xf32>
    %c3_220 = arith.constant 3 : index
    %c737_221 = arith.constant 737 : index
    %255 = vector.load %arg9[%c3_220, %c737_221] : memref<4x1090xf32, #tpu.memory_space<vmem>>, vector<1x32xf32>
    tpu.vector_store %arg9[%c3_220, %c737_221], %254 {strides = array<i32>} : memref<4x1090xf32, #tpu.memory_space<vmem>>, vector<1x32xf32>,
    %256 = vector.extract_strided_slice %209 {offsets = [23, 0], sizes = [1, 32], strides = [1, 1]} : vector<32x32xf32> to vector<1x32xf32>
    %c3_222 = arith.constant 3 : index
    %c769_223 = arith.constant 769 : index
    %257 = vector.load %arg9[%c3_222, %c769_223] : memref<4x1090xf32, #tpu.memory_space<vmem>>, vector<1x32xf32>
    tpu.vector_store %arg9[%c3_222, %c769_223], %256 {strides = array<i32>} : memref<4x1090xf32, #tpu.memory_space<vmem>>, vector<1x32xf32>,
    %258 = vector.extract_strided_slice %209 {offsets = [24, 0], sizes = [1, 32], strides = [1, 1]} : vector<32x32xf32> to vector<1x32xf32>
    %c3_224 = arith.constant 3 : index
    %c801_225 = arith.constant 801 : index
    %259 = vector.load %arg9[%c3_224, %c801_225] : memref<4x1090xf32, #tpu.memory_space<vmem>>, vector<1x32xf32>
    tpu.vector_store %arg9[%c3_224, %c801_225], %258 {strides = array<i32>} : memref<4x1090xf32, #tpu.memory_space<vmem>>, vector<1x32xf32>,
    %260 = vector.extract_strided_slice %209 {offsets = [25, 0], sizes = [1, 32], strides = [1, 1]} : vector<32x32xf32> to vector<1x32xf32>
    %c3_226 = arith.constant 3 : index
    %c833_227 = arith.constant 833 : index
    %261 = vector.load %arg9[%c3_226, %c833_227] : memref<4x1090xf32, #tpu.memory_space<vmem>>, vector<1x32xf32>
    tpu.vector_store %arg9[%c3_226, %c833_227], %260 {strides = array<i32>} : memref<4x1090xf32, #tpu.memory_space<vmem>>, vector<1x32xf32>,
    %262 = vector.extract_strided_slice %209 {offsets = [26, 0], sizes = [1, 32], strides = [1, 1]} : vector<32x32xf32> to vector<1x32xf32>
    %c3_228 = arith.constant 3 : index
    %c865_229 = arith.constant 865 : index
    %263 = vector.load %arg9[%c3_228, %c865_229] : memref<4x1090xf32, #tpu.memory_space<vmem>>, vector<1x32xf32>
    tpu.vector_store %arg9[%c3_228, %c865_229], %262 {strides = array<i32>} : memref<4x1090xf32, #tpu.memory_space<vmem>>, vector<1x32xf32>,
    %264 = vector.extract_strided_slice %209 {offsets = [27, 0], sizes = [1, 32], strides = [1, 1]} : vector<32x32xf32> to vector<1x32xf32>
    %c3_230 = arith.constant 3 : index
    %c897_231 = arith.constant 897 : index
    %265 = vector.load %arg9[%c3_230, %c897_231] : memref<4x1090xf32, #tpu.memory_space<vmem>>, vector<1x32xf32>
    tpu.vector_store %arg9[%c3_230, %c897_231], %264 {strides = array<i32>} : memref<4x1090xf32, #tpu.memory_space<vmem>>, vector<1x32xf32>,
    %266 = vector.extract_strided_slice %209 {offsets = [28, 0], sizes = [1, 32], strides = [1, 1]} : vector<32x32xf32> to vector<1x32xf32>
    %c3_232 = arith.constant 3 : index
    %c929_233 = arith.constant 929 : index
    %267 = vector.load %arg9[%c3_232, %c929_233] : memref<4x1090xf32, #tpu.memory_space<vmem>>, vector<1x32xf32>
    tpu.vector_store %arg9[%c3_232, %c929_233], %266 {strides = array<i32>} : memref<4x1090xf32, #tpu.memory_space<vmem>>, vector<1x32xf32>,
    %268 = vector.extract_strided_slice %209 {offsets = [29, 0], sizes = [1, 32], strides = [1, 1]} : vector<32x32xf32> to vector<1x32xf32>
    %c3_234 = arith.constant 3 : index
    %c961_235 = arith.constant 961 : index
    %269 = vector.load %arg9[%c3_234, %c961_235] : memref<4x1090xf32, #tpu.memory_space<vmem>>, vector<1x32xf32>
    tpu.vector_store %arg9[%c3_234, %c961_235], %268 {strides = array<i32>} : memref<4x1090xf32, #tpu.memory_space<vmem>>, vector<1x32xf32>,
    %270 = vector.extract_strided_slice %209 {offsets = [30, 0], sizes = [1, 32], strides = [1, 1]} : vector<32x32xf32> to vector<1x32xf32>
    %c3_236 = arith.constant 3 : index
    %c993_237 = arith.constant 993 : index
    %271 = vector.load %arg9[%c3_236, %c993_237] : memref<4x1090xf32, #tpu.memory_space<vmem>>, vector<1x32xf32>
    tpu.vector_store %arg9[%c3_236, %c993_237], %270 {strides = array<i32>} : memref<4x1090xf32, #tpu.memory_space<vmem>>, vector<1x32xf32>,
    %272 = vector.extract_strided_slice %209 {offsets = [31, 0], sizes = [1, 32], strides = [1, 1]} : vector<32x32xf32> to vector<1x32xf32>
    %c3_238 = arith.constant 3 : index
    %c1025_239 = arith.constant 1025 : index
    %273 = vector.load %arg9[%c3_238, %c1025_239] : memref<4x1090xf32, #tpu.memory_space<vmem>>, vector<1x32xf32>
    tpu.vector_store %arg9[%c3_238, %c1025_239], %272 {strides = array<i32>} : memref<4x1090xf32, #tpu.memory_space<vmem>>, vector<1x32xf32>,
    %c0_240 = arith.constant 0 : index
    %c0_241 = arith.constant 0 : index
    %274 = vector.load %arg9[%c0_240, %c0_241] : memref<4x1090xf32, #tpu.memory_space<vmem>>, vector<4x1024xf32>
    %c0_242 = arith.constant 0 : index
    %c0_243 = arith.constant 0 : index
    %275 = vector.load %arg7[%c0_242, %c0_243] : memref<2x1024xf32, #tpu.memory_space<vmem>>, vector<1x1024xf32>
    %276 = vector.broadcast %275 : vector<1x1024xf32> to vector<4x1024xf32>
    %277 = arith.mulf %274, %276 : vector<4x1024xf32>
    %c0_244 = arith.constant 0 : index
    %c0_245 = arith.constant 0 : index
    %278 = vector.load %arg10[%c0_244, %c0_245] : memref<36x1024xf32, #tpu.memory_space<vmem>>, vector<4x1024xf32>
    tpu.vector_store %arg10[%c0_244, %c0_245], %277 {strides = array<i32>} : memref<36x1024xf32, #tpu.memory_space<vmem>>, vector<4x1024xf32>,
    %c0_246 = arith.constant 0 : index
    %c1_247 = arith.constant 1 : index
    %279 = vector.load %arg9[%c0_246, %c1_247] : memref<4x1090xf32, #tpu.memory_space<vmem>>, vector<4x1024xf32>
    %c4 = arith.constant 4 : index
    %c0_248 = arith.constant 0 : index
    %280 = vector.load %arg10[%c4, %c0_248] : memref<36x1024xf32, #tpu.memory_space<vmem>>, vector<4x1024xf32>
    tpu.vector_store %arg10[%c4, %c0_248], %279 {strides = array<i32>} : memref<36x1024xf32, #tpu.memory_space<vmem>>, vector<4x1024xf32>,
    %c0_249 = arith.constant 0 : index
    %c2_250 = arith.constant 2 : index
    %281 = vector.load %arg9[%c0_249, %c2_250] : memref<4x1090xf32, #tpu.memory_space<vmem>>, vector<4x1024xf32>
    %c1_251 = arith.constant 1 : index
    %c0_252 = arith.constant 0 : index
    %282 = vector.load %arg7[%c1_251, %c0_252] : memref<2x1024xf32, #tpu.memory_space<vmem>>, vector<1x1024xf32>
    %283 = vector.broadcast %282 : vector<1x1024xf32> to vector<4x1024xf32>
    %284 = arith.mulf %281, %283 : vector<4x1024xf32>
    %c8 = arith.constant 8 : index
    %c0_253 = arith.constant 0 : index
    %285 = vector.load %arg10[%c8, %c0_253] : memref<36x1024xf32, #tpu.memory_space<vmem>>, vector<4x1024xf32>
    tpu.vector_store %arg10[%c8, %c0_253], %284 {strides = array<i32>} : memref<36x1024xf32, #tpu.memory_space<vmem>>, vector<4x1024xf32>,
    %c0_254 = arith.constant 0 : index
    %c32 = arith.constant 32 : index
    %286 = vector.load %arg9[%c0_254, %c32] : memref<4x1090xf32, #tpu.memory_space<vmem>>, vector<4x1024xf32>
    %c0_255 = arith.constant 0 : index
    %c0_256 = arith.constant 0 : index
    %287 = vector.load %arg7[%c0_255, %c0_256] : memref<2x1024xf32, #tpu.memory_space<vmem>>, vector<1x1024xf32>
    %288 = vector.broadcast %287 : vector<1x1024xf32> to vector<4x1024xf32>
    %289 = arith.mulf %286, %288 : vector<4x1024xf32>
    %c12 = arith.constant 12 : index
    %c0_257 = arith.constant 0 : index
    %290 = vector.load %arg10[%c12, %c0_257] : memref<36x1024xf32, #tpu.memory_space<vmem>>, vector<4x1024xf32>
    tpu.vector_store %arg10[%c12, %c0_257], %289 {strides = array<i32>} : memref<36x1024xf32, #tpu.memory_space<vmem>>, vector<4x1024xf32>,
    %c0_258 = arith.constant 0 : index
    %c33_259 = arith.constant 33 : index
    %291 = vector.load %arg9[%c0_258, %c33_259] : memref<4x1090xf32, #tpu.memory_space<vmem>>, vector<4x1024xf32>
    %c16 = arith.constant 16 : index
    %c0_260 = arith.constant 0 : index
    %292 = vector.load %arg10[%c16, %c0_260] : memref<36x1024xf32, #tpu.memory_space<vmem>>, vector<4x1024xf32>
    tpu.vector_store %arg10[%c16, %c0_260], %291 {strides = array<i32>} : memref<36x1024xf32, #tpu.memory_space<vmem>>, vector<4x1024xf32>,
    %c0_261 = arith.constant 0 : index
    %c34 = arith.constant 34 : index
    %293 = vector.load %arg9[%c0_261, %c34] : memref<4x1090xf32, #tpu.memory_space<vmem>>, vector<4x1024xf32>
    %c1_262 = arith.constant 1 : index
    %c0_263 = arith.constant 0 : index
    %294 = vector.load %arg7[%c1_262, %c0_263] : memref<2x1024xf32, #tpu.memory_space<vmem>>, vector<1x1024xf32>
    %295 = vector.broadcast %294 : vector<1x1024xf32> to vector<4x1024xf32>
    %296 = arith.mulf %293, %295 : vector<4x1024xf32>
    %c20 = arith.constant 20 : index
    %c0_264 = arith.constant 0 : index
    %297 = vector.load %arg10[%c20, %c0_264] : memref<36x1024xf32, #tpu.memory_space<vmem>>, vector<4x1024xf32>
    tpu.vector_store %arg10[%c20, %c0_264], %296 {strides = array<i32>} : memref<36x1024xf32, #tpu.memory_space<vmem>>, vector<4x1024xf32>,
    %c0_265 = arith.constant 0 : index
    %c64 = arith.constant 64 : index
    %298 = vector.load %arg9[%c0_265, %c64] : memref<4x1090xf32, #tpu.memory_space<vmem>>, vector<4x1024xf32>
    %c0_266 = arith.constant 0 : index
    %c0_267 = arith.constant 0 : index
    %299 = vector.load %arg7[%c0_266, %c0_267] : memref<2x1024xf32, #tpu.memory_space<vmem>>, vector<1x1024xf32>
    %300 = vector.broadcast %299 : vector<1x1024xf32> to vector<4x1024xf32>
    %301 = arith.mulf %298, %300 : vector<4x1024xf32>
    %c24 = arith.constant 24 : index
    %c0_268 = arith.constant 0 : index
    %302 = vector.load %arg10[%c24, %c0_268] : memref<36x1024xf32, #tpu.memory_space<vmem>>, vector<4x1024xf32>
    tpu.vector_store %arg10[%c24, %c0_268], %301 {strides = array<i32>} : memref<36x1024xf32, #tpu.memory_space<vmem>>, vector<4x1024xf32>,
    %c0_269 = arith.constant 0 : index
    %c65_270 = arith.constant 65 : index
    %303 = vector.load %arg9[%c0_269, %c65_270] : memref<4x1090xf32, #tpu.memory_space<vmem>>, vector<4x1024xf32>
    %c28 = arith.constant 28 : index
    %c0_271 = arith.constant 0 : index
    %304 = vector.load %arg10[%c28, %c0_271] : memref<36x1024xf32, #tpu.memory_space<vmem>>, vector<4x1024xf32>
    tpu.vector_store %arg10[%c28, %c0_271], %303 {strides = array<i32>} : memref<36x1024xf32, #tpu.memory_space<vmem>>, vector<4x1024xf32>,
    %c0_272 = arith.constant 0 : index
    %c66 = arith.constant 66 : index
    %305 = vector.load %arg9[%c0_272, %c66] : memref<4x1090xf32, #tpu.memory_space<vmem>>, vector<4x1024xf32>
    %c1_273 = arith.constant 1 : index
    %c0_274 = arith.constant 0 : index
    %306 = vector.load %arg7[%c1_273, %c0_274] : memref<2x1024xf32, #tpu.memory_space<vmem>>, vector<1x1024xf32>
    %307 = vector.broadcast %306 : vector<1x1024xf32> to vector<4x1024xf32>
    %308 = arith.mulf %305, %307 : vector<4x1024xf32>
    %c32_275 = arith.constant 32 : index
    %c0_276 = arith.constant 0 : index
    %309 = vector.load %arg10[%c32_275, %c0_276] : memref<36x1024xf32, #tpu.memory_space<vmem>>, vector<4x1024xf32>
    tpu.vector_store %arg10[%c32_275, %c0_276], %308 {strides = array<i32>} : memref<36x1024xf32, #tpu.memory_space<vmem>>, vector<4x1024xf32>,
    %c0_277 = arith.constant 0 : index
    %c0_278 = arith.constant 0 : index
    %310 = vector.load %arg4[%c0_277, %c0_278] : memref<8x36xf32, #tpu.memory_space<vmem>>, vector<8x36xf32>
    %c0_279 = arith.constant 0 : index
    %c0_280 = arith.constant 0 : index
    %311 = vector.load %arg10[%c0_279, %c0_280] : memref<36x1024xf32, #tpu.memory_space<vmem>>, vector<36x1024xf32>
    %cst_281 = arith.constant dense<0.000000e+00> : vector<8x1024xf32>
    %312 = tpu.matmul %310, %311, %cst_281 {dimension_numbers = #tpu.dot_dimension_numbers<[1], [0], [0], [1], [0, 0, 1, 1], [], []>} : vector<8x36xf32>, vector<36x1024xf32>, vector<8x1024xf32> -> vector<8x1024xf32>
    %c0_282 = arith.constant 0 : index
    %c0_283 = arith.constant 0 : index
    %313 = vector.load %arg5[%c0_282, %c0_283] : memref<8x1xf32, #tpu.memory_space<vmem>>, vector<8x1xf32>
    %314 = vector.broadcast %313 : vector<8x1xf32> to vector<8x1024xf32>
    %315 = arith.mulf %312, %314 : vector<8x1024xf32>
    %c0_284 = arith.constant 0 : index
    %c0_285 = arith.constant 0 : index
    %316 = vector.load %arg6[%c0_284, %c0_285] : memref<8x1xf32, #tpu.memory_space<vmem>>, vector<8x1xf32>
    %317 = vector.broadcast %316 : vector<8x1xf32> to vector<8x1024xf32>
    %318 = arith.addf %315, %317 : vector<8x1024xf32>
    %cst_286 = arith.constant 0.000000e+00 : f32
    %319 = vector.broadcast %cst_286 : f32 to vector<8x1024xf32>
    %320 = arith.maximumf %318, %319 : vector<8x1024xf32>
    %c0_287 = arith.constant 0 : index
    %c0_288 = arith.constant 0 : index
    %c0_289 = arith.constant 0 : index
    %321 = vector.load %arg8[%c0_287, %c0_288, %c0_289] : memref<1x8x1024xf32, #tpu.memory_space<vmem>>, vector<1x8x1024xf32>
    %322 = vector.shape_cast %321 : vector<1x8x1024xf32> to vector<8x1024xf32>
    %323 = vector.shape_cast %320 : vector<8x1024xf32> to vector<1x8x1024xf32>
    tpu.vector_store %arg8[%c0_287, %c0_288, %c0_289], %323 {strides = array<i32>} : memref<1x8x1024xf32, #tpu.memory_space<vmem>>, vector<1x8x1024xf32>,
    return
  }
  func.func @transform_0(%arg0: i32) -> (i32, i32, i32) {
    %c0_i32 = arith.constant 0 : i32
    %c0_i32_0 = arith.constant 0 : i32
    %c0_i32_1 = arith.constant 0 : i32
    return %arg0, %c0_i32, %c0_i32_0 : i32, i32, i32
  }
  func.func @transform_1(%arg0: i32) -> (i32, i32) {
    %c0_i32 = arith.constant 0 : i32
    %c0_i32_0 = arith.constant 0 : i32
    %c0_i32_1 = arith.constant 0 : i32
    return %c0_i32, %c0_i32_0 : i32, i32
  }
  func.func @transform_2(%arg0: i32) -> (i32, i32) {
    %c0_i32 = arith.constant 0 : i32
    %c0_i32_0 = arith.constant 0 : i32
    %c0_i32_1 = arith.constant 0 : i32
    return %c0_i32, %c0_i32_0 : i32, i32
  }
  func.func @transform_3(%arg0: i32) -> (i32, i32) {
    %c0_i32 = arith.constant 0 : i32
    %c0_i32_0 = arith.constant 0 : i32
    %c0_i32_1 = arith.constant 0 : i32
    return %c0_i32, %c0_i32_0 : i32, i32
  }
  func.func @transform_4(%arg0: i32) -> (i32, i32) {
    %c0_i32 = arith.constant 0 : i32
    %c0_i32_0 = arith.constant 0 : i32
    %c0_i32_1 = arith.constant 0 : i32
    return %c0_i32, %c0_i32_0 : i32, i32
  }
  func.func @transform_5(%arg0: i32) -> (i32, i32) {
    %c0_i32 = arith.constant 0 : i32
    %c0_i32_0 = arith.constant 0 : i32
    %c0_i32_1 = arith.constant 0 : i32
    return %c0_i32, %c0_i32_0 : i32, i32
  }
  func.func @transform_6(%arg0: i32) -> (i32, i32) {
    %c0_i32 = arith.constant 0 : i32
    %c0_i32_0 = arith.constant 0 : i32
    %c0_i32_1 = arith.constant 0 : i32
    return %c0_i32, %c0_i32_0 : i32, i32
  }
  func.func @transform_7(%arg0: i32) -> (i32, i32, i32) {
    %c0_i32 = arith.constant 0 : i32
    %c0_i32_0 = arith.constant 0 : i32
    %c0_i32_1 = arith.constant 0 : i32
    return %arg0, %c0_i32, %c0_i32_0 : i32, i32, i32
  }
}

</mosaic_0001>

<bundles_post_ra>
// kernel: upsample_forward.1
= control target key start
LH: loop header
LB: loop body
LE: loop exit
PB: predicated region body
PF: predicated region fallthrough
CT: control target
= control target key end

     0   :  { %12 = vsyncpa [#allocation5], 0  ;;  %s4571_s0 = inlined_call_operand.vmem [shape: f32[2,64,16], index: 0, kind: input, shape index: {}]   ;;  %s4572_s1 = inlined_call_operand.hbm [shape: f32[32,16], index: 1, kind: input, shape index: {}]   ;;  %s4573_s2 = inlined_call_operand.hbm [shape: f32[16,32], index: 2, kind: input, shape index: {}]   ;;  %s4574_s3 = inlined_call_operand.vmem [shape: f32[8,36], index: 3, kind: input, shape index: {}]   ;;  %s4575_s4 = inlined_call_operand.vmem [shape: f32[8,1], index: 4, kind: input, shape index: {}]   ;;  %s4576_s5 = inlined_call_operand.vmem [shape: f32[8,1], index: 5, kind: input, shape index: {}]   ;;  %s4577_s6 = inlined_call_operand.vmem [shape: f32[2,1024], index: 6, kind: input, shape index: {}]   ;;  %s4578_s7 = inlined_call_operand.vmem [shape: f32[2,8,1024], index: 7, kind: output, shape index: {}]  }
   0x1   :  { %13 = vsyncpa [#allocation7], 0  ;;  %s3125_s24 = smov 0  }
   0x2 LB: > { %s213_s27 = sshll.u32 %s4572_s1, 4  ;;  %s2778_s28 = sadd.s32 4294967295, %s3061_s24   ;;  %s3061_s24 = sphi %s3125_s24, %s19_s24   ;;  %s214_s27 = int_to_ptr.hbm [resolvable:$true] %s213_s27 }
   0x3   : > { %p2780_p0 = scmp.ge.s32.totalorder %s3061_s24, 1  ;;  %p202_p1 = scmp.lt.s32.totalorder %s3061_s24, 3 }
   0x4   : > { %p2949_p2 = scmp.eq.s32.totalorder %s2778_s28, 0  ;;  %s3063_s30 = smov [#allocation4]  }
   0x5   : > { %p3136_p3 = pnand %p2780_p0, %p202_p1  ;;  %s215_s8 = sshll.u32 %s3063_s30, 4  ;;  %s216_s8 = int_to_ptr.vmem [resolvable:$true] %s215_s8 }
   0x6   : > { %s227_s11 = sshll.u32 %s4573_s2, 4  ;;  %s3064_s12 = smov [#allocation6]   ;;  %s228_s11 = int_to_ptr.hbm [resolvable:$true] %s227_s11 }
   0x7   : > { %p2942_p4 = pneg %p3136_p3  ;;  %s229_s13 = sshll.u32 %s3064_s12, 4  ;;  %s230_s13 = int_to_ptr.vmem [resolvable:$true] %s229_s13 }
   0x8   : > { %s3065_s14 = smov 128   ;;  %s3066_s15 = smov 8  }
   0x9   : > { %p2943_p5 = pnand %p2949_p2, %p2942_p4  ;;  %265 = sbr.rel (%p3136_p3) target bundleno = 1354 (0x54a), region = 48 }
   0xb   : > { %2945 = dma.hbm_to_vmem [thread:$0]  (!%p2943_p5), %s214_s27, 512, %s216_s8, [#allocation5], %s3065_s14, %s3065_s14, %s3066_s15  }
   0xc   : > { %2948 = dma.hbm_to_vmem [thread:$0]  (!%p2943_p5), %s228_s11, 256, %s230_s13, [#allocation7], %s3065_s14, %s3065_s14, %s3066_s15  }
   0xe   : > { %3052 = dma.done.wait (%p2949_p2), [#allocation5], 512  }
   0xf   : > { %3054 = vsyncadd (%p2949_p2), [#allocation5], 4294966784 }
  0x10   : > { %3056 = dma.done.wait (%p2949_p2), [#allocation7], 256  }
  0x11   : > { %3058 = vsyncadd (%p2949_p2), [#allocation7], 4294967040  ;;  %p303_p6 = scmp.lt.s32.totalorder %s2778_s28, 1  ;;  %v328_v0 = vld [vmem:[#allocation6 + $0x8] sm:$0xff]  ;;  %v327_v1 = vld [vmem:[#allocation6] sm:$0xff]  ;;  %vm329_vm0 = vcmask 130048  }
  0x12   : > { %368 = vmatpush.msra.mxu0 %v328_v0  ;;  %v3168_v12 = vld [vmem:[#allocation4] sm:$0xff]  ;;  %vm1576_vm1 = vcmask 1043456   ;;  %v3195_v28 = vld [vmem:[#allocation4 + $0x8] sm:$0xff]  ;;  %s3067_s27 = smov 2   ;;  %s3068_s29 = smov 32   ;;  %v3215_v46 = vld [vmem:[#allocation4 + $0x10] sm:$0xff] }
  0x13   : > { %s4642_s28 = smov (!%p303_p6, %s2778_s28), 1  ;;  %v3175_v13 = vld [vmem:[%s4577_s6 + $0x1] ss:$2 sm:$0xff]  ;;  %v3180_v14 = vld [vmem:[%s4577_s6] ss:$2 sm:$0xff]  ;;  %s3069_s30 = smov 34  }
  0x14   : > { %s2932_s16 = sshll.u32 %s4642_s28, 6  ;;  %369 = vmatpush.msra.mxu0 %v327_v1  ;;  %v1709_v15 = vperm.slane %v3175_v13, 6  ;;  %v1710_v16 = vperm.slane %v3175_v13, 7  ;;  %v1821_v17 = vperm.slane %v3180_v14, 0  ;;  %v1822_v18 = vperm.slane %v3180_v14, 1  ;;  %v3238_v61 = vld [vmem:[#allocation4 + $0x18] sm:$0xff] }
  0x15   : > { %s307_s19 = scalar_lea.vmem %s4571_s0, %s2932_s16  ;;  %v3189_v19 = vld [vmem:[%s4577_s6 + $0x1] ss:$2 sm:$0xff]  ;;  %v1703_v20 = vperm.slane %v3175_v13, 0  ;;  %v1704_v21 = vperm.slane %v3175_v13, 1  ;;  %v1706_v24 = vperm.slane %v3175_v13, 3  ;;  %v1705_v32 = vperm.slane %v3175_v13, 2 }
  0x16   : > { %v319_v2 = vld [vmem:[%s307_s19] sm:$0xff]  ;;  %v320_v3 = vld [vmem:[%s307_s19 + $0x8] sm:$0xff]  ;;  %v321_v4 = vld [vmem:[%s307_s19 + $0x10] sm:$0xff]  ;;  %v1714_v22 = vrot.slane %v1710_v16, 4  ;;  %v1829_v23 = vrot.slane %v1822_v18, 4  ;;  %v2011_v25 = vperm.slane %v3189_v19, 1 }
  0x17   : > { %2791 = vmatmul.msk.f32.vlgmr.msra.gmra.mxu0 %vm329_vm0, %v319_v2  ;;  %v322_v5 = vld [vmem:[%s307_s19 + $0x18] sm:$0xff]  ;;  %v323_v6 = vld [vmem:[%s307_s19 + $0x20] sm:$0xff]  ;;  %v324_v7 = vld [vmem:[%s307_s19 + $0x28] sm:$0xff]  ;;  %v1711_v27 = vrot.slane %v1704_v21, 4  ;;  %v1712_v33 = vrot.slane %v1706_v24, 4  ;;  %v2010_v34 = vperm.slane %v3189_v19, 0 }
  0x18   : > { %v325_v8 = vld [vmem:[%s307_s19 + $0x30] sm:$0xff]  ;;  %v326_v9 = vld [vmem:[%s307_s19 + $0x38] sm:$0xff]  ;;  %v1718_v29 = vsel %vm1576_vm1, %v1709_v15, %v1714_v22  ;;  %v1833_v30 = vsel %vm1576_vm1, %v1821_v17, %v1829_v23  ;;  %v2018_v35 = vrot.slane %v2011_v25, 4  ;;  %v1827_v36 = vperm.slane %v3180_v14, 6  ;;  %v3229_v51 = vld [vmem:[%s4577_s6] ss:$2 sm:$0xff] }
  0x19   : > { %1725 = vrot.lane.b32.xlu0 %v1718_v29, %s3067_s27  ;;  %1837 = vrot.lane.b32.xlu1 %v1833_v30, %s3068_s29  ;;  %v1715_v31 = vsel %vm1576_vm1, %v1703_v20, %v1711_v27  ;;  %v1828_v37 = vperm.slane %v3180_v14, 7  ;;  %v1716_v39 = vsel %vm1576_vm1, %v1705_v32, %v1712_v33  ;;  %v1824_v41 = vperm.slane %v3180_v14, 3  ;;  %s3070_s10 = smov 64   ;;  %v2913_v17 = vld [vmem:[%s4577_s6 + $0x1] ss:$2 sm:$0xff]  ;;  %s3071_s13 = smov 66  }
  0x1a   : > { %1719 = vrot.lane.b32.xlu2 %v1715_v31, %s3067_s27  ;;  %v2022_v40 = vsel %vm1576_vm1, %v2010_v34, %v2018_v35  ;;  %v2017_v42 = vperm.slane %v3189_v19, 7  ;;  %v1708_v45 = vperm.slane %v3175_v13, 5  ;;  %v1823_v47 = vperm.slane %v3180_v14, 2  ;;  %s3072_s14 = smov 33   ;;  %s3073_s15 = smov 97  }
  0x1b   : > { %v1832_v38 = vrot.slane %v1828_v37, 4  ;;  %v1830_v48 = vrot.slane %v1824_v41, 4  ;;  %v2016_v49 = vperm.slane %v3189_v19, 6  ;;  %v1707_v52 = vperm.slane %v3175_v13, 4  ;;  %s3074_s17 = smov 65   ;;  %s3075_s18 = smov 1  }
  0x1c   : > { %v2021_v50 = vrot.slane %v2017_v42, 4  ;;  %v1713_v53 = vrot.slane %v1708_v45, 4  ;;  %v2130_v56 = vperm.slane %v3229_v51, 1  ;;  %v2013_v57 = vperm.slane %v3189_v19, 3  ;;  %s3077_s23 = smov 127   ;;  %s3078_s25 = smov 126  }
  0x1d   : > { %v1836_v44 = vsel %vm1576_vm1, %v1827_v36, %v1832_v38  ;;  %v1834_v54 = vsel %vm1576_vm1, %v1823_v47, %v1830_v48  ;;  %v1826_v60 = vperm.slane %v3180_v14, 5  ;;  %v2129_v62 = vperm.slane %v3229_v51, 0  ;;  %s3079_s26 = smov 96   ;;  %s3083_s8 = smov 62  }
  0x1e   : > { %v2025_v55 = vsel %vm1576_vm1, %v2016_v49, %v2021_v50  ;;  %v1717_v59 = vsel %vm1576_vm1, %v1707_v52, %v1713_v53  ;;  %v2137_v63 = vrot.slane %v2130_v56, 4  ;;  %v2012_v0 = vperm.slane %v3189_v19, 2 }
  0x1f   : > { %2792 = vmatmul.msk.f32.gmra.mxu0 %vm329_vm0, %v320_v3  ;;  %v2019_v1 = vrot.slane %v2013_v57, 4  ;;  %v1825_v2 = vperm.slane %v3180_v14, 4  ;;  %v1831_v3 = vrot.slane %v1826_v60, 4  ;;  %v2131_v13 = vperm.slane %v3229_v51, 2 }
  0x20   : > { %v2135_v18 = vperm.slane %v3229_v51, 6  ;;  %v2317_v20 = vperm.slane %v2913_v17, 0  ;;  %v2318_v21 = vperm.slane %v2913_v17, 1  ;;  %v2319_v23 = vperm.slane %v2913_v17, 2 }
  0x21   : > { %1721 = vrot.lane.b32.xlu0 %v1716_v39, %s3067_s27  ;;  %2026 = vrot.lane.b32.xlu1 %v2022_v40, %s3069_s30  ;;  %v2320_v24 = vperm.slane %v2913_v17, 3  ;;  %v2134_v33 = vperm.slane %v3229_v51, 5  ;;  %v2133_v34 = vperm.slane %v3229_v51, 4  ;;  %vm444_vm2 = vcmask 524552  }
  0x22   : > { %1843 = vrot.lane.b32.xlu2 %v1836_v44, %s3068_s29  ;;  %v2325_v25 = vrot.slane %v2318_v21, 4  ;;  %vm461_vm3 = vcmask 1041160   ;;  %vm462_vm4 = vcmask 4100   ;;  %vm458_vm5 = vcmask 793600  }
  0x23   : > { %v2326_v27 = vrot.slane %v2320_v24, 4  ;;  %v2139_v35 = vrot.slane %v2134_v33, 4  ;;  %vm451_vm6 = vcmask 786952   ;;  %vm3470_vm7 = vmor %vm462_vm4, %vm461_vm3  ;;  %vm470_vm8 = vcmask 262152  }
  0x24   : > { %v2329_v29 = vsel %vm1576_vm1, %v2317_v20, %v2325_v25  ;;  %vm1849_vm9 = vcmask 261120   ;;  %vm2038_vm10 = vcmask 277504   ;;  %vm317_vm11 = vcmask 535552  }
  0x25   : > { %v2330_v30 = vsel %vm1576_vm1, %v2319_v23, %v2326_v27  ;;  %v2143_v36 = vsel %vm1576_vm1, %v2133_v34, %v2139_v35  ;;  %v4580_v23 = vmov 0.0   ;;  %vm1731_vm12 = vcmask 15360  }
  0x26   : > { %313 = vst [vmem:[#allocation2] sm:$0xff] %v4580_v23  ;;  %vm2157_vm13 = vcmask 523264   ;;  %vm2345_vm14 = vcmask 539648   ;;  %vm1670_vm15 = vcmask 1039360   ;;  %vm1978_vm3 = vcmask 777216  }
  0x27   : > { %2793 = vmatmul.msk.f32.gmra.mxu0 %vm329_vm0, %v321_v4  ;;  %v2141_v4 = vsel %vm1576_vm1, %v2129_v62, %v2137_v63  ;;  %314 = vst [vmem:[#allocation2 + $0x8] sm:$0xff] %v4580_v23  ;;  %vm2097_vm4 = vcmask 769024  }
  0x28   : > { %315 = vst [vmem:[#allocation2 + $0x10] sm:$0xff] %v4580_v23 }
  0x29   : > { %1839 = vrot.lane.b32.xlu0 %v1834_v54, %s3068_s29  ;;  %2032 = vrot.lane.b32.xlu1 %v2025_v55, %s3069_s30  ;;  %316 = vst [vmem:[#allocation2 + $0x18] sm:$0xff] %v4580_v23 }
  0x2a   : > { %1723 = vrot.lane.b32.xlu2 %v1717_v59, %s3067_s27  ;;  %s3080_s27 = smov 95  }
  0x2f   : > { %2794 = vmatmul.msk.f32.gmra.mxu0 %vm329_vm0, %v322_v5  ;;  %v2023_v5 = vsel %vm1576_vm1, %v2012_v0, %v2019_v1 }
  0x31   : > { %2145 = vrot.lane.b32.xlu0 %v2141_v4, %s3070_s10  ;;  %2028 = vrot.lane.b32.xlu1 %v2023_v5, %s3069_s30 }
  0x37   : > { %2795 = vmatmul.msk.f32.gmra.mxu0 %vm329_vm0, %v323_v6  ;;  %v2015_v6 = vperm.slane %v3189_v19, 5 }
  0x3f   : > { %2796 = vmatmul.msk.f32.gmra.mxu0 %vm329_vm0, %v324_v7  ;;  %v2132_v7 = vperm.slane %v3229_v51, 3 }
  0x41   : > { %v2138_v14 = vrot.slane %v2132_v7, 4 }
  0x43   : > { %v2142_v16 = vsel %vm1576_vm1, %v2131_v13, %v2138_v14 }
  0x44   : > { %2147 = vrot.lane.b32.xlu1 %v2142_v16, %s3070_s10 }
  0x47   : > { %2797 = vmatmul.msk.f32.gmra.mxu0 %vm329_vm0, %v325_v8 }
  0x4c   : > { %2335 = vrot.lane.b32.xlu1 %v2330_v30, %s3071_s13 }
  0x4f   : > { %2798 = vmatmul.msk.f32.gmra.mxu0 %vm329_vm0, %v326_v9  ;;  %v1835_v9 = vsel %vm1576_vm1, %v1825_v2, %v1831_v3 }
  0x50   : > { %1841 = vrot.lane.b32.xlu2 %v1835_v9, %s3068_s29  ;;  %s3081_s29 = smov 94  }
  0x74   : > { %v3326_v56 = vpop.permute.xlu2 %1719 }
  0x8b   : > { %v3342_v0 = vpop.permute.xlu0 %1725  ;;  %v3350_v3 = vpop.permute.xlu1 %1837 }
  0x8c   : > { %4599 = vst [vmem:[#allocation11_spill] sm:$0xff] %v3342_v0 }
  0x93   : > { %v3364_v9 = vpop.permute.xlu0 %1721 }
  0x94   : > { %v371_v10 = vpop.f32.mrf.mxu0 }
  0x9b   : > { %v3381_v17 = vpop.permute.xlu0 %1839 }
  0x9c   : > { %v374_v11 = vpop.f32.mrf.mxu0 }
  0x9d   : > { %425 = vmatpush.msra.mxu1 %v374_v11  ;;  %v2020_v11 = vrot.slane %v2015_v6, 4 }
  0x9f   : > { %426 = vmatpush.msra.mxu1 %v371_v10  ;;  %v2014_v10 = vperm.slane %v3189_v19, 4  ;;  %v2136_v19 = vperm.slane %v3229_v51, 7 }
  0xa0   : > { %2799 = vmatmul.msk.f32.vlgmr.msra.gmra.mxu1 %vm329_vm0, %v3168_v12 }
  0xa1   : > { %v2024_v15 = vsel %vm1576_vm1, %v2014_v10, %v2020_v11  ;;  %v2140_v22 = vrot.slane %v2136_v19, 4  ;;  %v3367_v10 = vpop.permute.xlu1 %2026 }
  0xa2   : > { %2030 = vrot.lane.b32.xlu0 %v2024_v15, %s3069_s30  ;;  %4601 = vst [vmem:[#allocation13_spill] sm:$0xff] %v3367_v10  ;;  %s3082_s30 = smov 63  }
  0xa4   : > { %v377_v26 = vpop.f32.mrf.mxu0 }
  0xa8   : > { %2800 = vmatmul.msk.f32.gmra.mxu1 %vm329_vm0, %v3195_v28 }
  0xa9   : > { %v3384_v19 = vpop.permute.xlu1 %2032 }
  0xaa   : > { %2333 = vrot.lane.b32.xlu0 %v2329_v29, %s3071_s13  ;;  %4603 = vst [vmem:[#allocation15_spill] sm:$0xff] %v3384_v19 }
  0xac   : > { %v380_v43 = vpop.f32.mrf.mxu0 }
  0xad   : > { %721 = vmatpush.msra.mxu2 %v380_v43 }
  0xaf   : > { %722 = vmatpush.msra.mxu2 %v377_v26  ;;  %v2144_v26 = vsel %vm1576_vm1, %v2135_v18, %v2140_v22 }
  0xb0   : > { %2801 = vmatmul.msk.f32.gmra.mxu1 %vm329_vm0, %v3215_v46  ;;  %2827 = vmatmul.msk.f32.vlgmr.msra.gmra.mxu2 %vm329_vm0, %v3168_v12 }
  0xb1   : > { %2151 = vrot.lane.b32.xlu2 %v2144_v26, %s3070_s10  ;;  %v3401_v26 = vpop.permute.xlu0 %2145  ;;  %v3406_v29 = vpop.permute.xlu1 %2028 }
  0xb2   : > { %4605 = vst [vmem:[#allocation17_spill] sm:$0xff] %v3401_v26 }
  0xb3   : > { %4606 = vst [vmem:[#allocation18_spill] sm:$0xff] %v3406_v29 }
  0xb4   : > { %v383_v58 = vpop.f32.mrf.mxu0 }
  0xb8   : > { %2802 = vmatmul.msk.f32.gmra.mxu1 %vm329_vm0, %v3238_v61  ;;  %2828 = vmatmul.msk.f32.gmra.mxu2 %vm329_vm0, %v3195_v28 }
  0xb9   : > { %2149 = vrot.lane.b32.xlu2 %v2143_v36, %s3070_s10 }
  0xbc   : > { %v386_v8 = vpop.f32.mrf.mxu0 }
  0xbd   : > { %1010 = vmatpush.msra.mxu3 %v386_v8 }
  0xbf   : > { %1011 = vmatpush.msra.mxu3 %v383_v58 }
  0xc0   : > { %2829 = vmatmul.msk.f32.gmra.mxu2 %vm329_vm0, %v3215_v46  ;;  %2855 = vmatmul.msk.f32.vlgmr.msra.gmra.mxu3 %vm329_vm0, %v3168_v12 }
  0xc4   : > { %v389_v31 = vpop.f32.mrf.mxu0 }
  0xc8   : > { %2830 = vmatmul.msk.f32.gmra.mxu2 %vm329_vm0, %v3238_v61  ;;  %2856 = vmatmul.msk.f32.gmra.mxu3 %vm329_vm0, %v3195_v28 }
  0xcc   : > { %v392_v32 = vpop.f32.mrf.mxu0 }
  0xcd   : > { %1299 = vmatpush.msrb.mxu1 %v392_v32 }
  0xcf   : > { %1300 = vmatpush.msrb.mxu1 %v389_v31 }
  0xd0   : > { %2857 = vmatmul.msk.f32.gmra.mxu3 %vm329_vm0, %v3215_v46  ;;  %2883 = vmatmul.msk.f32.vlgmr.msrb.gmra.mxu1 %vm329_vm0, %v3168_v12 }
  0xd8   : > { %2858 = vmatmul.msk.f32.gmra.mxu3 %vm329_vm0, %v3238_v61  ;;  %2884 = vmatmul.msk.f32.gmra.mxu1 %vm329_vm0, %v3195_v28 }
  0xe0   : > { %2885 = vmatmul.msk.f32.gmra.mxu1 %vm329_vm0, %v3215_v46 }
  0xe8   : > { %2886 = vmatmul.msk.f32.gmra.mxu1 %vm329_vm0, %v3238_v61  ;;  %v3337_v61 = vpop.permute.xlu2 %1843  ;;  %vm1789_vm0 = vcmask 1031168  }
  0xe9   : > { %4598 = vst [vmem:[#allocation10_spill] sm:$0xff] %v3337_v61 }
  0xf0   : > { %v3354_v4 = vpop.permute.xlu2 %1723 }
  0xf1   : > { %4600 = vst [vmem:[#allocation12_spill] sm:$0xff] %v3354_v4 }
  0xf8   : > { %v3370_v13 = vpop.permute.xlu2 %1841 }
  0xf9   : > { %4602 = vst [vmem:[#allocation14_spill] sm:$0xff] %v3370_v13 }
 0x10b   : > { %v3386_v20 = vpop.permute.xlu2 %2151 }
 0x10c   : > { %4604 = vst [vmem:[#allocation16_spill] sm:$0xff] %v3386_v20 }
 0x113   : > { %v3413_v31 = vpop.permute.xlu2 %2149 }
 0x114   : > { %4607 = vst [vmem:[#allocation19_spill] sm:$0xff] %v3413_v31  ;;  %v3419_v34 = vpop.permute.xlu0 %2030 }
 0x115   : > { %4608 = vst [vmem:[#allocation20_spill] sm:$0xff] %v3419_v34 }
 0x11d   : > { %v428_v37 = vpop.f32.mrf.mxu1 }
 0x11e   : > { %472 = vst.sshfl [vmem:[#allocation1] sm:$0xff pattern:$0x75316420] %v428_v37  ;;  %441 = vrot.lane.b32.xlu0 %v428_v37, %s3072_s14  ;;  %v2804_v12 = vrot.slane %v428_v37, 10  ;;  %v2803_v38 = vrot.slane %v428_v37, 9  ;;  %v2805_v28 = vrot.slane %v428_v37, 11 }
 0x120   : > { %455 = vrot.lane.b32.xlu1 %v2804_v12, %s3073_s15 }
 0x125   : > { %v474_v39 = vld [vmem:[#allocation1 + $0x1] ss:$2 sm:$0xff]  ;;  %v431_v40 = vpop.f32.mrf.mxu1 }
 0x126   : > { %479 = vst.sshfl [vmem:[#allocation1] sm:$0xff pattern:$0x75316420] %v428_v37  ;;  %475 = vrot.lane.b32.xlu2 %v474_v39, %s3072_s14  ;;  %448 = vrot.lane.b32.xlu0 %v2803_v38, %s3074_s17  ;;  %v2809_v41 = vrot.slane %v431_v40, 9  ;;  %v2810_v42 = vrot.slane %v431_v40, 10  ;;  %v2811_v45 = vrot.slane %v431_v40, 11 }
 0x128   : > { %467 = vrot.lane.b32.xlu1 %v2805_v28, %s3075_s18 }
 0x12d   : > { %v481_v43 = vld [vmem:[#allocation1 + $0x1] ss:$2 sm:$0xff]  ;;  %v3306_v44 = vpop.f32.mrf.mxu1 }
 0x12e   : > { %488 = vst.sshfl [vmem:[#allocation1] sm:$0xff pattern:$0x75316420] %v428_v37  ;;  %509 = vrot.lane.b32.xlu2 %v431_v40, %s3072_s14  ;;  %515 = vrot.lane.b32.xlu0 %v2809_v41, %s3074_s17  ;;  %v2816_v46 = vrot.slane %v3306_v44, 10  ;;  %v2806_v49 = vrot.slane %v481_v43, 9  ;;  %v2817_v50 = vrot.slane %v3306_v44, 11  ;;  %v3441_v41 = vpop.permute.xlu0 %2333 }
 0x12f   : > { %v2815_v53 = vrot.slane %v3306_v44, 9  ;;  %4610 = vst [vmem:[#allocation22_spill] sm:$0xff] %v3441_v41 }
 0x130   : > { %521 = vrot.lane.b32.xlu1 %v2810_v42, %s3073_s15 }
 0x133   : > { %v3320_v52 = vpop.f32.mrf.mxu2 }
 0x134   : > { %v2831_v54 = vrot.slane %v3320_v52, 9  ;;  %v2832_v55 = vrot.slane %v3320_v52, 10  ;;  %v2833_v62 = vrot.slane %v3320_v52, 11 }
 0x135   : > { %v490_v47 = vld [vmem:[#allocation1 + $0x1] ss:$2 sm:$0xff]  ;;  %v3314_v48 = vpop.f32.mrf.mxu1 }
 0x136   : > { %499 = vst.sshfl [vmem:[#allocation1] sm:$0xff pattern:$0x75316420] %v428_v37  ;;  %529 = vrot.lane.b32.xlu2 %v2811_v45, %s3075_s18  ;;  %582 = vrot.lane.b32.xlu0 %v2816_v46, %s3073_s15  ;;  %v2807_v58 = vrot.slane %v490_v47, 10  ;;  %v2821_v59 = vrot.slane %v3314_v48, 9  ;;  %v2823_v63 = vrot.slane %v3314_v48, 11  ;;  %v3428_v37 = vpop.permute.xlu1 %2147 }
 0x137   : > { %v2822_v5 = vrot.slane %v3314_v48, 10  ;;  %4609 = vst [vmem:[#allocation21_spill] sm:$0xff] %v3428_v37 }
 0x138   : > { %570 = vrot.lane.b32.xlu1 %v3306_v44, %s3072_s14 }
 0x13b   : > { %v3346_v2 = vpop.f32.mrf.mxu2 }
 0x13c   : > { %v2838_v6 = vrot.slane %v3346_v2, 10  ;;  %v2839_v7 = vrot.slane %v3346_v2, 11  ;;  %v2837_v11 = vrot.slane %v3346_v2, 9 }
 0x13d   : > { %v501_v51 = vld [vmem:[#allocation1 + $0x1] ss:$2 sm:$0xff] }
 0x13e   : > { %533 = vst.sshfl [vmem:[#allocation1] sm:$0xff pattern:$0x75316420] %v431_v40  ;;  %484 = vrot.lane.b32.xlu2 %v2806_v49, %s3074_s17  ;;  %631 = vrot.lane.b32.xlu0 %v3314_v48, %s3072_s14  ;;  %v2808_v16 = vrot.slane %v501_v51, 11  ;;  %v3446_v43 = vpop.permute.xlu1 %2335 }
 0x13f   : > { %4611 = vst [vmem:[#allocation23_spill] sm:$0xff] %v3446_v43 }
 0x140   : > { %590 = vrot.lane.b32.xlu1 %v2817_v50, %s3075_s18 }
 0x143   : > { %v3372_v14 = vpop.f32.mrf.mxu2  ;;  %v3390_v22 = vpop.f32.mrf.mxu3 }
 0x144   : > { %v2844_v18 = vrot.slane %v3372_v14, 10  ;;  %v2845_v24 = vrot.slane %v3372_v14, 11  ;;  %v2859_v25 = vrot.slane %v3390_v22, 9  ;;  %v2843_v27 = vrot.slane %v3372_v14, 9 }
 0x145   : > { %v535_v57 = vld [vmem:[#allocation1 + $0x1] ss:$2 sm:$0xff]  ;;  %v2860_v32 = vrot.slane %v3390_v22, 10  ;;  %v2861_v35 = vrot.slane %v3390_v22, 11 }
 0x146   : > { %540 = vst.sshfl [vmem:[#allocation1] sm:$0xff pattern:$0x75316420] %v431_v40  ;;  %576 = vrot.lane.b32.xlu2 %v2815_v53, %s3074_s17  ;;  %743 = vrot.lane.b32.xlu0 %v2831_v54, %s3074_s17 }
 0x148   : > { %749 = vrot.lane.b32.xlu1 %v2832_v55, %s3073_s15 }
 0x14b   : > { %v3417_v33 = vpop.f32.mrf.mxu2  ;;  %v3432_v39 = vpop.f32.mrf.mxu3 }
 0x14c   : > { %v2851_v38 = vrot.slane %v3417_v33, 11  ;;  %v2866_v45 = vrot.slane %v3432_v39, 10  ;;  %v2865_v46 = vrot.slane %v3432_v39, 9  ;;  %v2867_v53 = vrot.slane %v3432_v39, 11 }
 0x14d   : > { %v3332_v60 = vld [vmem:[#allocation1 + $0x1] ss:$2 sm:$0xff]  ;;  %v3461_v54 = vpop.f32.mrf.mxu1 }
 0x14e   : > { %549 = vst.sshfl [vmem:[#allocation1] sm:$0xff pattern:$0x75316420] %v431_v40  ;;  %737 = vrot.lane.b32.xlu2 %v3320_v52, %s3072_s14  ;;  %493 = vrot.lane.b32.xlu0 %v2807_v58, %s3073_s15  ;;  %v2812_v58 = vrot.slane %v3332_v60, 9 }
 0x150   : > { %637 = vrot.lane.b32.xlu1 %v2821_v59, %s3074_s17 }
 0x153   : > { %v3481_v60 = vpop.f32.mrf.mxu3 }
 0x155   : > { %v3344_v1 = vld [vmem:[#allocation1 + $0x1] ss:$2 sm:$0xff] }
 0x156   : > { %560 = vst.sshfl [vmem:[#allocation1] sm:$0xff pattern:$0x75316420] %v431_v40  ;;  %757 = vrot.lane.b32.xlu2 %v2833_v62, %s3075_s18  ;;  %651 = vrot.lane.b32.xlu0 %v2823_v63, %s3075_s18  ;;  %v2850_v40 = vrot.slane %v3417_v33, 10 }
 0x158   : > { %798 = vrot.lane.b32.xlu1 %v3346_v2, %s3072_s14 }
 0x15d   : > { %v3359_v8 = vld [vmem:[#allocation1 + $0x1] ss:$2 sm:$0xff] }
 0x15e   : > { %594 = vst.sshfl [vmem:[#allocation1] sm:$0xff pattern:$0x75316420] %v3306_v44  ;;  %643 = vrot.lane.b32.xlu2 %v2822_v5, %s3073_s15  ;;  %810 = vrot.lane.b32.xlu0 %v2838_v6, %s3073_s15  ;;  %v2887_v6 = vrot.slane %v3461_v54, 9  ;;  %v2814_v31 = vrot.slane %v3359_v8, 11  ;;  %v4589_v8 = vrot.slane %v3367_v10, 4 }
 0x160   : > { %818 = vrot.lane.b32.xlu1 %v2839_v7, %s3075_s18  ;;  %v2888_v7 = vrot.slane %v3461_v54, 10 }
 0x165   : > { %v3374_v15 = vld [vmem:[#allocation1 + $0x1] ss:$2 sm:$0xff] }
 0x166   : > { %601 = vst.sshfl [vmem:[#allocation1] sm:$0xff pattern:$0x75316420] %v3306_v44  ;;  %804 = vrot.lane.b32.xlu2 %v2837_v11, %s3074_s17  ;;  %859 = vrot.lane.b32.xlu0 %v3372_v14, %s3072_s14 }
 0x168   : > { %504 = vrot.lane.b32.xlu1 %v2808_v16, %s3075_s18 }
 0x16d   : > { %v3388_v21 = vld [vmem:[#allocation1 + $0x1] ss:$2 sm:$0xff] }
 0x16e   : > { %610 = vst.sshfl [vmem:[#allocation1] sm:$0xff pattern:$0x75316420] %v3306_v44  ;;  %536 = vrot.lane.b32.xlu0 %v535_v57, %s3072_s14  ;;  %871 = vrot.lane.b32.xlu2 %v2844_v18, %s3073_s15 }
 0x170   : > { %1026 = vrot.lane.b32.xlu1 %v3390_v22, %s3072_s14 }
 0x175   : > { %v3408_v30 = vld [vmem:[#allocation1 + $0x1] ss:$2 sm:$0xff] }
 0x176   : > { %621 = vst.sshfl [vmem:[#allocation1] sm:$0xff pattern:$0x75316420] %v3306_v44  ;;  %879 = vrot.lane.b32.xlu0 %v2845_v24, %s3075_s18  ;;  %1032 = vrot.lane.b32.xlu2 %v2859_v25, %s3074_s17  ;;  %v2849_v44 = vrot.slane %v3417_v33, 9  ;;  %v2873_v25 = vrot.slane %v3481_v60, 11 }
 0x178   : > { %865 = vrot.lane.b32.xlu1 %v2843_v27, %s3074_s17  ;;  %v2871_v27 = vrot.slane %v3481_v60, 9 }
 0x17d   : > { %v3422_v36 = vld [vmem:[#allocation1 + $0x1] ss:$2 sm:$0xff] }
 0x17e   : > { %655 = vst.sshfl [vmem:[#allocation1] sm:$0xff pattern:$0x75316420] %v3314_v48  ;;  %1038 = vrot.lane.b32.xlu0 %v2860_v32, %s3073_s15  ;;  %920 = vrot.lane.b32.xlu2 %v3417_v33, %s3072_s14  ;;  %v2889_v32 = vrot.slane %v3461_v54, 11 }
 0x180   : > { %v476_v12 = vpop.permute.xlu2 %475  ;;  %1046 = vrot.lane.b32.xlu1 %v2861_v35, %s3075_s18 }
 0x185   : > { %v3435_v28 = vld [vmem:[#allocation1 + $0x1] ss:$2 sm:$0xff] }
 0x186   : > { %662 = vst.sshfl [vmem:[#allocation1] sm:$0xff pattern:$0x75316420] %v3314_v48  ;;  %940 = vrot.lane.b32.xlu2 %v2851_v38, %s3075_s18  ;;  %1087 = vrot.lane.b32.xlu0 %v3432_v39, %s3072_s14 }
 0x188   : > { %v3443_v42 = vpop.permute.xlu2 %509  ;;  %932 = vrot.lane.b32.xlu1 %v2850_v40, %s3073_s15 }
 0x18d   : > { %v3451_v47 = vld [vmem:[#allocation1 + $0x1] ss:$2 sm:$0xff] }
 0x18e   : > { %671 = vst.sshfl [vmem:[#allocation1] sm:$0xff pattern:$0x75316420] %v3314_v48  ;;  %926 = vrot.lane.b32.xlu0 %v2849_v44, %s3074_s17  ;;  %1099 = vrot.lane.b32.xlu2 %v2866_v45, %s3073_s15 }
 0x190   : > { %v442_v49 = vpop.permute.xlu0 %441  ;;  %v3456_v50 = vpop.permute.xlu2 %529  ;;  %1093 = vrot.lane.b32.xlu1 %v2865_v46, %s3074_s17  ;;  %v2813_v46 = vrot.slane %v3344_v1, 10 }
 0x191   : > { %445 = vst.msk [vmem:[#allocation2] sm:$0x1] %vm444_vm2, %v442_v49  ;;  %v2872_v49 = vrot.slane %v3481_v60, 10 }
 0x192   : > { %v456_v51 = vpop.permute.xlu1 %455 }
 0x193   : > { %v457_v57 = vrot.slane %v456_v51, 4 }
 0x195   : > { %v3463_v55 = vld [vmem:[#allocation1 + $0x1] ss:$2 sm:$0xff] }
 0x196   : > { %682 = vst.sshfl [vmem:[#allocation1] sm:$0xff pattern:$0x75316420] %v3314_v48  ;;  %1107 = vrot.lane.b32.xlu0 %v2867_v53, %s3075_s18  ;;  %1315 = vrot.lane.b32.xlu2 %v3461_v54, %s3072_s14  ;;  %v459_v48 = vsel %vm458_vm5, %v457_v57, %v456_v51 }
 0x198   : > { %v449_v62 = vpop.permute.xlu0 %448  ;;  %v485_v63 = vpop.permute.xlu2 %484  ;;  %545 = vrot.lane.b32.xlu1 %v2812_v58, %s3074_s17 }
 0x199   : > { %452 = vst.msk [vmem:[#allocation2] sm:$0x1] %vm451_vm6, %v449_v62 }
 0x19a   : > { %464 = vst.msk [vmem:[#allocation2] sm:$0x11] %vm3470_vm7, %v459_v48  ;;  %v468_v5 = vpop.permute.xlu1 %467  ;;  %v3537_v48 = vpop.f32.mrf.mxu3 }
 0x19b   : > { %471 = vst.msk [vmem:[#allocation2 + $0x4] sm:$0x1] %vm470_vm8, %v468_v5 }
 0x19c   : > { %478 = vst.msk [vmem:[#allocation2 + $0x4] sm:$0x1] %vm444_vm2, %v476_v12  ;;  %v3507_v12 = vpop.f32.mrf.mxu1 }
 0x19d   : > { %v3485_v11 = vld [vmem:[#allocation1 + $0x1] ss:$2 sm:$0xff]  ;;  %487 = vst.msk [vmem:[#allocation2 + $0x4] sm:$0x1] %vm451_vm6, %v485_v63  ;;  %v2894_v45 = vrot.slane %v3507_v12, 10  ;;  %v2895_v1 = vrot.slane %v3507_v12, 11 }
 0x19e   : > { %761 = vst.sshfl [vmem:[#allocation1] sm:$0xff pattern:$0x75316420] %v3320_v52  ;;  %1148 = vrot.lane.b32.xlu2 %v3481_v60, %s3072_s14  ;;  %1321 = vrot.lane.b32.xlu0 %v2887_v6, %s3074_s17  ;;  %v2893_v62 = vrot.slane %v3507_v12, 9 }
 0x1a0   : > { %v3492_v16 = vpop.permute.xlu0 %515  ;;  %v3494_v18 = vpop.permute.xlu2 %576  ;;  %1327 = vrot.lane.b32.xlu1 %v2888_v7, %s3073_s15 }
 0x1a2   : > { %v3497_v24 = vpop.permute.xlu1 %521 }
 0x1a5   : > { %v3502_v35 = vld [vmem:[#allocation1 + $0x1] ss:$2 sm:$0xff] }
 0x1a6   : > { %768 = vst.sshfl [vmem:[#allocation1] sm:$0xff pattern:$0x75316420] %v3320_v52  ;;  %1168 = vrot.lane.b32.xlu2 %v2873_v25, %s3075_s18  ;;  %1154 = vrot.lane.b32.xlu0 %v2871_v27, %s3074_s17  ;;  %v2877_v25 = vrot.slane %v3537_v48, 9  ;;  %v2879_v27 = vrot.slane %v3537_v48, 11 }
 0x1a8   : > { %v3509_v38 = vpop.permute.xlu0 %582  ;;  %v738_v40 = vpop.permute.xlu2 %737  ;;  %1335 = vrot.lane.b32.xlu1 %v2889_v32, %s3075_s18  ;;  %v4579_v32 = vrot.slane %v3350_v3, 4 }
 0x1a9   : > { %740 = vst.msk [vmem:[#allocation2 + $0x1] sm:$0x1] %vm444_vm2, %v738_v40 }
 0x1aa   : > { %v3513_v44 = vpop.permute.xlu1 %570  ;;  %v3557_v40 = vsel %vm1849_vm9, %v4579_v32, %v3350_v3 }
 0x1ab   : > { %4614 = vst [vmem:[#allocation24_spill] sm:$0xff] %v3557_v40 }
 0x1ad   : > { %v3518_v51 = vld [vmem:[#allocation1 + $0x1] ss:$2 sm:$0xff] }
 0x1ae   : > { %777 = vst.sshfl [vmem:[#allocation1] sm:$0xff pattern:$0x75316420] %v3320_v52  ;;  %554 = vrot.lane.b32.xlu2 %v2813_v46, %s3073_s15  ;;  %1388 = vrot.lane.b32.xlu0 %v2894_v45, %s3073_s15  ;;  %v3559_v45 = vpop.f32.mrf.mxu1 }
 0x1af   : > { %v2899_v32 = vrot.slane %v3559_v45, 9 }
 0x1b0   : > { %v3523_v53 = vpop.permute.xlu0 %631  ;;  %v3525_v57 = vpop.permute.xlu2 %757  ;;  %1160 = vrot.lane.b32.xlu1 %v2872_v49, %s3073_s15 }
 0x1b2   : > { %v3528_v58 = vpop.permute.xlu1 %590 }
 0x1b5   : > { %v3532_v63 = vld [vmem:[#allocation1 + $0x1] ss:$2 sm:$0xff] }
 0x1b6   : > { %788 = vst.sshfl [vmem:[#allocation1] sm:$0xff pattern:$0x75316420] %v3320_v52  ;;  %1396 = vrot.lane.b32.xlu0 %v2895_v1, %s3075_s18  ;;  %1382 = vrot.lane.b32.xlu2 %v2893_v62, %s3074_s17  ;;  %v3588_v40 = vpop.f32.mrf.mxu1 }
 0x1b8   : > { %v3539_v5 = vpop.permute.xlu2 %643  ;;  %v744_v6 = vpop.permute.xlu0 %743  ;;  %1376 = vrot.lane.b32.xlu1 %v3507_v12, %s3072_s14 }
 0x1b9   : > { %746 = vst.msk [vmem:[#allocation2 + $0x1] sm:$0x1] %vm451_vm6, %v744_v6  ;;  %v2900_v6 = vrot.slane %v3559_v45, 10 }
 0x1ba   : > { %v750_v7 = vpop.permute.xlu1 %749 }
 0x1bd   : > { %v3546_v52 = vld [vmem:[#allocation1 + $0x1] ss:$2 sm:$0xff] }
 0x1be   : > { %822 = vst.sshfl [vmem:[#allocation1] sm:$0xff pattern:$0x75316420] %v3346_v2  ;;  %1209 = vrot.lane.b32.xlu0 %v3537_v48, %s3072_s14  ;;  %1215 = vrot.lane.b32.xlu2 %v2877_v25, %s3074_s17 }
 0x1c0   : > { %v494_v46 = vpop.permute.xlu0 %493  ;;  %v3561_v49 = vpop.permute.xlu2 %804  ;;  %1229 = vrot.lane.b32.xlu1 %v2879_v27, %s3075_s18 }
 0x1c1   : > { %v495_v1 = vrot.slane %v494_v46, 4 }
 0x1c2   : > { %v3564_v62 = vpop.permute.xlu1 %637 }
 0x1c3   : > { %v496_v25 = vsel %vm458_vm5, %v495_v1, %v494_v46  ;;  %v2878_v1 = vrot.slane %v3537_v48, 10 }
 0x1c4   : > { %498 = vst.msk [vmem:[#allocation2 + $0x4] sm:$0x11] %vm3470_vm7, %v496_v25  ;;  %v2901_v25 = vrot.slane %v3559_v45, 11 }
 0x1c5   : > { %v3571_v23 = vld [vmem:[#allocation1 + $0x1] ss:$2 sm:$0xff] }
 0x1c6   : > { %829 = vst.sshfl [vmem:[#allocation1] sm:$0xff pattern:$0x75316420] %v3346_v2  ;;  %1437 = vrot.lane.b32.xlu0 %v3559_v45, %s3072_s14  ;;  %1449 = vrot.lane.b32.xlu2 %v2900_v6, %s3073_s15 }
 0x1c8   : > { %v3577_v27 = vpop.permute.xlu0 %651  ;;  %v3579_v20 = vpop.permute.xlu2 %871  ;;  %1443 = vrot.lane.b32.xlu1 %v2899_v32, %s3074_s17 }
 0x1ca   : > { %v3582_v46 = vpop.permute.xlu1 %798 }
 0x1cd   : > { %v3586_v19 = vld [vmem:[#allocation1 + $0x1] ss:$2 sm:$0xff] }
 0x1ce   : > { %838 = vst.sshfl [vmem:[#allocation1] sm:$0xff pattern:$0x75316420] %v3346_v2  ;;  %1221 = vrot.lane.b32.xlu0 %v2878_v1, %s3073_s15  ;;  %1457 = vrot.lane.b32.xlu2 %v2901_v25, %s3075_s18  ;;  %v2819_v1 = vrot.slane %v3408_v30, 10  ;;  %v751_v25 = vrot.slane %v750_v7, 4  ;;  %v2905_v30 = vrot.slane %v3588_v40, 9 }
 0x1d0   : > { %v3593_v6 = vpop.permute.xlu0 %810  ;;  %v1033_v61 = vpop.permute.xlu2 %1032  ;;  %1498 = vrot.lane.b32.xlu1 %v3588_v40, %s3072_s14  ;;  %v752_v43 = vsel %vm458_vm5, %v751_v25, %v750_v7 }
 0x1d1   : > { %754 = vst.msk [vmem:[#allocation2 + $0x1] sm:$0x11] %vm3470_vm7, %v752_v43 }
 0x1d2   : > { %v3597_v32 = vpop.permute.xlu1 %818  ;;  %760 = vst.msk [vmem:[#allocation2 + $0x5] sm:$0x1] %vm470_vm8, %v3525_v57 }
 0x1d5   : > { %v3600_v0 = vld [vmem:[#allocation1 + $0x1] ss:$2 sm:$0xff] }
 0x1d6   : > { %849 = vst.sshfl [vmem:[#allocation1] sm:$0xff pattern:$0x75316420] %v3346_v2  ;;  %565 = vrot.lane.b32.xlu0 %v2814_v31, %s3075_s18  ;;  %597 = vrot.lane.b32.xlu2 %v3374_v15, %s3072_s14  ;;  %v2906_v15 = vrot.slane %v3588_v40, 10  ;;  %v3622_v31 = vsel %vm2038_vm10, %v4589_v8, %v3367_v10 }
 0x1d7   : > { %4615 = vst [vmem:[#allocation25_spill] sm:$0xff] %v3622_v31 }
 0x1d8   : > { %v3607_v34 = vpop.permute.xlu0 %859  ;;  %v3609_v41 = vpop.permute.xlu2 %920  ;;  %615 = vrot.lane.b32.xlu1 %v2819_v1, %s3073_s15  ;;  %v523_v1 = vrot.slane %v3497_v24, 4 }
 0x1da   : > { %v505_v2 = vpop.permute.xlu1 %504  ;;  %v524_v43 = vsel %vm458_vm5, %v523_v1, %v3497_v24  ;;  %v2907_v24 = vrot.slane %v3588_v40, 11 }
 0x1db   : > { %507 = vst.msk [vmem:[#allocation2 + $0x8] sm:$0x1] %vm470_vm8, %v505_v2 }
 0x1dc   : > { %512 = vst.msk [vmem:[#allocation2 + $0x8] sm:$0x1] %vm444_vm2, %v3443_v42 }
 0x1dd   : > { %v3628_v7 = vld [vmem:[#allocation1 + $0x1] ss:$2 sm:$0xff]  ;;  %518 = vst.msk [vmem:[#allocation2 + $0x8] sm:$0x1] %vm451_vm6, %v3492_v16  ;;  %v2820_v16 = vrot.slane %v3422_v36, 11  ;;  %v2818_v36 = vrot.slane %v3388_v21, 9 }
 0x1de   : > { %883 = vst.sshfl [vmem:[#allocation1] sm:$0xff pattern:$0x75316420] %v3372_v14  ;;  %1510 = vrot.lane.b32.xlu2 %v2906_v15, %s3073_s15  ;;  %1504 = vrot.lane.b32.xlu0 %v2905_v30, %s3074_s17  ;;  %v2825_v21 = vrot.slane %v3463_v55, 10 }
 0x1df   : > { %526 = vst.msk [vmem:[#allocation2 + $0x8] sm:$0x11] %vm3470_vm7, %v524_v43 }
 0x1e0   : > { %v537_v57 = vpop.permute.xlu0 %536  ;;  %v3641_v25 = vpop.permute.xlu2 %940  ;;  %658 = vrot.lane.b32.xlu1 %v3435_v28, %s3072_s14  ;;  %532 = vst.msk [vmem:[#allocation2 + $0xc] sm:$0x1] %vm470_vm8, %v3456_v50  ;;  %v2826_v28 = vrot.slane %v3485_v11, 11  ;;  %v2834_v11 = vrot.slane %v3518_v51, 9  ;;  %v2841_v51 = vrot.slane %v3600_v0, 10 }
 0x1e1   : > { %539 = vst.msk [vmem:[#allocation2 + $0xc] sm:$0x1] %vm444_vm2, %v537_v57 }
 0x1e2   : > { %v1027_v42 = vpop.permute.xlu1 %1026 }
 0x1e3   : > { %1029 = vst.msk [vmem:[#allocation2 + $0x2] sm:$0x1] %vm444_vm2, %v1027_v42 }
 0x1e4   : > { %1035 = vst.msk [vmem:[#allocation2 + $0x2] sm:$0x1] %vm451_vm6, %v1033_v61  ;;  %v2824_v61 = vrot.slane %v3451_v47, 9  ;;  %v2835_v47 = vrot.slane %v3532_v63, 10 }
 0x1e5   : > { %v885_v2 = vld [vmem:[#allocation1 + $0x1] ss:$2 sm:$0xff] }
 0x1e6   : > { %890 = vst.sshfl [vmem:[#allocation1] sm:$0xff pattern:$0x75316420] %v3372_v14  ;;  %626 = vrot.lane.b32.xlu2 %v2820_v16, %s3075_s18  ;;  %1518 = vrot.lane.b32.xlu0 %v2907_v24, %s3075_s18 }
 0x1e8   : > { %v3656_v50 = vpop.permute.xlu0 %879  ;;  %v3658_v15 = vpop.permute.xlu2 %1099  ;;  %687 = vrot.lane.b32.xlu1 %v2826_v28, %s3075_s18 }
 0x1ea   : > { %v3661_v30 = vpop.permute.xlu1 %865 }
 0x1ed   : > { %v892_v1 = vld [vmem:[#allocation1 + $0x1] ss:$2 sm:$0xff] }
 0x1ee   : > { %899 = vst.sshfl [vmem:[#allocation1] sm:$0xff pattern:$0x75316420] %v3372_v14  ;;  %667 = vrot.lane.b32.xlu2 %v2824_v61, %s3074_s17  ;;  %606 = vrot.lane.b32.xlu0 %v2818_v36, %s3074_s17 }
 0x1f0   : > { %v1039_v43 = vpop.permute.xlu0 %1038  ;;  %v1316_v57 = vpop.permute.xlu2 %1315  ;;  %773 = vrot.lane.b32.xlu1 %v2834_v11, %s3074_s17 }
 0x1f1   : > { %1318 = vst.msk [vmem:[#allocation2 + $0x3] sm:$0x1] %vm444_vm2, %v1316_v57 }
 0x1f2   : > { %v1047_v42 = vpop.permute.xlu1 %1046 }
 0x1f5   : > { %v901_v24 = vld [vmem:[#allocation1 + $0x1] ss:$2 sm:$0xff] }
 0x1f6   : > { %910 = vst.sshfl [vmem:[#allocation1] sm:$0xff pattern:$0x75316420] %v3372_v14  ;;  %782 = vrot.lane.b32.xlu2 %v2835_v47, %s3073_s15  ;;  %676 = vrot.lane.b32.xlu0 %v2825_v21, %s3073_s15  ;;  %v1040_v14 = vrot.slane %v1039_v43, 4 }
 0x1f8   : > { %v3677_v16 = vpop.permute.xlu0 %1087  ;;  %v3679_v28 = vpop.permute.xlu2 %1148  ;;  %843 = vrot.lane.b32.xlu1 %v2841_v51, %s3073_s15  ;;  %v1041_v36 = vsel %vm458_vm5, %v1040_v14, %v1039_v43 }
 0x1f9   : > { %1043 = vst.msk [vmem:[#allocation2 + $0x2] sm:$0x11] %vm3470_vm7, %v1041_v36 }
 0x1fa   : > { %v3682_v61 = vpop.permute.xlu1 %932  ;;  %1049 = vst.msk [vmem:[#allocation2 + $0x6] sm:$0x1] %vm470_vm8, %v1047_v42 }
 0x1fd   : > { %v912_v63 = vld [vmem:[#allocation1 + $0x1] ss:$2 sm:$0xff] }
 0x1fe   : > { %944 = vst.sshfl [vmem:[#allocation1] sm:$0xff pattern:$0x75316420] %v3417_v33  ;;  %825 = vrot.lane.b32.xlu2 %v3571_v23, %s3072_s14  ;;  %764 = vrot.lane.b32.xlu0 %v3502_v35, %s3072_s14  ;;  %v2842_v23 = vrot.slane %v3628_v7, 11  ;;  %v2836_v35 = vrot.slane %v3546_v52, 11  ;;  %v2846_v52 = vrot.slane %v892_v1, 9 }
 0x1ff   : > { %v2840_v7 = vrot.slane %v3586_v19, 9  ;;  %v2847_v1 = vrot.slane %v901_v24, 10 }
 0x200   : > { %v3689_v55 = vpop.permute.xlu0 %926  ;;  %v3691_v0 = vpop.permute.xlu2 %1168  ;;  %886 = vrot.lane.b32.xlu1 %v885_v2, %s3072_s14  ;;  %v2848_v2 = vrot.slane %v912_v63, 11 }
 0x202   : > { %v3697_v11 = vpop.permute.xlu1 %1093 }
 0x205   : > { %v946_v57 = vld [vmem:[#allocation1 + $0x1] ss:$2 sm:$0xff] }
 0x206   : > { %951 = vst.sshfl [vmem:[#allocation1] sm:$0xff pattern:$0x75316420] %v3417_v33  ;;  %854 = vrot.lane.b32.xlu2 %v2842_v23, %s3075_s18  ;;  %793 = vrot.lane.b32.xlu0 %v2836_v35, %s3075_s18 }
 0x208   : > { %v3705_v43 = vpop.permute.xlu0 %1107  ;;  %v555_v47 = vpop.permute.xlu2 %554  ;;  %915 = vrot.lane.b32.xlu1 %v2848_v2, %s3075_s18 }
 0x209   : > { %v556_v21 = vrot.slane %v555_v47, 4 }
 0x20a   : > { %v546_v51 = vpop.permute.xlu1 %545 }
 0x20b   : > { %v557_v42 = vsel %vm458_vm5, %v556_v21, %v555_v47  ;;  %548 = vst.msk [vmem:[#allocation2 + $0xc] sm:$0x1] %vm451_vm6, %v546_v51 }
 0x20c   : > { %559 = vst.msk [vmem:[#allocation2 + $0xc] sm:$0x11] %vm3470_vm7, %v557_v42 }
 0x20d   : > { %v953_v14 = vld [vmem:[#allocation1 + $0x1] ss:$2 sm:$0xff] }
 0x20e   : > { %960 = vst.sshfl [vmem:[#allocation1] sm:$0xff pattern:$0x75316420] %v3417_v33  ;;  %895 = vrot.lane.b32.xlu2 %v2846_v52, %s3074_s17  ;;  %834 = vrot.lane.b32.xlu0 %v2840_v7, %s3074_s17  ;;  %v2852_v63 = vrot.slane %v953_v14, 9 }
 0x210   : > { %v1322_v36 = vpop.permute.xlu0 %1321  ;;  %v3716_v23 = vpop.permute.xlu2 %1382  ;;  %956 = vrot.lane.b32.xlu1 %v2852_v63, %s3074_s17 }
 0x211   : > { %1324 = vst.msk [vmem:[#allocation2 + $0x3] sm:$0x1] %vm451_vm6, %v1322_v36 }
 0x212   : > { %v1328_v35 = vpop.permute.xlu1 %1327 }
 0x213   : > { %v1329_v2 = vrot.slane %v1328_v35, 4 }
 0x215   : > { %v962_v47 = vld [vmem:[#allocation1 + $0x1] ss:$2 sm:$0xff]  ;;  %v1330_v19 = vsel %vm458_vm5, %v1329_v2, %v1328_v35 }
 0x216   : > { %971 = vst.sshfl [vmem:[#allocation1] sm:$0xff pattern:$0x75316420] %v3417_v33  ;;  %904 = vrot.lane.b32.xlu0 %v2847_v1, %s3073_s15  ;;  %v2853_v21 = vrot.slane %v962_v47, 10 }
 0x217   : > { %1332 = vst.msk [vmem:[#allocation2 + $0x3] sm:$0x11] %vm3470_vm7, %v1330_v19 }
 0x218   : > { %v3725_v51 = vpop.permute.xlu0 %1154  ;;  %v3727_v42 = vpop.permute.xlu2 %1215  ;;  %965 = vrot.lane.b32.xlu2 %v2853_v21, %s3073_s15 }
 0x21a   : > { %v1336_v52 = vpop.permute.xlu1 %1335 }
 0x21b   : > { %1338 = vst.msk [vmem:[#allocation2 + $0x7] sm:$0x1] %vm470_vm8, %v1336_v52 }
 0x21d   : > { %v973_v24 = vld [vmem:[#allocation1 + $0x1] ss:$2 sm:$0xff] }
 0x21e   : > { %1050 = vst.sshfl [vmem:[#allocation1] sm:$0xff pattern:$0x75316420] %v3390_v22  ;;  %947 = vrot.lane.b32.xlu0 %v946_v57, %s3072_s14  ;;  %v2854_v63 = vrot.slane %v973_v24, 11 }
 0x220   : > { %v3733_v33 = vpop.permute.xlu0 %1388  ;;  %v3735_v7 = vpop.permute.xlu2 %1449 }
 0x222   : > { %v3737_v14 = vpop.permute.xlu1 %1160 }
 0x225   : > { %v1052_v36 = vld [vmem:[#allocation1 + $0x1] ss:$2 sm:$0xff] }
 0x226   : > { %1053 = vrot.lane.b32.xlu2 %v1052_v36, %s3072_s14  ;;  %1057 = vst.sshfl [vmem:[#allocation1] sm:$0xff pattern:$0x75316420] %v3390_v22  ;;  %976 = vrot.lane.b32.xlu0 %v2854_v63, %s3075_s18 }
 0x228   : > { %v3742_v35 = vpop.permute.xlu0 %1396  ;;  %v3744_v2 = vpop.permute.xlu2 %1457 }
 0x22a   : > { %v3746_v1 = vpop.permute.xlu1 %1376 }
 0x22d   : > { %v1059_v57 = vld [vmem:[#allocation1 + $0x1] ss:$2 sm:$0xff] }
 0x22e   : > { %v2862_v47 = vrot.slane %v1059_v57, 9  ;;  %1066 = vst.sshfl [vmem:[#allocation1] sm:$0xff pattern:$0x75316420] %v3390_v22 }
 0x230   : > { %v3749_v19 = vpop.permute.xlu0 %1209  ;;  %v598_v21 = vpop.permute.xlu2 %597  ;;  %1062 = vrot.lane.b32.xlu0 %v2862_v47, %s3074_s17 }
 0x232   : > { %v3752_v52 = vpop.permute.xlu1 %1229 }
 0x235   : > { %v1068_v24 = vld [vmem:[#allocation1 + $0x1] ss:$2 sm:$0xff] }
 0x236   : > { %v2863_v36 = vrot.slane %v1068_v24, 10  ;;  %1077 = vst.sshfl [vmem:[#allocation1] sm:$0xff pattern:$0x75316420] %v3390_v22 }
 0x238   : > { %v3755_v63 = vpop.permute.xlu0 %1437  ;;  %1071 = vrot.lane.b32.xlu1 %v2863_v36, %s3073_s15  ;;  %v3758_v8 = vpop.permute.xlu2 %1510  ;;  %v584_v36 = vrot.slane %v3509_v38, 4 }
 0x239   : > { %4616 = vst [vmem:[#allocation26_spill] sm:$0xff] %v3758_v8 }
 0x23a   : > { %v3760_v57 = vpop.permute.xlu1 %1443 }
 0x23d   : > { %v1079_v31 = vld [vmem:[#allocation1 + $0x1] ss:$2 sm:$0xff] }
 0x23e   : > { %v2864_v13 = vrot.slane %v1079_v31, 11  ;;  %1111 = vst.sshfl [vmem:[#allocation1] sm:$0xff pattern:$0x75316420] %v3432_v39 }
 0x240   : > { %v3763_v26 = vpop.permute.xlu0 %1221  ;;  %1082 = vrot.lane.b32.xlu2 %v2864_v13, %s3075_s18  ;;  %v627_v47 = vpop.permute.xlu2 %626  ;;  %v585_v13 = vsel %vm458_vm5, %v584_v36, %v3509_v38 }
 0x242   : > { %v3766_v24 = vpop.permute.xlu1 %1498 }
 0x243   : > { %4617 = vst [vmem:[#allocation27_spill] sm:$0xff] %v3766_v24 }
 0x245   : > { %v1113_v22 = vld [vmem:[#allocation1 + $0x1] ss:$2 sm:$0xff] }
 0x246   : > { %1114 = vrot.lane.b32.xlu1 %v1113_v22, %s3072_s14  ;;  %1118 = vst.sshfl [vmem:[#allocation1] sm:$0xff pattern:$0x75316420] %v3432_v39 }
 0x248   : > { %v566_v37 = vpop.permute.xlu0 %565  ;;  %v668_v4 = vpop.permute.xlu2 %667 }
 0x249   : > { %568 = vst.msk [vmem:[#allocation2 + $0x10] sm:$0x1] %vm470_vm8, %v566_v37 }
 0x24a   : > { %573 = vst.msk [vmem:[#allocation2 + $0x10] sm:$0x1] %vm444_vm2, %v3513_v44  ;;  %v616_v31 = vpop.permute.xlu1 %615  ;;  %v4619_v44 = vmov 0.0  }
 0x24b   : > { %579 = vst.msk [vmem:[#allocation2 + $0x10] sm:$0x1] %vm451_vm6, %v3494_v18 }
 0x24c   : > { %587 = vst.msk [vmem:[#allocation2 + $0x10] sm:$0x11] %vm3470_vm7, %v585_v13 }
 0x24d   : > { %593 = vst.msk [vmem:[#allocation2 + $0x14] sm:$0x1] %vm470_vm8, %v3528_v58  ;;  %v1120_v22 = vld [vmem:[#allocation1 + $0x1] ss:$2 sm:$0xff] }
 0x24e   : > { %600 = vst.msk [vmem:[#allocation2 + $0x14] sm:$0x1] %vm444_vm2, %v598_v21  ;;  %v2868_v37 = vrot.slane %v1120_v22, 9  ;;  %v617_v22 = vrot.slane %v616_v31, 4 }
 0x24f   : > { %1127 = vst.sshfl [vmem:[#allocation1] sm:$0xff pattern:$0x75316420] %v3432_v39 }
 0x250   : > { %1123 = vrot.lane.b32.xlu2 %v2868_v37, %s3074_s17  ;;  %v3785_v38 = vpop.permute.xlu0 %1504  ;;  %318 = vst.msk [vmem:[#allocation2 + $0x20] sm:$0xf] %vm317_vm11, %v4619_v44  ;;  %v783_v18 = vpop.permute.xlu2 %782  ;;  %v618_v44 = vsel %vm458_vm5, %v617_v22, %v616_v31 }
 0x251   : > { %4618 = vst [vmem:[#allocation28_spill] sm:$0xff] %v3785_v38  ;;  %v645_v38 = vrot.slane %v3539_v5, 4 }
 0x252   : > { %v659_v13 = vpop.permute.xlu1 %658 }
 0x256   : > { %v1129_v36 = vld [vmem:[#allocation1 + $0x1] ss:$2 sm:$0xff] }
 0x257   : > { %v2869_v10 = vrot.slane %v1129_v36, 10  ;;  %1138 = vst.sshfl [vmem:[#allocation1] sm:$0xff pattern:$0x75316420] %v3432_v39 }
 0x258   : > { %v3789_v58 = vpop.permute.xlu0 %1518  ;;  %v826_v21 = vpop.permute.xlu2 %825 }
 0x259   : > { %1132 = vrot.lane.b32.xlu0 %v2869_v10, %s3073_s15  ;;  %v646_v10 = vsel %vm458_vm5, %v645_v38, %v3539_v5 }
 0x25a   : > { %v688_v8 = vpop.permute.xlu1 %687 }
 0x25e   : > { %v1140_v29 = vld [vmem:[#allocation1 + $0x1] ss:$2 sm:$0xff] }
 0x25f   : > { %v2870_v24 = vrot.slane %v1140_v29, 11  ;;  %1172 = vst.sshfl [vmem:[#allocation1] sm:$0xff pattern:$0x75316420] %v3481_v60 }
 0x260   : > { %v607_v37 = vpop.permute.xlu0 %606  ;;  %v855_v29 = vpop.permute.xlu2 %854 }
 0x261   : > { %1143 = vrot.lane.b32.xlu1 %v2870_v24, %s3075_s18  ;;  %609 = vst.msk [vmem:[#allocation2 + $0x14] sm:$0x1] %vm451_vm6, %v607_v37  ;;  %v784_v24 = vrot.slane %v783_v18, 4 }
 0x262   : > { %620 = vst.msk [vmem:[#allocation2 + $0x14] sm:$0x11] %vm3470_vm7, %v618_v44  ;;  %v774_v5 = vpop.permute.xlu1 %773 }
 0x263   : > { %629 = vst.msk [vmem:[#allocation2 + $0x18] sm:$0x1] %vm470_vm8, %v627_v47 }
 0x264   : > { %634 = vst.msk [vmem:[#allocation2 + $0x18] sm:$0x1] %vm444_vm2, %v3523_v53 }
 0x265   : > { %640 = vst.msk [vmem:[#allocation2 + $0x18] sm:$0x1] %vm451_vm6, %v3564_v62 }
 0x266   : > { %648 = vst.msk [vmem:[#allocation2 + $0x18] sm:$0x11] %vm3470_vm7, %v646_v10  ;;  %v1174_v39 = vld [vmem:[#allocation1 + $0x1] ss:$2 sm:$0xff] }
 0x267   : > { %654 = vst.msk [vmem:[#allocation2 + $0x1c] sm:$0x1] %vm470_vm8, %v3577_v27  ;;  %1175 = vrot.lane.b32.xlu0 %v1174_v39, %s3072_s14 }
 0x268   : > { %661 = vst.msk [vmem:[#allocation2 + $0x1c] sm:$0x1] %vm444_vm2, %v659_v13  ;;  %v677_v47 = vpop.permute.xlu0 %676  ;;  %v896_v27 = vpop.permute.xlu2 %895  ;;  %v785_v13 = vsel %vm458_vm5, %v784_v24, %v783_v18 }
 0x269   : > { %1179 = vst.sshfl [vmem:[#allocation1] sm:$0xff pattern:$0x75316420] %v3481_v60  ;;  %v678_v53 = vrot.slane %v677_v47, 4 }
 0x26a   : > { %670 = vst.msk [vmem:[#allocation2 + $0x1c] sm:$0x1] %vm451_vm6, %v668_v4  ;;  %v844_v4 = vpop.permute.xlu1 %843 }
 0x26b   : > { %v679_v62 = vsel %vm458_vm5, %v678_v53, %v677_v47 }
 0x26c   : > { %681 = vst.msk [vmem:[#allocation2 + $0x1c] sm:$0x11] %vm3470_vm7, %v679_v62 }
 0x26d   : > { %690 = vst.msk [vmem:[#allocation2 + $0x20] sm:$0x1] %vm470_vm8, %v688_v8  ;;  %v812_v8 = vrot.slane %v3593_v6, 4 }
 0x26f   : > { %v813_v18 = vsel %vm458_vm5, %v812_v8, %v3593_v6 }
 0x270   : > { %v1181_v31 = vld [vmem:[#allocation1 + $0x1] ss:$2 sm:$0xff]  ;;  %v765_v38 = vpop.permute.xlu0 %764 }
 0x271   : > { %v2874_v36 = vrot.slane %v1181_v31, 9  ;;  %1188 = vst.sshfl [vmem:[#allocation1] sm:$0xff pattern:$0x75316420] %v3481_v60 }
 0x272   : > { %767 = vst.msk [vmem:[#allocation2 + $0x5] sm:$0x1] %vm444_vm2, %v765_v38  ;;  %v966_v22 = vpop.permute.xlu2 %965  ;;  %v887_v39 = vpop.permute.xlu1 %886 }
 0x273   : > { %1184 = vrot.lane.b32.xlu1 %v2874_v36, %s3074_s17  ;;  %776 = vst.msk [vmem:[#allocation2 + $0x5] sm:$0x1] %vm451_vm6, %v774_v5 }
 0x274   : > { %787 = vst.msk [vmem:[#allocation2 + $0x5] sm:$0x11] %vm3470_vm7, %v785_v13 }
 0x278   : > { %v1190_v37 = vld [vmem:[#allocation1 + $0x1] ss:$2 sm:$0xff]  ;;  %v794_v44 = vpop.permute.xlu0 %793 }
 0x279   : > { %v2875_v10 = vrot.slane %v1190_v37, 10  ;;  %1199 = vst.sshfl [vmem:[#allocation1] sm:$0xff pattern:$0x75316420] %v3481_v60  ;;  %v845_v60 = vrot.slane %v844_v4, 4 }
 0x27a   : > { %796 = vst.msk [vmem:[#allocation2 + $0x9] sm:$0x1] %vm470_vm8, %v794_v44  ;;  %v916_v31 = vpop.permute.xlu1 %915 }
 0x27b   : > { %1193 = vrot.lane.b32.xlu2 %v2875_v10, %s3073_s15  ;;  %801 = vst.msk [vmem:[#allocation2 + $0x9] sm:$0x1] %vm444_vm2, %v3582_v46  ;;  %v846_v6 = vsel %vm458_vm5, %v845_v60, %v844_v4  ;;  %v1101_v10 = vrot.slane %v3658_v15, 4 }
 0x27c   : > { %807 = vst.msk [vmem:[#allocation2 + $0x9] sm:$0x1] %vm451_vm6, %v3561_v49  ;;  %v873_v49 = vrot.slane %v3579_v20, 4 }
 0x27d   : > { %815 = vst.msk [vmem:[#allocation2 + $0x9] sm:$0x11] %vm3470_vm7, %v813_v18  ;;  %v1102_v60 = vsel %vm458_vm5, %v1101_v10, %v3658_v15 }
 0x27e   : > { %821 = vst.msk [vmem:[#allocation2 + $0xd] sm:$0x1] %vm470_vm8, %v3597_v32  ;;  %v874_v32 = vsel %vm458_vm5, %v873_v49, %v3579_v20 }
 0x27f   : > { %828 = vst.msk [vmem:[#allocation2 + $0xd] sm:$0x1] %vm444_vm2, %v826_v21 }
 0x280   : > { %v1054_v47 = vpop.permute.xlu2 %1053  ;;  %v1201_v53 = vld [vmem:[#allocation1 + $0x1] ss:$2 sm:$0xff]  ;;  %v835_v5 = vpop.permute.xlu0 %834 }
 0x281   : > { %1056 = vst.msk [vmem:[#allocation2 + $0x6] sm:$0x1] %vm444_vm2, %v1054_v47  ;;  %v2876_v46 = vrot.slane %v1201_v53, 11 }
 0x282   : > { %1233 = vst.sshfl [vmem:[#allocation1] sm:$0xff pattern:$0x75316420] %v3537_v48  ;;  %v957_v36 = vpop.permute.xlu1 %956 }
 0x283   : > { %1204 = vrot.lane.b32.xlu0 %v2876_v46, %s3075_s18  ;;  %837 = vst.msk [vmem:[#allocation2 + $0xd] sm:$0x1] %vm451_vm6, %v835_v5 }
 0x284   : > { %848 = vst.msk [vmem:[#allocation2 + $0xd] sm:$0x11] %vm3470_vm7, %v846_v6 }
 0x285   : > { %857 = vst.msk [vmem:[#allocation2 + $0x11] sm:$0x1] %vm470_vm8, %v855_v29  ;;  %v967_v29 = vrot.slane %v966_v22, 4 }
 0x286   : > { %862 = vst.msk [vmem:[#allocation2 + $0x11] sm:$0x1] %vm444_vm2, %v3607_v34  ;;  %v934_v34 = vrot.slane %v3682_v61, 4 }
 0x287   : > { %868 = vst.msk [vmem:[#allocation2 + $0x11] sm:$0x1] %vm451_vm6, %v3661_v30 }
 0x288   : > { %876 = vst.msk [vmem:[#allocation2 + $0x11] sm:$0x11] %vm3470_vm7, %v874_v32  ;;  %v905_v21 = vpop.permute.xlu0 %904 }
 0x289   : > { %882 = vst.msk [vmem:[#allocation2 + $0x15] sm:$0x1] %vm470_vm8, %v3656_v50  ;;  %v1235_v62 = vld [vmem:[#allocation1 + $0x1] ss:$2 sm:$0xff]  ;;  %v906_v24 = vrot.slane %v905_v21, 4  ;;  %v935_v50 = vsel %vm458_vm5, %v934_v34, %v3682_v61 }
 0x28a   : > { %1236 = vrot.lane.b32.xlu2 %v1235_v62, %s3072_s14  ;;  %889 = vst.msk [vmem:[#allocation2 + $0x15] sm:$0x1] %vm444_vm2, %v887_v39 }
 0x28b   : > { %1240 = vst.sshfl [vmem:[#allocation1] sm:$0xff pattern:$0x75316420] %v3537_v48  ;;  %v907_v20 = vsel %vm458_vm5, %v906_v24, %v905_v21 }
 0x28c   : > { %898 = vst.msk [vmem:[#allocation2 + $0x15] sm:$0x1] %vm451_vm6, %v896_v27 }
 0x28d   : > { %909 = vst.msk [vmem:[#allocation2 + $0x15] sm:$0x11] %vm3470_vm7, %v907_v20 }
 0x28e   : > { %918 = vst.msk [vmem:[#allocation2 + $0x19] sm:$0x1] %vm470_vm8, %v916_v31 }
 0x28f   : > { %923 = vst.msk [vmem:[#allocation2 + $0x19] sm:$0x1] %vm444_vm2, %v3609_v41  ;;  %v968_v41 = vsel %vm458_vm5, %v967_v29, %v966_v22 }
 0x290   : > { %929 = vst.msk [vmem:[#allocation2 + $0x19] sm:$0x1] %vm451_vm6, %v3689_v55  ;;  %v948_v30 = vpop.permute.xlu0 %947 }
 0x291   : > { %937 = vst.msk [vmem:[#allocation2 + $0x19] sm:$0x11] %vm3470_vm7, %v935_v50 }
 0x292   : > { %v1242_v27 = vld [vmem:[#allocation1 + $0x1] ss:$2 sm:$0xff]  ;;  %943 = vst.msk [vmem:[#allocation2 + $0x1d] sm:$0x1] %vm470_vm8, %v3641_v25 }
 0x293   : > { %v2880_v38 = vrot.slane %v1242_v27, 9  ;;  %1249 = vst.sshfl [vmem:[#allocation1] sm:$0xff pattern:$0x75316420] %v3537_v48 }
 0x294   : > { %950 = vst.msk [vmem:[#allocation2 + $0x1d] sm:$0x1] %vm444_vm2, %v948_v30 }
 0x295   : > { %1245 = vrot.lane.b32.xlu1 %v2880_v38, %s3074_s17  ;;  %959 = vst.msk [vmem:[#allocation2 + $0x1d] sm:$0x1] %vm451_vm6, %v957_v36  ;;  %v1223_v38 = vrot.slane %v3763_v26, 4 }
 0x296   : > { %970 = vst.msk [vmem:[#allocation2 + $0x1d] sm:$0x11] %vm3470_vm7, %v968_v41 }
 0x298   : > { %v977_v61 = vpop.permute.xlu0 %976 }
 0x299   : > { %979 = vst.msk [vmem:[#allocation2 + $0x21] sm:$0x1] %vm470_vm8, %v977_v61  ;;  %v1224_v61 = vsel %vm458_vm5, %v1223_v38, %v3763_v26 }
 0x29a   : > { %v1251_v55 = vld [vmem:[#allocation1 + $0x1] ss:$2 sm:$0xff]  ;;  %v1083_v18 = vpop.permute.xlu2 %1082 }
 0x29b   : > { %v2881_v25 = vrot.slane %v1251_v55, 10  ;;  %1260 = vst.sshfl [vmem:[#allocation1] sm:$0xff pattern:$0x75316420] %v3537_v48 }
 0x29d   : > { %1254 = vrot.lane.b32.xlu2 %v2881_v25, %s3073_s15 }
 0x2a2   : > { %v1262_v13 = vld [vmem:[#allocation1 + $0x1] ss:$2 sm:$0xff]  ;;  %v1063_v4 = vpop.permute.xlu0 %1062 }
 0x2a3   : > { %v2882_v8 = vrot.slane %v1262_v13, 11  ;;  %1339 = vst.sshfl [vmem:[#allocation1] sm:$0xff pattern:$0x75316420] %v3461_v54 }
 0x2a4   : > { %1065 = vst.msk [vmem:[#allocation2 + $0x6] sm:$0x1] %vm451_vm6, %v1063_v4 }
 0x2a5   : > { %1265 = vrot.lane.b32.xlu0 %v2882_v8, %s3075_s18 }
 0x2aa   : > { %v1341_v22 = vld [vmem:[#allocation1 + $0x1] ss:$2 sm:$0xff]  ;;  %v1072_v37 = vpop.permute.xlu1 %1071 }
 0x2ab   : > { %1346 = vst.sshfl [vmem:[#allocation1] sm:$0xff pattern:$0x75316420] %v3461_v54  ;;  %v1073_v44 = vrot.slane %v1072_v37, 4 }
 0x2ad   : > { %1342 = vrot.lane.b32.xlu0 %v1341_v22, %s3072_s14  ;;  %v1074_v48 = vsel %vm458_vm5, %v1073_v44, %v1072_v37 }
 0x2ae   : > { %1076 = vst.msk [vmem:[#allocation2 + $0x6] sm:$0x11] %vm3470_vm7, %v1074_v48 }
 0x2af   : > { %1085 = vst.msk [vmem:[#allocation2 + $0xa] sm:$0x1] %vm470_vm8, %v1083_v18 }
 0x2b0   : > { %1090 = vst.msk [vmem:[#allocation2 + $0xa] sm:$0x1] %vm444_vm2, %v3677_v16  ;;  %v1124_v16 = vpop.permute.xlu2 %1123 }
 0x2b1   : > { %1096 = vst.msk [vmem:[#allocation2 + $0xa] sm:$0x1] %vm451_vm6, %v3697_v11 }
 0x2b2   : > { %1104 = vst.msk [vmem:[#allocation2 + $0xa] sm:$0x11] %vm3470_vm7, %v1102_v60  ;;  %v1348_v39 = vld [vmem:[#allocation1 + $0x1] ss:$2 sm:$0xff] }
 0x2b3   : > { %v2890_v47 = vrot.slane %v1348_v39, 9  ;;  %1110 = vst.msk [vmem:[#allocation2 + $0xe] sm:$0x1] %vm470_vm8, %v3705_v43 }
 0x2b4   : > { %1355 = vst.sshfl [vmem:[#allocation1] sm:$0xff pattern:$0x75316420] %v3461_v54 }
 0x2b5   : > { %1351 = vrot.lane.b32.xlu1 %v2890_v47, %s3074_s17 }
 0x2b8   : > { %v1115_v53 = vpop.permute.xlu1 %1114 }
 0x2b9   : > { %1117 = vst.msk [vmem:[#allocation2 + $0xe] sm:$0x1] %vm444_vm2, %v1115_v53 }
 0x2ba   : > { %1126 = vst.msk [vmem:[#allocation2 + $0xe] sm:$0x1] %vm451_vm6, %v1124_v16 }
 0x2bb   : > { %v1357_v15 = vld [vmem:[#allocation1 + $0x1] ss:$2 sm:$0xff] }
 0x2bc   : > { %v2891_v11 = vrot.slane %v1357_v15, 10  ;;  %1366 = vst.sshfl [vmem:[#allocation1] sm:$0xff pattern:$0x75316420] %v3461_v54  ;;  %v1162_v54 = vrot.slane %v3737_v14, 4 }
 0x2be   : > { %1360 = vrot.lane.b32.xlu2 %v2891_v11, %s3073_s15  ;;  %v1163_v31 = vsel %vm458_vm5, %v1162_v54, %v3737_v14 }
 0x2c3   : > { %v1368_v5 = vld [vmem:[#allocation1 + $0x1] ss:$2 sm:$0xff] }
 0x2c4   : > { %v2892_v46 = vrot.slane %v1368_v5, 11  ;;  %1400 = vst.sshfl [vmem:[#allocation1] sm:$0xff pattern:$0x75316420] %v3507_v12 }
 0x2c6   : > { %1371 = vrot.lane.b32.xlu2 %v2892_v46, %s3075_s18 }
 0x2cb   : > { %v1402_v43 = vld [vmem:[#allocation1 + $0x1] ss:$2 sm:$0xff]  ;;  %v1133_v49 = vpop.permute.xlu0 %1132 }
 0x2cc   : > { %1407 = vst.sshfl [vmem:[#allocation1] sm:$0xff pattern:$0x75316420] %v3507_v12  ;;  %v1134_v6 = vrot.slane %v1133_v49, 4 }
 0x2ce   : > { %1403 = vrot.lane.b32.xlu2 %v1402_v43, %s3072_s14  ;;  %v1135_v32 = vsel %vm458_vm5, %v1134_v6, %v1133_v49  ;;  %v3987_v6 = vld [vmem:[%s4577_s6] ss:$2 sm:$0xff] }
 0x2cf   : > { %1137 = vst.msk [vmem:[#allocation2 + $0xe] sm:$0x11] %vm3470_vm7, %v1135_v32 }
 0x2d3   : > { %v1409_v21 = vld [vmem:[#allocation1 + $0x1] ss:$2 sm:$0xff]  ;;  %v1144_v62 = vpop.permute.xlu1 %1143 }
 0x2d4   : > { %v2896_v24 = vrot.slane %v1409_v21, 9  ;;  %1416 = vst.sshfl [vmem:[#allocation1] sm:$0xff pattern:$0x75316420] %v3507_v12 }
 0x2d5   : > { %1146 = vst.msk [vmem:[#allocation2 + $0x12] sm:$0x1] %vm470_vm8, %v1144_v62 }
 0x2d6   : > { %1412 = vrot.lane.b32.xlu0 %v2896_v24, %s3074_s17  ;;  %1151 = vst.msk [vmem:[#allocation2 + $0x12] sm:$0x1] %vm444_vm2, %v3679_v28  ;;  %v1194_v28 = vpop.permute.xlu2 %1193  ;;  %v1390_v24 = vrot.slane %v3733_v33, 4 }
 0x2d7   : > { %1157 = vst.msk [vmem:[#allocation2 + $0x12] sm:$0x1] %vm451_vm6, %v3725_v51  ;;  %v1195_v14 = vrot.slane %v1194_v28, 4 }
 0x2d8   : > { %1165 = vst.msk [vmem:[#allocation2 + $0x12] sm:$0x11] %vm3470_vm7, %v1163_v31 }
 0x2d9   : > { %1171 = vst.msk [vmem:[#allocation2 + $0x16] sm:$0x1] %vm470_vm8, %v3691_v0  ;;  %v1176_v20 = vpop.permute.xlu0 %1175  ;;  %v1196_v27 = vsel %vm458_vm5, %v1195_v14, %v1194_v28 }
 0x2da   : > { %1178 = vst.msk [vmem:[#allocation2 + $0x16] sm:$0x1] %vm444_vm2, %v1176_v20  ;;  %v1564_v20 = vperm.slane %v3987_v6, 0 }
 0x2db   : > { %v1418_v34 = vld [vmem:[#allocation1 + $0x1] ss:$2 sm:$0xff] }
 0x2dc   : > { %v2897_v50 = vrot.slane %v1418_v34, 10  ;;  %1427 = vst.sshfl [vmem:[#allocation1] sm:$0xff pattern:$0x75316420] %v3507_v12 }
 0x2de   : > { %1421 = vrot.lane.b32.xlu1 %v2897_v50, %s3073_s15  ;;  %v1391_v50 = vsel %vm458_vm5, %v1390_v24, %v3733_v33 }
 0x2e3   : > { %v1429_v30 = vld [vmem:[#allocation1 + $0x1] ss:$2 sm:$0xff] }
 0x2e4   : > { %v2898_v29 = vrot.slane %v1429_v30, 11  ;;  %1461 = vst.sshfl [vmem:[#allocation1] sm:$0xff pattern:$0x75316420] %v3559_v45  ;;  %v1237_v55 = vpop.permute.xlu2 %1236 }
 0x2e5   : > { %v1185_v51 = vpop.permute.xlu1 %1184 }
 0x2e6   : > { %1432 = vrot.lane.b32.xlu1 %v2898_v29, %s3075_s18  ;;  %1187 = vst.msk [vmem:[#allocation2 + $0x16] sm:$0x1] %vm451_vm6, %v1185_v51 }
 0x2e7   : > { %1198 = vst.msk [vmem:[#allocation2 + $0x16] sm:$0x11] %vm3470_vm7, %v1196_v27 }
 0x2eb   : > { %v1463_v0 = vld [vmem:[#allocation1 + $0x1] ss:$2 sm:$0xff] }
 0x2ec   : > { %1468 = vst.sshfl [vmem:[#allocation1] sm:$0xff pattern:$0x75316420] %v3559_v45 }
 0x2ee   : > { %1464 = vrot.lane.b32.xlu1 %v1463_v0, %s3072_s14  ;;  %v1567_v0 = vperm.slane %v3987_v6, 3 }
 0x2f3   : > { %v1470_v12 = vld [vmem:[#allocation1 + $0x1] ss:$2 sm:$0xff] }
 0x2f4   : > { %v2902_v36 = vrot.slane %v1470_v12, 9  ;;  %1477 = vst.sshfl [vmem:[#allocation1] sm:$0xff pattern:$0x75316420] %v3559_v45 }
 0x2f5   : > { %v1205_v41 = vpop.permute.xlu0 %1204 }
 0x2f6   : > { %1473 = vrot.lane.b32.xlu2 %v2902_v36, %s3074_s17  ;;  %1207 = vst.msk [vmem:[#allocation2 + $0x1a] sm:$0x1] %vm470_vm8, %v1205_v41  ;;  %v1566_v36 = vperm.slane %v3987_v6, 2  ;;  %v1573_v41 = vrot.slane %v1567_v0, 4 }
 0x2f7   : > { %1212 = vst.msk [vmem:[#allocation2 + $0x1a] sm:$0x1] %vm444_vm2, %v3749_v19  ;;  %v1255_v19 = vpop.permute.xlu2 %1254 }
 0x2f8   : > { %1218 = vst.msk [vmem:[#allocation2 + $0x1a] sm:$0x1] %vm451_vm6, %v3727_v42  ;;  %v1256_v4 = vrot.slane %v1255_v19, 4 }
 0x2f9   : > { %1226 = vst.msk [vmem:[#allocation2 + $0x1a] sm:$0x11] %vm3470_vm7, %v1224_v61  ;;  %v1451_v61 = vrot.slane %v3735_v7, 4 }
 0x2fa   : > { %1232 = vst.msk [vmem:[#allocation2 + $0x1e] sm:$0x1] %vm470_vm8, %v3752_v52  ;;  %v1257_v22 = vsel %vm458_vm5, %v1256_v4, %v1255_v19 }
 0x2fb   : > { %v1479_v25 = vld [vmem:[#allocation1 + $0x1] ss:$2 sm:$0xff]  ;;  %1239 = vst.msk [vmem:[#allocation2 + $0x1e] sm:$0x1] %vm444_vm2, %v1237_v55 }
 0x2fc   : > { %v2903_v13 = vrot.slane %v1479_v25, 10  ;;  %1488 = vst.sshfl [vmem:[#allocation1] sm:$0xff pattern:$0x75316420] %v3559_v45  ;;  %v2986_v45 = vld [vmem:[%s4577_s6 + $0x1] ss:$2 sm:$0xff]  ;;  %v1578_v25 = vsel %vm1576_vm1, %v1566_v36, %v1573_v41 }
 0x2fd   : > { %v2324_v52 = vperm.slane %v2986_v45, 7  ;;  %v2323_v44 = vperm.slane %v2986_v45, 6  ;;  %v2322_v60 = vperm.slane %v2986_v45, 5  ;;  %v2321_v53 = vperm.slane %v2986_v45, 4  ;;  %v4628_v36 = vld [vmem:[#allocation21_spill] sm:$0xff] }
 0x2fe   : > { %1482 = vrot.lane.b32.xlu0 %v2903_v13, %s3073_s15  ;;  %v1452_v13 = vsel %vm458_vm5, %v1451_v61, %v3735_v7  ;;  %v1727_v7 = vrot.slane %v3326_v56, 4  ;;  %v1846_v45 = vrot.slane %v3381_v17, 4  ;;  %v2154_v41 = vrot.slane %v4628_v36, 4 }
 0x2ff   : > { %v2328_v10 = vrot.slane %v2324_v52, 4  ;;  %v2327_v16 = vrot.slane %v2322_v60, 4 }
 0x301   : > { %v2332_v48 = vsel %vm1576_vm1, %v2323_v44, %v2328_v10  ;;  %v2331_v5 = vsel %vm1576_vm1, %v2321_v53, %v2327_v16  ;;  %v4620_v10 = vrot.slane %v3350_v3, 4 }
 0x303   : > { %v1490_v26 = vld [vmem:[#allocation1 + $0x1] ss:$2 sm:$0xff] }
 0x304   : > { %v2904_v8 = vrot.slane %v1490_v26, 11  ;;  %1522 = vst.sshfl [vmem:[#allocation1] sm:$0xff pattern:$0x75316420] %v3588_v40 }
 0x306   : > { %1493 = vrot.lane.b32.xlu1 %v2904_v8, %s3075_s18 }
 0x307   : > { %v1246_v42 = vpop.permute.xlu1 %1245 }
 0x308   : > { %1248 = vst.msk [vmem:[#allocation2 + $0x1e] sm:$0x1] %vm451_vm6, %v1246_v42 }
 0x309   : > { %1259 = vst.msk [vmem:[#allocation2 + $0x1e] sm:$0x11] %vm3470_vm7, %v1257_v22 }
 0x30b   : > { %v1524_v37 = vld [vmem:[#allocation1 + $0x1] ss:$2 sm:$0xff] }
 0x30c   : > { %1525 = vrot.lane.b32.xlu0 %v1524_v37, %s3072_s14  ;;  %1529 = vst.sshfl [vmem:[#allocation1] sm:$0xff pattern:$0x75316420] %v3588_v40 }
 0x313   : > { %v1531_v18 = vld [vmem:[#allocation1 + $0x1] ss:$2 sm:$0xff] }
 0x314   : > { %v2908_v39 = vrot.slane %v1531_v18, 9  ;;  %1538 = vst.sshfl [vmem:[#allocation1] sm:$0xff pattern:$0x75316420] %v3588_v40  ;;  %2339 = vrot.lane.b32.xlu0 %v2332_v48, %s3071_s13  ;;  %v1851_v48 = vsel %vm1576_vm1, %v4620_v10, %v1846_v45  ;;  %v1569_v18 = vperm.slane %v3987_v6, 5 }
 0x316   : > { %1534 = vrot.lane.b32.xlu2 %v2908_v39, %s3074_s17 }
 0x317   : > { %v1266_v47 = vpop.permute.xlu0 %1265 }
 0x318   : > { %1268 = vst.msk [vmem:[#allocation2 + $0x22] sm:$0x1] %vm470_vm8, %v1266_v47  ;;  %v1361_v15 = vpop.permute.xlu2 %1360  ;;  %v1852_v47 = vsel %vm1849_vm9, %v1851_v48, %v3381_v17 }
 0x319   : > { %v1362_v32 = vrot.slane %v1361_v15, 4 }
 0x31b   : > { %v1540_v11 = vld [vmem:[#allocation1 + $0x1] ss:$2 sm:$0xff]  ;;  %v1363_v31 = vsel %vm458_vm5, %v1362_v32, %v1361_v15  ;;  %v1568_v15 = vperm.slane %v3987_v6, 4 }
 0x31c   : > { %v2909_v46 = vrot.slane %v1540_v11, 10  ;;  %1549 = vst.sshfl [vmem:[#allocation1] sm:$0xff pattern:$0x75316420] %v3588_v40  ;;  %v1565_v40 = vperm.slane %v3987_v6, 1  ;;  %v1574_v11 = vrot.slane %v1569_v18, 4 }
 0x31e   : > { %1543 = vrot.lane.b32.xlu1 %v2909_v46, %s3073_s15  ;;  %2337 = vrot.lane.b32.xlu2 %v2331_v5, %s3071_s13  ;;  %v1572_v34 = vrot.slane %v1565_v40, 4  ;;  %v4621_v46 = vld [vmem:[#allocation26_spill] sm:$0xff]  ;;  %v1579_v32 = vsel %vm1576_vm1, %v1568_v15, %v1574_v11  ;;  %v4631_v15 = vld [vmem:[#allocation23_spill] sm:$0xff] }
 0x31f   : > { %v1343_v43 = vpop.permute.xlu0 %1342  ;;  %v2342_v11 = vrot.slane %v4631_v15, 4 }
 0x320   : > { %1345 = vst.msk [vmem:[#allocation2 + $0x7] sm:$0x1] %vm444_vm2, %v1343_v43  ;;  %v1372_v54 = vpop.permute.xlu2 %1371  ;;  %v1577_v28 = vsel %vm1576_vm1, %v1564_v20, %v1572_v34  ;;  %v1512_v43 = vrot.slane %v4621_v46, 4 }
 0x323   : > { %v1551_v49 = vld [vmem:[#allocation1 + $0x1] ss:$2 sm:$0xff] }
 0x324   : > { %v2910_v21 = vrot.slane %v1551_v49, 11 }
 0x326   : > { %1554 = vrot.lane.b32.xlu1 %v2910_v21, %s3075_s18  ;;  %v1513_v21 = vsel %vm458_vm5, %v1512_v43, %v4621_v46  ;;  %v4632_v46 = vld [vmem:[#allocation22_spill] sm:$0xff]  ;;  %s4558_s18 = scalar_lea.vmem %s4578_s7, %s2932_s16 }
 0x327   : > { %v1352_v62 = vpop.permute.xlu1 %1351  ;;  %v2341_v43 = vrot.slane %v4632_v46, 4 }
 0x328   : > { %1354 = vst.msk [vmem:[#allocation2 + $0x7] sm:$0x1] %vm451_vm6, %v1352_v62  ;;  %v1404_v14 = vpop.permute.xlu2 %1403  ;;  %v4623_v62 = vld [vmem:[#allocation28_spill] sm:$0xff] }
 0x329   : > { %1365 = vst.msk [vmem:[#allocation2 + $0x7] sm:$0x11] %vm3470_vm7, %v1363_v31 }
 0x32a   : > { %1374 = vst.msk [vmem:[#allocation2 + $0xb] sm:$0x1] %vm470_vm8, %v1372_v54  ;;  %v4622_v54 = vld [vmem:[#allocation27_spill] sm:$0xff] }
 0x32b   : > { %1379 = vst.msk [vmem:[#allocation2 + $0xb] sm:$0x1] %vm444_vm2, %v3746_v1 }
 0x32c   : > { %1385 = vst.msk [vmem:[#allocation2 + $0xb] sm:$0x1] %vm451_vm6, %v3716_v23 }
 0x32d   : > { %1393 = vst.msk [vmem:[#allocation2 + $0xb] sm:$0x11] %vm3470_vm7, %v1391_v50 }
 0x32e   : > { %1399 = vst.msk [vmem:[#allocation2 + $0xf] sm:$0x1] %vm470_vm8, %v3742_v35 }
 0x32f   : > { %1406 = vst.msk [vmem:[#allocation2 + $0xf] sm:$0x1] %vm444_vm2, %v1404_v14 }
 0x330   : > { %v4010_v30 = vld [vmem:[#allocation2] sm:$0xff] }
 0x331   : > { %v1585_v1 = vmul.f32 %v1577_v28, %v4010_v30  ;;  %v4624_v28 = vld [vmem:[#allocation18_spill] sm:$0xff] }
 0x332   : > { %v2035_v14 = vrot.slane %v4624_v28, 4 }
 0x333   : > { %1593 = vst [vmem:[#allocation1] ss:$2 sm:$0xff] %v1585_v1 }
 0x33a   : > { %v1600_v33 = vld.sshfl [vmem:[#allocation1] sm:$0xff pattern:$0x75316420]  ;;  %v1601_v29 = vld.sshfl [vmem:[#allocation1 + $0x8] sm:$0xff pattern:$0x75316420] }
 0x33b   : > { %1616 = vst [vmem:[#allocation3 + $0xb0] sm:$0xf] %v1600_v33 }
 0x33c   : > { %1617 = vst [vmem:[#allocation3 + $0xd0] sm:$0xf] %v1601_v29 }
 0x33d   : > { %1635 = vst [vmem:[#allocation1 + $0x1] ss:$2 sm:$0xff] %v4010_v30 }
 0x344   : > { %v1643_v23 = vld.sshfl [vmem:[#allocation1 + $0x8] sm:$0xff pattern:$0x75316420]  ;;  %v1642_v51 = vld.sshfl [vmem:[#allocation1] sm:$0xff pattern:$0x75316420] }
 0x345   : > { %1654 = vrot.lane.b32.xlu2 %v1643_v23, %s3077_s23  ;;  %1652 = vrot.lane.b32.xlu1 %v1642_v51, %s3077_s23  ;;  %v4627_v51 = vld [vmem:[#allocation12_spill] sm:$0xff] }
 0x348   : > { %v1413_v35 = vpop.permute.xlu0 %1412 }
 0x349   : > { %1415 = vst.msk [vmem:[#allocation2 + $0xf] sm:$0x1] %vm451_vm6, %v1413_v35  ;;  %v1729_v35 = vrot.slane %v4627_v51, 4 }
 0x350   : > { %v1422_v27 = vpop.permute.xlu1 %1421  ;;  %v1474_v8 = vpop.permute.xlu2 %1473 }
 0x351   : > { %v1423_v12 = vrot.slane %v1422_v27, 4 }
 0x353   : > { %v1424_v38 = vsel %vm458_vm5, %v1423_v12, %v1422_v27 }
 0x354   : > { %1426 = vst.msk [vmem:[#allocation2 + $0xf] sm:$0x11] %vm3470_vm7, %v1424_v38 }
 0x358   : > { %v1433_v55 = vpop.permute.xlu1 %1432 }
 0x359   : > { %1435 = vst.msk [vmem:[#allocation2 + $0x13] sm:$0x1] %vm470_vm8, %v1433_v55 }
 0x35a   : > { %1440 = vst.msk [vmem:[#allocation2 + $0x13] sm:$0x1] %vm444_vm2, %v3755_v63  ;;  %v1728_v63 = vrot.slane %v3364_v9, 4 }
 0x35b   : > { %v4029_v19 = vld [vmem:[#allocation2 + $0x8] sm:$0xff]  ;;  %1446 = vst.msk [vmem:[#allocation2 + $0x13] sm:$0x1] %vm451_vm6, %v3760_v57 }
 0x35c   : > { %v1586_v26 = vmul.f32 %v1578_v25, %v4029_v19  ;;  %1454 = vst.msk [vmem:[#allocation2 + $0x13] sm:$0x11] %vm3470_vm7, %v1452_v13  ;;  %v1863_v16 = vmul.f32 %v1852_v47, %v4029_v19  ;;  %v1735_v0 = vsel %vm1576_vm1, %v1728_v63, %v1729_v35  ;;  %v4629_v25 = vld [vmem:[#allocation17_spill] sm:$0xff] }
 0x35d   : > { %1460 = vst.msk [vmem:[#allocation2 + $0x17] sm:$0x1] %vm470_vm8, %v3744_v2  ;;  %v1733_v2 = vsel %vm1576_vm1, %v1727_v7, %v1728_v63  ;;  %v1736_v55 = vsel %vm1731_vm12, %v1735_v0, %v4627_v51  ;;  %v2153_v13 = vrot.slane %v4629_v25, 4  ;;  %v4630_v63 = vld [vmem:[#allocation14_spill] sm:$0xff] }
 0x35e   : > { %1595 = vst [vmem:[#allocation1 + $0x10] ss:$2 sm:$0xff] %v1586_v26  ;;  %v1734_v22 = vsel %vm1731_vm12, %v1733_v2, %v3364_v9 }
 0x35f   : > { %v1745_v52 = vmul.f32 %v1734_v22, %v4029_v19  ;;  %v2159_v26 = vsel %vm1576_vm1, %v2153_v13, %v2154_v41  ;;  %v1571_v22 = vperm.slane %v3987_v6, 7 }
 0x360   : > { %v1465_v4 = vpop.permute.xlu1 %1464  ;;  %v2160_v2 = vsel %vm2157_vm13, %v2159_v26, %v4628_v36 }
 0x361   : > { %1467 = vst.msk [vmem:[#allocation2 + $0x17] sm:$0x1] %vm444_vm2, %v1465_v4 }
 0x362   : > { %1476 = vst.msk [vmem:[#allocation2 + $0x17] sm:$0x1] %vm451_vm6, %v1474_v8 }
 0x365   : > { %v1602_v57 = vld.sshfl [vmem:[#allocation1 + $0x10] sm:$0xff pattern:$0x75316420]  ;;  %v1603_v42 = vld.sshfl [vmem:[#allocation1 + $0x18] sm:$0xff pattern:$0x75316420] }
 0x366   : > { %1637 = vst [vmem:[#allocation1 + $0x11] ss:$2 sm:$0xff] %v4029_v19 }
 0x367   : > { %1618 = vst [vmem:[#allocation3 + $0x10] sm:$0xf] %v1602_v57  ;;  %v1847_v57 = vrot.slane %v4630_v63, 4 }
 0x368   : > { %1619 = vst [vmem:[#allocation3 + $0x48] sm:$0xf] %v1603_v42 }
 0x369   : > { %v1853_v42 = vsel %vm1576_vm1, %v1846_v45, %v1847_v57 }
 0x36a   : > { %v1854_v18 = vsel %vm1849_vm9, %v1853_v42, %v4630_v63 }
 0x36d   : > { %v1644_v37 = vld.sshfl [vmem:[#allocation1 + $0x10] sm:$0xff pattern:$0x75316420]  ;;  %v1645_v44 = vld.sshfl [vmem:[#allocation1 + $0x18] sm:$0xff pattern:$0x75316420] }
 0x36e   : > { %1656 = vrot.lane.b32.xlu0 %v1644_v37, %s3077_s23  ;;  %1756 = vst [vmem:[#allocation1 + $0x10] ss:$2 sm:$0xff] %v1745_v52  ;;  %v2171_v37 = vmul.f32 %v2160_v2, %v4029_v19 }
 0x370   : > { %v1483_v60 = vpop.permute.xlu0 %1482  ;;  %v1535_v50 = vpop.permute.xlu2 %1534 }
 0x371   : > { %v1484_v39 = vrot.slane %v1483_v60, 4 }
 0x373   : > { %v1485_v53 = vsel %vm458_vm5, %v1484_v39, %v1483_v60  ;;  %v1570_v60 = vperm.slane %v3987_v6, 6  ;;  %v1575_v39 = vrot.slane %v1571_v22, 4 }
 0x374   : > { %1487 = vst.msk [vmem:[#allocation2 + $0x17] sm:$0x11] %vm3470_vm7, %v1485_v53 }
 0x375   : > { %v1764_v3 = vld.sshfl [vmem:[#allocation1 + $0x18] sm:$0xff pattern:$0x75316420]  ;;  %v1763_v5 = vld.sshfl [vmem:[#allocation1 + $0x10] sm:$0xff pattern:$0x75316420] }
 0x376   : > { %1658 = vrot.lane.b32.xlu0 %v1645_v44, %s3077_s23  ;;  %1777 = vrot.lane.b32.xlu2 %v1764_v3, %s3078_s25  ;;  %1875 = vst [vmem:[#allocation1 + $0x11] ss:$2 sm:$0xff] %v1863_v16  ;;  %v1580_v3 = vsel %vm1576_vm1, %v1570_v60, %v1575_v39 }
 0x378   : > { %v1494_v49 = vpop.permute.xlu1 %1493 }
 0x379   : > { %1496 = vst.msk [vmem:[#allocation2 + $0x1b] sm:$0x1] %vm470_vm8, %v1494_v49 }
 0x37a   : > { %1501 = vst.msk [vmem:[#allocation2 + $0x1b] sm:$0x1] %vm444_vm2, %v4622_v54 }
 0x37b   : > { %v4075_v40 = vld [vmem:[#allocation2 + $0x10] sm:$0xff]  ;;  %1507 = vst.msk [vmem:[#allocation2 + $0x1b] sm:$0x1] %vm451_vm6, %v4623_v62  ;;  %v4633_v62 = vld [vmem:[#allocation20_spill] sm:$0xff] }
 0x37c   : > { %v1587_v24 = vmul.f32 %v1579_v32, %v4075_v40  ;;  %1515 = vst.msk [vmem:[#allocation2 + $0x1b] sm:$0x11] %vm3470_vm7, %v1513_v21  ;;  %v1746_v9 = vmul.f32 %v1736_v55, %v4075_v40  ;;  %v1864_v45 = vmul.f32 %v1854_v18, %v4075_v40  ;;  %v2347_v21 = vsel %vm1576_vm1, %v2341_v43, %v2342_v11 }
 0x37d   : > { %1521 = vst.msk [vmem:[#allocation2 + $0x1f] sm:$0x1] %vm470_vm8, %v3789_v58  ;;  %v1883_v31 = vld.sshfl [vmem:[#allocation1 + $0x18] sm:$0xff pattern:$0x75316420] }
 0x37e   : > { %1597 = vst [vmem:[#allocation1 + $0x20] ss:$2 sm:$0xff] %v1587_v24  ;;  %v1526_v20 = vpop.permute.xlu0 %1525  ;;  %1775 = vrot.lane.b32.xlu0 %v1763_v5, %s3078_s25  ;;  %1896 = vrot.lane.b32.xlu1 %v1883_v31, %s3079_s26  ;;  %v1882_v34 = vld.sshfl [vmem:[#allocation1 + $0x10] sm:$0xff pattern:$0x75316420]  ;;  %v2036_v24 = vrot.slane %v4633_v62, 4 }
 0x37f   : > { %1528 = vst.msk [vmem:[#allocation2 + $0x1f] sm:$0x1] %vm444_vm2, %v1526_v20  ;;  %v4625_v58 = vld [vmem:[#allocation13_spill] sm:$0xff]  ;;  %v2348_v20 = vsel %vm2345_vm14, %v2347_v21, %v4631_v15  ;;  %vm1908_vm2 = vcmask 785408  }
 0x380   : > { %1537 = vst.msk [vmem:[#allocation2 + $0x1f] sm:$0x1] %vm451_vm6, %v1535_v50  ;;  %v4626_v1 = vrot.slane %v4625_v58, 4  ;;  %v2042_v50 = vsel %vm1576_vm1, %v2035_v14, %v2036_v24  ;;  %vm2403_vm6 = vcmask 506880  }
 0x381   : > { %1945 = vst [vmem:[#allocation1 + $0x10] ss:$2 sm:$0xff] %v4029_v19 }
 0x382   : > { %v2040_v33 = vsel %vm1576_vm1, %v4626_v1, %v2035_v14  ;;  %v1732_v14 = vsel %vm1731_vm12, %v1727_v7, %v3326_v56 }
 0x383   : > { %v2041_v27 = vsel %vm2038_vm10, %v2040_v33, %v4624_v28  ;;  %v4634_v33 = vld [vmem:[#allocation11_spill] sm:$0xff] }
 0x384   : > { %v2052_v12 = vmul.f32 %v2041_v27, %v4029_v19 }
 0x385   : > { %v1604_v29 = vld.sshfl [vmem:[#allocation1 + $0x20] sm:$0xff pattern:$0x75316420]  ;;  %v1605_v23 = vld.sshfl [vmem:[#allocation1 + $0x28] sm:$0xff pattern:$0x75316420] }
 0x386   : > { %1639 = vst [vmem:[#allocation1 + $0x21] ss:$2 sm:$0xff] %v4075_v40  ;;  %1894 = vrot.lane.b32.xlu0 %v1882_v34, %s3079_s26  ;;  %v2359_v34 = vmul.f32 %v2348_v20, %v4029_v19 }
 0x387   : > { %1620 = vst [vmem:[#allocation3 + $0x120] sm:$0xf] %v1604_v29  ;;  %v1730_v29 = vrot.slane %v4634_v33, 4 }
 0x388   : > { %1621 = vst [vmem:[#allocation3 + $0x38] sm:$0xf] %v1605_v23  ;;  %v1953_v38 = vld.sshfl [vmem:[#allocation1 + $0x18] sm:$0xff pattern:$0x75316420] }
 0x389   : > { %1966 = vrot.lane.b32.xlu1 %v1953_v38, %s3080_s27  ;;  %v1952_v61 = vld.sshfl [vmem:[#allocation1 + $0x10] sm:$0xff pattern:$0x75316420]  ;;  %v1737_v38 = vsel %vm1576_vm1, %v1729_v35, %v1730_v29  ;;  %v4636_v35 = vld [vmem:[#allocation10_spill] sm:$0xff] }
 0x38a   : > { %2064 = vst [vmem:[#allocation1 + $0x11] ss:$2 sm:$0xff] %v2052_v12  ;;  %v1738_v56 = vsel %vm1731_vm12, %v1737_v38, %v4634_v33 }
 0x38d   : > { %v1646_v4 = vld.sshfl [vmem:[#allocation1 + $0x20] sm:$0xff pattern:$0x75316420]  ;;  %v1647_v8 = vld.sshfl [vmem:[#allocation1 + $0x28] sm:$0xff pattern:$0x75316420] }
 0x38e   : > { %1964 = vrot.lane.b32.xlu0 %v1952_v61, %s3080_s27  ;;  %1758 = vst [vmem:[#allocation1 + $0x20] ss:$2 sm:$0xff] %v1746_v9  ;;  %v4635_v61 = vld [vmem:[#allocation19_spill] sm:$0xff]  ;;  %v1744_v9 = vmul.f32 %v1732_v14, %v4010_v30  ;;  %v4639_v14 = vld [vmem:[#allocation16_spill] sm:$0xff] }
 0x38f   : > { %v2155_v55 = vrot.slane %v4635_v61, 4 }
 0x390   : > { %v1544_v52 = vpop.permute.xlu1 %1543 }
 0x391   : > { %1660 = vrot.lane.b32.xlu1 %v1646_v4, %s3077_s23  ;;  %v1545_v44 = vrot.slane %v1544_v52, 4  ;;  %v2071_v10 = vld.sshfl [vmem:[#allocation1 + $0x10] sm:$0xff pattern:$0x75316420]  ;;  %v2161_v7 = vsel %vm1576_vm1, %v2154_v41, %v2155_v55  ;;  %v1848_v4 = vrot.slane %v4636_v35, 4 }
 0x392   : > { %v2072_v48 = vld.sshfl [vmem:[#allocation1 + $0x18] sm:$0xff pattern:$0x75316420]  ;;  %v2162_v22 = vsel %vm2157_vm13, %v2161_v7, %v4635_v61  ;;  %v4283_v61 = vpop.permute.xlu0 %2339 }
 0x393   : > { %v1546_v17 = vsel %vm458_vm5, %v1545_v44, %v1544_v52  ;;  %2182 = vst [vmem:[#allocation1 + $0x10] ss:$2 sm:$0xff] %v2171_v37  ;;  %v2172_v41 = vmul.f32 %v2162_v22, %v4075_v40  ;;  %v4207_v52 = vpop.permute.xlu2 %2337  ;;  %v1855_v37 = vsel %vm1576_vm1, %v1847_v57, %v1848_v4  ;;  %vm2285_vm5 = vcmask 515072  }
 0x394   : > { %1548 = vst.msk [vmem:[#allocation2 + $0x1f] sm:$0x11] %vm3470_vm7, %v1546_v17  ;;  %v2343_v39 = vrot.slane %v4207_v52, 4  ;;  %vm2469_vm7 = vcmask 293888  }
 0x395   : > { %v4136_v47 = vld.sshfl [vmem:[#allocation1 + $0x20] sm:$0xff pattern:$0x75316420]  ;;  %v4138_v53 = vld.sshfl [vmem:[#allocation1 + $0x28] sm:$0xff pattern:$0x75316420] }
 0x396   : > { %2083 = vrot.lane.b32.xlu0 %v2071_v10, %s3081_s29  ;;  %1877 = vst [vmem:[#allocation1 + $0x21] ss:$2 sm:$0xff] %v1864_v45  ;;  %v1856_v45 = vsel %vm1849_vm9, %v1855_v37, %v4636_v35  ;;  %v2349_v20 = vsel %vm1576_vm1, %v2342_v11, %v2343_v39 }
 0x397   : > { %v2350_v33 = vsel %vm2345_vm14, %v2349_v20, %v4207_v52 }
 0x398   : > { %v1555_v16 = vpop.permute.xlu1 %1554 }
 0x399   : > { %1662 = vrot.lane.b32.xlu1 %v1647_v8, %s3077_s23  ;;  %1557 = vst.msk [vmem:[#allocation2 + $0x23] sm:$0x1] %vm470_vm8, %v1555_v16 }
 0x39a   : > { %v2189_v6 = vld.sshfl [vmem:[#allocation1 + $0x10] sm:$0xff pattern:$0x75316420]  ;;  %v2190_v59 = vld.sshfl [vmem:[#allocation1 + $0x18] sm:$0xff pattern:$0x75316420] }
 0x39b   : > { %v4145_v5 = vld [vmem:[#allocation2 + $0x18] sm:$0xff]  ;;  %2252 = vst [vmem:[#allocation1 + $0x11] ss:$2 sm:$0xff] %v4029_v19  ;;  %v2043_v19 = vsel %vm2038_vm10, %v2042_v50, %v4633_v62 }
 0x39c   : > { %v1588_v49 = vmul.f32 %v1580_v3, %v4145_v5  ;;  %v2053_v0 = vmul.f32 %v2043_v19, %v4075_v40  ;;  %v1747_v8 = vmul.f32 %v1738_v56, %v4145_v5  ;;  %v1865_v60 = vmul.f32 %v1856_v45, %v4145_v5 }
 0x39d   : > { %v1884_v32 = vld.sshfl [vmem:[#allocation1 + $0x20] sm:$0xff pattern:$0x75316420]  ;;  %v1885_v54 = vld.sshfl [vmem:[#allocation1 + $0x28] sm:$0xff pattern:$0x75316420] }
 0x39e   : > { %1599 = vst [vmem:[#allocation1 + $0x30] ss:$2 sm:$0xff] %v1588_v49  ;;  %2085 = vrot.lane.b32.xlu0 %v2072_v48, %s3081_s29 }
 0x39f   : > { %1947 = vst [vmem:[#allocation1 + $0x20] ss:$2 sm:$0xff] %v4075_v40  ;;  %v4226_v16 = vpop.permute.xlu2 %1654 }
 0x3a0   : > { %v1628_v31 = vld [vmem:[#allocation2 + $0x20] sm:$0xf] }
 0x3a1   : > { %1650 = vst [vmem:[#allocation1 + $0x1] ss:$2 sm:$0xff] %v1628_v31  ;;  %v1699_v36 = vld [vmem:[#allocation2 + $0x20] sm:$0xf] }
 0x3a2   : > { %v4166_v58 = vld.sshfl [vmem:[#allocation1 + $0x10] sm:$0xff pattern:$0x75316420]  ;;  %v2260_v1 = vld.sshfl [vmem:[#allocation1 + $0x18] sm:$0xff pattern:$0x75316420]  ;;  %v1748_v48 = vmul.f32 %v1730_v29, %v1699_v36 }
 0x3a3   : > { %2273 = vrot.lane.b32.xlu2 %v2260_v1, %s3082_s30  ;;  %2370 = vst [vmem:[#allocation1 + $0x10] ss:$2 sm:$0xff] %v2359_v34  ;;  %v1818_v1 = vld [vmem:[#allocation2 + $0x20] sm:$0xf] }
 0x3a4   : > { %v1866_v11 = vmul.f32 %v1848_v4, %v1818_v1  ;;  %v1937_v35 = vld [vmem:[#allocation2 + $0x20] sm:$0xf] }
 0x3a5   : > { %v1606_v23 = vld.sshfl [vmem:[#allocation1 + $0x30] sm:$0xff pattern:$0x75316420]  ;;  %v1607_v27 = vld.sshfl [vmem:[#allocation1 + $0x38] sm:$0xff pattern:$0x75316420] }
 0x3a6   : > { %1641 = vst [vmem:[#allocation1 + $0x31] ss:$2 sm:$0xff] %v4145_v5  ;;  %2201 = vrot.lane.b32.xlu0 %v2189_v6, %s3070_s10  ;;  %v1954_v28 = vld.sshfl [vmem:[#allocation1 + $0x20] sm:$0xff pattern:$0x75316420] }
 0x3a7   : > { %1622 = vst [vmem:[#allocation3 + $0xf8] sm:$0xf] %v1606_v23  ;;  %v4179_v12 = vld.sshfl [vmem:[#allocation1 + $0x28] sm:$0xff pattern:$0x75316420] }
 0x3a8   : > { %1623 = vst [vmem:[#allocation3 + $0x100] sm:$0xf] %v1607_v27  ;;  %v4186_v26 = vld.sshfl [vmem:[#allocation1] sm:$0xff pattern:$0x75316420]  ;;  %v2360_v27 = vmul.f32 %v2350_v33, %v4075_v40 }
 0x3a9   : > { %2066 = vst [vmem:[#allocation1 + $0x21] ss:$2 sm:$0xff] %v2053_v0  ;;  %v2156_v0 = vrot.slane %v4639_v14, 4 }
 0x3aa   : > { %1754 = vst [vmem:[#allocation1] ss:$2 sm:$0xff] %v1744_v9  ;;  %v2378_v51 = vld.sshfl [vmem:[#allocation1 + $0x18] sm:$0xff pattern:$0x75316420] }
 0x3ab   : > { %2391 = vrot.lane.b32.xlu1 %v2378_v51, %s3083_s8  ;;  %1898 = vrot.lane.b32.xlu2 %v1884_v32, %s3079_s26  ;;  %v4637_v32 = vld [vmem:[#allocation24_spill] sm:$0xff] }
 0x3ad   : > { %v4199_v42 = vld.sshfl [vmem:[#allocation1 + $0x30] sm:$0xff pattern:$0x75316420]  ;;  %v4201_v2 = vld.sshfl [vmem:[#allocation1 + $0x38] sm:$0xff pattern:$0x75316420] }
 0x3ae   : > { %2203 = vrot.lane.b32.xlu0 %v2190_v59, %s3070_s10  ;;  %1760 = vst [vmem:[#allocation1 + $0x30] ss:$2 sm:$0xff] %v1747_v8 }
 0x3b0   : > { %v2073_v44 = vld.sshfl [vmem:[#allocation1 + $0x20] sm:$0xff pattern:$0x75316420]  ;;  %v2074_v10 = vld.sshfl [vmem:[#allocation1 + $0x28] sm:$0xff pattern:$0x75316420] }
 0x3b1   : > { %2184 = vst [vmem:[#allocation1 + $0x20] ss:$2 sm:$0xff] %v2172_v41  ;;  %v1761_v18 = vld.sshfl [vmem:[#allocation1] sm:$0xff pattern:$0x75316420]  ;;  %v4640_v41 = vld [vmem:[#allocation25_spill] sm:$0xff] }
 0x3b2   : > { %v4212_v17 = vld.sshfl [vmem:[#allocation1 + $0x8] sm:$0xff pattern:$0x75316420]  ;;  %v2051_v52 = vmul.f32 %v4640_v41, %v4010_v30 }
 0x3b3   : > { %1769 = vst [vmem:[#allocation1] ss:$2 sm:$0xff] %v1748_v48  ;;  %1900 = vrot.lane.b32.xlu2 %v1885_v54, %s3079_s26  ;;  %2087 = vrot.lane.b32.xlu1 %v2073_v44, %s3081_s29  ;;  %v1862_v54 = vmul.f32 %v4637_v32, %v4010_v30 }
 0x3b5   : > { %v4219_v63 = vld.sshfl [vmem:[#allocation1 + $0x30] sm:$0xff pattern:$0x75316420]  ;;  %v4221_v57 = vld.sshfl [vmem:[#allocation1 + $0x38] sm:$0xff pattern:$0x75316420] }
 0x3b6   : > { %1779 = vrot.lane.b32.xlu0 %v4136_v47, %s3078_s25  ;;  %1879 = vst [vmem:[#allocation1 + $0x31] ss:$2 sm:$0xff] %v1865_v60  ;;  %v4638_v47 = vld [vmem:[#allocation15_spill] sm:$0xff] }
 0x3b7   : > { %v1653_v3 = vpop.permute.xlu1 %1652  ;;  %v2037_v31 = vrot.slane %v4638_v47, 4 }
 0x3b8   : > { %v1671_v6 = vsel %vm1670_vm15, %v1653_v3, %v4226_v16  ;;  %v2191_v59 = vld.sshfl [vmem:[#allocation1 + $0x20] sm:$0xff pattern:$0x75316420]  ;;  %v2192_v49 = vld.sshfl [vmem:[#allocation1 + $0x28] sm:$0xff pattern:$0x75316420] }
 0x3b9   : > { %1687 = vst [vmem:[#allocation3 + $0xb0] sm:$0xf0] %v1671_v6  ;;  %v2044_v15 = vsel %vm1576_vm1, %v2036_v24, %v2037_v31 }
 0x3ba   : > { %2254 = vst [vmem:[#allocation1 + $0x21] ss:$2 sm:$0xff] %v4075_v40  ;;  %v4233_v21 = vld.sshfl [vmem:[#allocation1] sm:$0xff pattern:$0x75316420]  ;;  %v2163_v40 = vsel %vm1576_vm1, %v2155_v55, %v2156_v0  ;;  %v2344_v55 = vrot.slane %v4283_v61, 4 }
 0x3bb   : > { %1873 = vst [vmem:[#allocation1 + $0x1] ss:$2 sm:$0xff] %v1862_v54  ;;  %1968 = vrot.lane.b32.xlu2 %v1954_v28, %s3080_s27  ;;  %2089 = vrot.lane.b32.xlu1 %v2074_v10, %s3081_s29 }
 0x3bc   : > { %v2351_v36 = vsel %vm1576_vm1, %v2343_v39, %v2344_v55 }
 0x3bd   : > { %v4241_v34 = vld.sshfl [vmem:[#allocation1 + $0x38] sm:$0xff pattern:$0x75316420]  ;;  %v4243_v50 = vld.sshfl [vmem:[#allocation1 + $0x30] sm:$0xff pattern:$0x75316420]  ;;  %v2352_v37 = vsel %vm2345_vm14, %v2351_v36, %v4283_v61 }
 0x3be   : > { %1781 = vrot.lane.b32.xlu0 %v4138_v53, %s3078_s25  ;;  %1949 = vst [vmem:[#allocation1 + $0x30] ss:$2 sm:$0xff] %v4145_v5  ;;  %v2045_v53 = vsel %vm2038_vm10, %v2044_v15, %v4638_v47  ;;  %v2361_v10 = vmul.f32 %v2352_v37, %v4145_v5  ;;  %v2126_v47 = vld [vmem:[#allocation2 + $0x20] sm:$0xf] }
 0x3bf   : > { %v2054_v38 = vmul.f32 %v2045_v53, %v4145_v5 }
 0x3c1   : > { %v2261_v29 = vld.sshfl [vmem:[#allocation1 + $0x20] sm:$0xff pattern:$0x75316420]  ;;  %v2262_v23 = vld.sshfl [vmem:[#allocation1 + $0x28] sm:$0xff pattern:$0x75316420] }
 0x3c2   : > { %v1881_v19 = vld.sshfl [vmem:[#allocation1 + $0x8] sm:$0xff pattern:$0x75316420]  ;;  %v1880_v28 = vld.sshfl [vmem:[#allocation1] sm:$0xff pattern:$0x75316420] }
 0x3c3   : > { %1888 = vst [vmem:[#allocation1 + $0x1] ss:$2 sm:$0xff] %v1866_v11  ;;  %1970 = vrot.lane.b32.xlu2 %v4179_v12, %s3080_s27  ;;  %1771 = vrot.lane.b32.xlu1 %v1761_v18, %s3078_s25  ;;  %v2164_v12 = vsel %vm2157_vm13, %v2163_v40, %v4639_v14 }
 0x3c4   : > { %2372 = vst [vmem:[#allocation1 + $0x20] ss:$2 sm:$0xff] %v2360_v27  ;;  %v2173_v56 = vmul.f32 %v2164_v12, %v4145_v5 }
 0x3c5   : > { %v1956_v62 = vld.sshfl [vmem:[#allocation1 + $0x30] sm:$0xff pattern:$0x75316420]  ;;  %v4263_v24 = vld.sshfl [vmem:[#allocation1 + $0x38] sm:$0xff pattern:$0x75316420] }
 0x3c6   : > { %2271 = vrot.lane.b32.xlu0 %v4166_v58, %s3082_s30  ;;  %2068 = vst [vmem:[#allocation1 + $0x31] ss:$2 sm:$0xff] %v2054_v38  ;;  %v2377_v58 = vld.sshfl [vmem:[#allocation1 + $0x10] sm:$0xff pattern:$0x75316420] }
 0x3ca   : > { %v4272_v9 = vld.sshfl [vmem:[#allocation1] sm:$0xff pattern:$0x75316420] }
 0x3cb   : > { %1943 = vst [vmem:[#allocation1] ss:$2 sm:$0xff] %v4010_v30  ;;  %1664 = vrot.lane.b32.xlu2 %v4199_v42, %s3077_s23  ;;  %2205 = vrot.lane.b32.xlu1 %v2191_v59, %s3070_s10  ;;  %v2379_v3 = vld.sshfl [vmem:[#allocation1 + $0x20] sm:$0xff pattern:$0x75316420] }
 0x3cc   : > { %v2380_v32 = vld.sshfl [vmem:[#allocation1 + $0x28] sm:$0xff pattern:$0x75316420] }
 0x3cd   : > { %v2075_v7 = vld.sshfl [vmem:[#allocation1 + $0x30] sm:$0xff pattern:$0x75316420]  ;;  %v4281_v51 = vld.sshfl [vmem:[#allocation1 + $0x38] sm:$0xff pattern:$0x75316420] }
 0x3ce   : > { %2389 = vrot.lane.b32.xlu0 %v2377_v58, %s3083_s8  ;;  %2186 = vst [vmem:[#allocation1 + $0x30] ss:$2 sm:$0xff] %v2173_v56 }
 0x3d2   : > { %v1950_v4 = vld.sshfl [vmem:[#allocation1] sm:$0xff pattern:$0x75316420]  ;;  %v4287_v8 = vld.sshfl [vmem:[#allocation1 + $0x8] sm:$0xff pattern:$0x75316420] }
 0x3d3   : > { %1958 = vst [vmem:[#allocation1] ss:$2 sm:$0xff] %v1937_v35  ;;  %1773 = vrot.lane.b32.xlu2 %v4212_v17, %s3078_s25  ;;  %2207 = vrot.lane.b32.xlu1 %v2192_v49, %s3070_s10  ;;  %v2007_v17 = vld [vmem:[#allocation2 + $0x20] sm:$0xf]  ;;  %v2346_v35 = vsel %vm2345_vm14, %v2341_v43, %v4632_v46 }
 0x3d4   : > { %v2055_v39 = vmul.f32 %v2037_v31, %v2007_v17  ;;  %v4333_v31 = vpop.permute.xlu2 %1777  ;;  %v2314_v46 = vld [vmem:[#allocation2 + $0x20] sm:$0xf] }
 0x3d5   : > { %v4292_v42 = vld.sshfl [vmem:[#allocation1 + $0x30] sm:$0xff pattern:$0x75316420]  ;;  %v4294_v22 = vld.sshfl [vmem:[#allocation1 + $0x38] sm:$0xff pattern:$0x75316420] }
 0x3d6   : > { %2275 = vrot.lane.b32.xlu0 %v2261_v29, %s3082_s30  ;;  %2256 = vst [vmem:[#allocation1 + $0x31] ss:$2 sm:$0xff] %v4145_v5 }
 0x3da   : > { %v4305_v44 = vld.sshfl [vmem:[#allocation1] sm:$0xff pattern:$0x75316420] }
 0x3db   : > { %2062 = vst [vmem:[#allocation1 + $0x1] ss:$2 sm:$0xff] %v2051_v52  ;;  %1783 = vrot.lane.b32.xlu1 %v4219_v63, %s3078_s25  ;;  %1892 = vrot.lane.b32.xlu2 %v1881_v19, %s3079_s26  ;;  %v2362_v52 = vmul.f32 %v2344_v55, %v2314_v46 }
 0x3dd   : > { %v2263_v48 = vld.sshfl [vmem:[#allocation1 + $0x30] sm:$0xff pattern:$0x75316420]  ;;  %v2264_v18 = vld.sshfl [vmem:[#allocation1 + $0x38] sm:$0xff pattern:$0x75316420] }
 0x3de   : > { %2277 = vrot.lane.b32.xlu0 %v2262_v23, %s3082_s30  ;;  %2374 = vst [vmem:[#allocation1 + $0x30] ss:$2 sm:$0xff] %v2361_v10 }
 0x3e0   : > { %v1657_v45 = vpop.permute.xlu0 %1656 }
 0x3e1   : > { %v1672_v60 = vsel %vm1670_vm15, %v4226_v16, %v1657_v45  ;;  %v2158_v16 = vsel %vm2157_vm13, %v2153_v13, %v4629_v25 }
 0x3e2   : > { %1688 = vst [vmem:[#allocation3 + $0xd0] sm:$0xf0] %v1672_v60  ;;  %v2069_v5 = vld.sshfl [vmem:[#allocation1] sm:$0xff pattern:$0x75316420]  ;;  %v2170_v49 = vmul.f32 %v2158_v16, %v4010_v30 }
 0x3e3   : > { %v4316_v6 = vld.sshfl [vmem:[#allocation1 + $0x8] sm:$0xff pattern:$0x75316420]  ;;  %2393 = vrot.lane.b32.xlu2 %v2379_v3, %s3083_s8  ;;  %1890 = vrot.lane.b32.xlu1 %v1880_v28, %s3079_s26 }
 0x3e4   : > { %2077 = vst [vmem:[#allocation1 + $0x1] ss:$2 sm:$0xff] %v2055_v39 }
 0x3e5   : > { %v2381_v15 = vld.sshfl [vmem:[#allocation1 + $0x30] sm:$0xff pattern:$0x75316420]  ;;  %v2382_v19 = vld.sshfl [vmem:[#allocation1 + $0x38] sm:$0xff pattern:$0x75316420] }
 0x3e6   : > { %1902 = vrot.lane.b32.xlu0 %v4243_v50, %s3079_s26  ;;  %v2174_v50 = vmul.f32 %v2156_v0, %v2126_v47  ;;  %v2243_v0 = vld [vmem:[#allocation2 + $0x20] sm:$0xf] }
 0x3e8   : > { %v1659_v63 = vpop.permute.xlu0 %1658 }
 0x3e9   : > { %v1673_v59 = vsel %vm1670_vm15, %v1657_v45, %v1659_v63 }
 0x3ea   : > { %1689 = vst [vmem:[#allocation3 + $0x10] sm:$0xf0] %v1673_v59 }
 0x3eb   : > { %v4328_v54 = vld.sshfl [vmem:[#allocation1] sm:$0xff pattern:$0x75316420]  ;;  %2395 = vrot.lane.b32.xlu2 %v2380_v32, %s3083_s8  ;;  %1960 = vrot.lane.b32.xlu1 %v1950_v4, %s3080_s27  ;;  %v2358_v4 = vmul.f32 %v2346_v35, %v4010_v30 }
 0x3ec   : > { %2180 = vst [vmem:[#allocation1] ss:$2 sm:$0xff] %v2170_v49 }
 0x3ee   : > { %1972 = vrot.lane.b32.xlu0 %v1956_v62, %s3080_s27 }
 0x3f0   : > { %v4335_v25 = vpop.permute.xlu0 %1775  ;;  %v1897_v20 = vpop.permute.xlu1 %1896 }
 0x3f1   : > { %v1792_v13 = vsel %vm1789_vm0, %v4335_v25, %v4333_v31 }
 0x3f2   : > { %1808 = vst [vmem:[#allocation3 + $0x138] sm:$0xf] %v1792_v13 }
 0x3f3   : > { %v4342_v1 = vld.sshfl [vmem:[#allocation1 + $0x8] sm:$0xff pattern:$0x75316420]  ;;  %v2187_v33 = vld.sshfl [vmem:[#allocation1] sm:$0xff pattern:$0x75316420]  ;;  %2091 = vrot.lane.b32.xlu2 %v2075_v7, %s3081_s29  ;;  %2279 = vrot.lane.b32.xlu1 %v2263_v48, %s3082_s30 }
 0x3f4   : > { %2195 = vst [vmem:[#allocation1] ss:$2 sm:$0xff] %v2174_v50 }
 0x3f6   : > { %2397 = vrot.lane.b32.xlu0 %v2381_v15, %s3083_s8 }
 0x3f8   : > { %v4347_v11 = vpop.permute.xlu0 %1894 }
 0x3f9   : > { %v1911_v29 = vsel %vm1908_vm2, %v4347_v11, %v1897_v20 }
 0x3fa   : > { %1927 = vst [vmem:[#allocation3 + $0x138] sm:$0xf0] %v1911_v29 }
 0x3fb   : > { %v1967_v23 = vpop.permute.xlu1 %1966  ;;  %v2196_v27 = vld.sshfl [vmem:[#allocation1] sm:$0xff pattern:$0x75316420]  ;;  %1962 = vrot.lane.b32.xlu2 %v4287_v8, %s3080_s27  ;;  %2281 = vrot.lane.b32.xlu1 %v2264_v18, %s3082_s30 }
 0x3fc   : > { %2250 = vst [vmem:[#allocation1 + $0x1] ss:$2 sm:$0xff] %v4010_v30 }
 0x3fd   : > { %v4355_v28 = vpop.permute.xlu2 %2273 }
 0x3fe   : > { %2399 = vrot.lane.b32.xlu0 %v2382_v19, %s3083_s8 }
 0x400   : > { %v4358_v53 = vpop.permute.xlu0 %1964 }
 0x401   : > { %v1981_v14 = vsel %vm1978_vm3, %v4358_v53, %v1967_v23 }
 0x402   : > { %1997 = vst [vmem:[#allocation3 + $0x8] sm:$0xf] %v1981_v14 }
 0x403   : > { %v1661_v38 = vpop.permute.xlu1 %1660  ;;  %v2257_v62 = vld.sshfl [vmem:[#allocation1] sm:$0xff pattern:$0x75316420]  ;;  %v2258_v40 = vld.sshfl [vmem:[#allocation1 + $0x8] sm:$0xff pattern:$0x75316420]  ;;  %2209 = vrot.lane.b32.xlu2 %v4292_v42, %s3070_s10  ;;  %2079 = vrot.lane.b32.xlu1 %v2069_v5, %s3081_s29 }
 0x404   : > { %v1674_v12 = vsel %vm1670_vm15, %v1659_v63, %v1661_v38  ;;  %2265 = vst [vmem:[#allocation1 + $0x1] ss:$2 sm:$0xff] %v2243_v0 }
 0x405   : > { %1690 = vst [vmem:[#allocation3 + $0x48] sm:$0xf0] %v1674_v12  ;;  %v1899_v56 = vpop.permute.xlu2 %1898 }
 0x406   : > { %2213 = vrot.lane.b32.xlu0 %v2196_v27, %s3070_s10  ;;  %v1912_v58 = vsel %vm1908_vm2, %v1897_v20, %v1899_v56 }
 0x407   : > { %1928 = vst [vmem:[#allocation3 + $0xf0] sm:$0xf0] %v1912_v58 }
 0x408   : > { %v4368_v7 = vpop.permute.xlu0 %2083 }
 0x40b   : > { %v2266_v8 = vld.sshfl [vmem:[#allocation1] sm:$0xff pattern:$0x75316420]  ;;  %v1663_v42 = vpop.permute.xlu1 %1662  ;;  %2211 = vrot.lane.b32.xlu2 %v4294_v22, %s3070_s10  ;;  %2197 = vrot.lane.b32.xlu1 %v2187_v33, %s3070_s10 }
 0x40c   : > { %2368 = vst [vmem:[#allocation1] ss:$2 sm:$0xff] %v2358_v4  ;;  %v1675_v36 = vsel %vm1670_vm15, %v1661_v38, %v1663_v42 }
 0x40d   : > { %1691 = vst [vmem:[#allocation3 + $0x120] sm:$0xf0] %v1675_v36  ;;  %v4379_v41 = vpop.permute.xlu2 %1900 }
 0x40e   : > { %1974 = vrot.lane.b32.xlu0 %v4263_v24, %s3080_s27  ;;  %v1913_v30 = vsel %vm1908_vm2, %v1899_v56, %v4379_v41 }
 0x40f   : > { %1929 = vst [vmem:[#allocation3 + $0x18] sm:$0xf0] %v1913_v30 }
 0x410   : > { %v2086_v43 = vpop.permute.xlu0 %2085 }
 0x411   : > { %v2100_v22 = vsel %vm2097_vm4, %v4368_v7, %v2086_v43 }
 0x412   : > { %2116 = vst [vmem:[#allocation3 + $0x8] sm:$0xf0] %v2100_v22 }
 0x413   : > { %v2375_v37 = vld.sshfl [vmem:[#allocation1] sm:$0xff pattern:$0x75316420]  ;;  %v2376_v10 = vld.sshfl [vmem:[#allocation1 + $0x8] sm:$0xff pattern:$0x75316420]  ;;  %2081 = vrot.lane.b32.xlu2 %v4316_v6, %s3081_s29  ;;  %2267 = vrot.lane.b32.xlu1 %v2257_v62, %s3082_s30 }
 0x414   : > { %2383 = vst [vmem:[#allocation1] ss:$2 sm:$0xff] %v2362_v52 }
 0x415   : > { %v1969_v24 = vpop.permute.xlu2 %1968 }
 0x416   : > { %2095 = vrot.lane.b32.xlu0 %v4328_v54, %s3081_s29  ;;  %v1982_v48 = vsel %vm1978_vm3, %v1967_v23, %v1969_v24 }
 0x417   : > { %1998 = vst [vmem:[#allocation3 + $0x98] sm:$0xf] %v1982_v48 }
 0x418   : > { %v4395_v18 = vpop.permute.xlu0 %2201 }
 0x41b   : > { %2199 = vrot.lane.b32.xlu2 %v4342_v1, %s3070_s10  ;;  %2385 = vrot.lane.b32.xlu1 %v2375_v37, %s3083_s8  ;;  %v2384_v54 = vld.sshfl [vmem:[#allocation1] sm:$0xff pattern:$0x75316420] }
 0x41d   : > { %v2392_v61 = vpop.permute.xlu1 %2391  ;;  %v4400_v55 = vpop.permute.xlu2 %1970 }
 0x41e   : > { %1904 = vrot.lane.b32.xlu0 %v4241_v34, %s3079_s26  ;;  %v1983_v17 = vsel %vm1978_vm3, %v1969_v24, %v4400_v55 }
 0x41f   : > { %1999 = vst [vmem:[#allocation3 + $0xa8] sm:$0xf] %v1983_v17 }
 0x420   : > { %v2204_v45 = vpop.permute.xlu0 %2203 }
 0x421   : > { %v2217_v60 = vsel %vm2157_vm13, %v4395_v18, %v2204_v45 }
 0x422   : > { %2233 = vst [vmem:[#allocation3 + $0xd8] sm:$0xf] %v2217_v60 }
 0x423   : > { %2269 = vrot.lane.b32.xlu2 %v2258_v40, %s3082_s30  ;;  %1976 = vrot.lane.b32.xlu1 %v4305_v44, %s3080_s27 }
 0x425   : > { %v2088_v39 = vpop.permute.xlu1 %2087  ;;  %v4411_v5 = vpop.permute.xlu2 %1664 }
 0x426   : > { %1668 = vrot.lane.b32.xlu0 %v4186_v26, %s3077_s23  ;;  %v2101_v34 = vsel %vm2097_vm4, %v2086_v43, %v2088_v39  ;;  %v1676_v3 = vsel %vm1670_vm15, %v1663_v42, %v4411_v5 }
 0x427   : > { %2117 = vst [vmem:[#allocation3 + $0x98] sm:$0xf0] %v2101_v34 }
 0x428   : > { %v1780_v6 = vpop.permute.xlu0 %1779  ;;  %1692 = vst [vmem:[#allocation3 + $0x38] sm:$0xf0] %v1676_v3 }
 0x429   : > { %v1793_v63 = vsel %vm1789_vm0, %v4333_v31, %v1780_v6 }
 0x42a   : > { %1809 = vst [vmem:[#allocation3 + $0xf0] sm:$0xf] %v1793_v63 }
 0x42b   : > { %2387 = vrot.lane.b32.xlu2 %v2376_v10, %s3083_s8  ;;  %1785 = vrot.lane.b32.xlu1 %v4221_v57, %s3078_s25 }
 0x42d   : > { %v2090_v44 = vpop.permute.xlu1 %2089  ;;  %v1774_v16 = vpop.permute.xlu2 %1773 }
 0x42e   : > { %v2102_v26 = vsel %vm2097_vm4, %v2088_v39, %v2090_v44  ;;  %v1791_v59 = vsel %vm1789_vm0, %v1774_v16, %v4335_v25 }
 0x42f   : > { %2118 = vst [vmem:[#allocation3 + $0xa8] sm:$0xf0] %v2102_v26 }
 0x430   : > { %v1782_v49 = vpop.permute.xlu0 %1781  ;;  %1807 = vst [vmem:[#allocation3 + $0x108] sm:$0xf] %v1791_v59 }
 0x431   : > { %v1794_v32 = vsel %vm1789_vm0, %v1780_v6, %v1782_v49 }
 0x432   : > { %1810 = vst [vmem:[#allocation3 + $0x18] sm:$0xf] %v1794_v32 }
 0x433   : > { %2283 = vrot.lane.b32.xlu2 %v2266_v8, %s3082_s30  ;;  %2401 = vrot.lane.b32.xlu1 %v2384_v54, %s3083_s8 }
 0x435   : > { %v1772_v47 = vpop.permute.xlu1 %1771  ;;  %v1893_v57 = vpop.permute.xlu2 %1892 }
 0x436   : > { %v1790_v31 = vsel %vm1789_vm0, %v1772_v47, %v1774_v16  ;;  %v1910_v13 = vsel %vm1908_vm2, %v1893_v57, %v4347_v11 }
 0x437   : > { %1806 = vst [vmem:[#allocation3 + $0x80] sm:$0xf] %v1790_v31 }
 0x438   : > { %v4432_v25 = vpop.permute.xlu0 %2271  ;;  %1926 = vst [vmem:[#allocation3 + $0x108] sm:$0xf0] %v1910_v13 }
 0x439   : > { %v2288_v20 = vsel %vm2285_vm5, %v4432_v25, %v4355_v28 }
 0x43a   : > { %2304 = vst [vmem:[#allocation3 + $0xd8] sm:$0xf0] %v2288_v20 }
 0x43b   : > { %2093 = vrot.lane.b32.xlu2 %v4281_v51, %s3081_s29  ;;  %1906 = vrot.lane.b32.xlu1 %v4272_v9, %s3079_s26 }
 0x43d   : > { %v2206_v50 = vpop.permute.xlu1 %2205  ;;  %v2394_v1 = vpop.permute.xlu2 %2393 }
 0x43e   : > { %v2218_v33 = vsel %vm2157_vm13, %v2204_v45, %v2206_v50  ;;  %v2407_v15 = vsel %vm2403_vm6, %v2392_v61, %v2394_v1 }
 0x43f   : > { %2234 = vst [vmem:[#allocation3 + $0xa0] sm:$0xf] %v2218_v33 }
 0x440   : > { %v4443_v11 = vpop.permute.xlu0 %2389  ;;  %2423 = vst [vmem:[#allocation3 + $0x40] sm:$0xf] %v2407_v15 }
 0x441   : > { %v2406_v29 = vsel %vm2403_vm6, %v4443_v11, %v2392_v61 }
 0x442   : > { %2422 = vst [vmem:[#allocation3 + $0x30] sm:$0xf] %v2406_v29  ;;  %v2438_v29 = vld [vmem:[#allocation3 + $0x108] sm:$0xff] }
 0x443   : > { %1787 = vrot.lane.b32.xlu2 %v4233_v21, %s3078_s25 }
 0x445   : > { %v2208_v51 = vpop.permute.xlu1 %2207  ;;  %v2396_v9 = vpop.permute.xlu2 %2395 }
 0x446   : > { %v2219_v23 = vsel %vm2157_vm13, %v2206_v50, %v2208_v51  ;;  %v2408_v27 = vsel %vm2403_vm6, %v2394_v1, %v2396_v9 }
 0x447   : > { %2235 = vst [vmem:[#allocation3 + $0x68] sm:$0xf] %v2219_v23  ;;  %v3084_v23 = vmov 0  }
 0x448   : > { %v2276_v19 = vpop.permute.xlu0 %2275  ;;  %2424 = vst [vmem:[#allocation3 + $0x28] sm:$0xf] %v2408_v27  ;;  %2983 = vset.pattern.permute.xlu1 %v3084_v23  ;;  %v2657_v27 = vld [vmem:[%s4575_s4] sm:$0xff]  ;;  %2984 = vset.pattern.permute.xlu2 %v3084_v23 }
 0x449   : > { %v2289_v14 = vsel %vm2285_vm5, %v4355_v28, %v2276_v19  ;;  %2660 = vperm.xlu1 %2983, %v2657_v27   ;;  %2985 = vset.pattern.permute.xlu0 %v3084_v23 }
 0x44a   : > { %2305 = vst [vmem:[#allocation3 + $0xa0] sm:$0xf0] %v2289_v14 }
 0x44b   : > { %1666 = vrot.lane.b32.xlu2 %v4201_v2, %s3077_s23 }
 0x44d   : > { %v4455_v0 = vpop.permute.xlu1 %1783  ;;  %v4457_v38 = vpop.permute.xlu2 %2091 }
 0x44e   : > { %v1795_v21 = vsel %vm1789_vm0, %v1782_v49, %v4455_v0  ;;  %v2103_v62 = vsel %vm2097_vm4, %v2090_v44, %v4457_v38 }
 0x44f   : > { %1811 = vst [vmem:[#allocation3 + $0xc8] sm:$0xf] %v1795_v21 }
 0x450   : > { %v2278_v40 = vpop.permute.xlu0 %2277  ;;  %2119 = vst [vmem:[#allocation3 + $0x90] sm:$0xf0] %v2103_v62  ;;  %v2430_v62 = vld [vmem:[#allocation3 + $0xd0] sm:$0xff] }
 0x451   : > { %v2290_v12 = vsel %vm2285_vm5, %v2276_v19, %v2278_v40 }
 0x452   : > { %2306 = vst [vmem:[#allocation3 + $0x68] sm:$0xf0] %v2290_v12  ;;  %v4515_v12 = vld [vmem:[%s4574_s3] sm:$0xff] }
 0x455   : > { %v1891_v28 = vpop.permute.xlu1 %1890  ;;  %v1963_v56 = vpop.permute.xlu2 %1962 }
 0x456   : > { %v1909_v2 = vsel %vm1908_vm2, %v1891_v28, %v1893_v57  ;;  %v1980_v58 = vsel %vm1978_vm3, %v1963_v56, %v4358_v53 }
 0x457   : > { %1925 = vst [vmem:[#allocation3 + $0x80] sm:$0xf0] %v1909_v2 }
 0x458   : > { %v4467_v35 = vpop.permute.xlu0 %1902  ;;  %1996 = vst [vmem:[#allocation3 + $0x110] sm:$0xf] %v1980_v58  ;;  %v2448_v58 = vld [vmem:[#allocation3 + $0x98] sm:$0xff] }
 0x459   : > { %v1914_v4 = vsel %vm1908_vm2, %v4379_v41, %v4467_v35 }
 0x45a   : > { %1930 = vst [vmem:[#allocation3 + $0xc8] sm:$0xf0] %v1914_v4 }
 0x45d   : > { %v2210_v8 = vpop.permute.xlu2 %2209  ;;  %v1961_v42 = vpop.permute.xlu1 %1960 }
 0x45e   : > { %v2220_v36 = vsel %vm2157_vm13, %v2208_v51, %v2210_v8  ;;  %v1979_v46 = vsel %vm1978_vm3, %v1961_v42, %v1963_v56  ;;  %v2456_v56 = vld [vmem:[#allocation3 + $0xa0] sm:$0xff] }
 0x45f   : > { %2236 = vst [vmem:[#allocation3 + $0x130] sm:$0xf] %v2220_v36 }
 0x460   : > { %v1973_v30 = vpop.permute.xlu0 %1972  ;;  %1995 = vst [vmem:[#allocation3 + $0x128] sm:$0xf] %v1979_v46 }
 0x461   : > { %v1984_v53 = vsel %vm1978_vm3, %v4400_v55, %v1973_v30 }
 0x462   : > { %2000 = vst [vmem:[#allocation3 + $0x90] sm:$0xf] %v1984_v53  ;;  %v2429_v53 = vld [vmem:[#allocation3 + $0xb0] sm:$0xff] }
 0x465   : > { %v2212_v43 = vpop.permute.xlu2 %2211  ;;  %v2280_v22 = vpop.permute.xlu1 %2279 }
 0x466   : > { %v2221_v52 = vsel %vm2157_vm13, %v2210_v8, %v2212_v43  ;;  %v2291_v41 = vsel %vm2285_vm5, %v2278_v40, %v2280_v22  ;;  %v2437_v8 = vld [vmem:[#allocation3 + $0x80] sm:$0xff] }
 0x467   : > { %2237 = vst [vmem:[#allocation3 + $0x50] sm:$0xf] %v2221_v52 }
 0x468   : > { %v2398_v37 = vpop.permute.xlu0 %2397  ;;  %2307 = vst [vmem:[#allocation3 + $0x130] sm:$0xf0] %v2291_v41  ;;  %v2455_v41 = vld [vmem:[#allocation3 + $0xd8] sm:$0xff] }
 0x469   : > { %v2409_v10 = vsel %vm2403_vm6, %v2396_v9, %v2398_v37 }
 0x46a   : > { %2425 = vst [vmem:[#allocation3] sm:$0xf] %v2409_v10  ;;  %v2447_v10 = vld [vmem:[#allocation3 + $0x8] sm:$0xff] }
 0x46d   : > { %v2282_v24 = vpop.permute.xlu1 %2281  ;;  %v2082_v48 = vpop.permute.xlu2 %2081 }
 0x46e   : > { %v2292_v61 = vsel %vm2285_vm5, %v2280_v22, %v2282_v24  ;;  %v2099_v55 = vsel %vm2097_vm4, %v2082_v48, %v4368_v7  ;;  %v2432_v22 = vld [vmem:[#allocation3 + $0x48] sm:$0xff] }
 0x46f   : > { %2308 = vst [vmem:[#allocation3 + $0x50] sm:$0xf0] %v2292_v61 }
 0x470   : > { %v4482_v17 = vpop.permute.xlu0 %2399  ;;  %2115 = vst [vmem:[#allocation3 + $0x110] sm:$0xf0] %v2099_v55 }
 0x471   : > { %v2410_v45 = vsel %vm2403_vm6, %v2398_v37, %v4482_v17  ;;  %v2466_v52 = vld [vmem:[#allocation3] sm:$0xf] }
 0x472   : > { %2426 = vst [vmem:[#allocation3 + $0xb8] sm:$0xf] %v2410_v45 }
 0x475   : > { %v2080_v60 = vpop.permute.xlu1 %2079  ;;  %v2200_v39 = vpop.permute.xlu2 %2199 }
 0x476   : > { %v2098_v34 = vsel %vm2097_vm4, %v2080_v60, %v2082_v48  ;;  %v2216_v3 = vsel %vm2157_vm13, %v2200_v39, %v4395_v18 }
 0x477   : > { %2114 = vst [vmem:[#allocation3 + $0x128] sm:$0xf0] %v2098_v34  ;;  %v2442_v34 = vld [vmem:[#allocation3 + $0xc8] sm:$0xff] }
 0x478   : > { %v2214_v6 = vpop.permute.xlu0 %2213  ;;  %2232 = vst [vmem:[#allocation3 + $0x118] sm:$0xf] %v2216_v3  ;;  %v2431_v3 = vld [vmem:[#allocation3 + $0x10] sm:$0xff] }
 0x479   : > { %v2222_v7 = vsel %vm2157_vm13, %v2212_v43, %v2214_v6  ;;  %v2463_v43 = vld [vmem:[#allocation3 + $0x30] sm:$0xf]  ;;  %v2465_v6 = vld [vmem:[#allocation3 + $0x28] sm:$0xf] }
 0x47a   : > { %2238 = vst [vmem:[#allocation3 + $0xe8] sm:$0xf] %v2222_v7  ;;  %v2434_v7 = vld [vmem:[#allocation3 + $0x38] sm:$0xff] }
 0x47d   : > { %v2198_v63 = vpop.permute.xlu1 %2197  ;;  %v2270_v44 = vpop.permute.xlu2 %2269 }
 0x47e   : > { %v2215_v16 = vsel %vm2157_vm13, %v2198_v63, %v2200_v39  ;;  %v2287_v26 = vsel %vm2285_vm5, %v2270_v44, %v4432_v25  ;;  %v2445_v2 = vld [vmem:[#allocation3 + $0x128] sm:$0xff]  ;;  %v2439_v39 = vld [vmem:[#allocation3 + $0x138] sm:$0xff] }
 0x47f   : > { %2231 = vst [vmem:[#allocation3 + $0xc0] sm:$0xf] %v2215_v16  ;;  %v2441_v16 = vld [vmem:[#allocation3 + $0x18] sm:$0xff] }
 0x480   : > { %v1975_v59 = vpop.permute.xlu0 %1974  ;;  %2303 = vst [vmem:[#allocation3 + $0x118] sm:$0xf0] %v2287_v26 }
 0x481   : > { %v1985_v49 = vsel %vm1978_vm3, %v1973_v30, %v1975_v59  ;;  %v2440_v30 = vld [vmem:[#allocation3 + $0xf0] sm:$0xff] }
 0x482   : > { %2001 = vst [vmem:[#allocation3 + $0xe0] sm:$0xf] %v1985_v49 }
 0x485   : > { %v2268_v18 = vpop.permute.xlu1 %2267  ;;  %v2388_v32 = vpop.permute.xlu2 %2387 }
 0x486   : > { %v2286_v54 = vsel %vm2285_vm5, %v2268_v18, %v2270_v44  ;;  %v2405_v47 = vsel %vm2403_vm6, %v2388_v32, %v4443_v11  ;;  %v2446_v11 = vld [vmem:[#allocation3 + $0x110] sm:$0xff]  ;;  %v2467_v18 = vld [vmem:[#allocation3 + $0xb8] sm:$0xf] }
 0x487   : > { %2302 = vst [vmem:[#allocation3 + $0xc0] sm:$0xf0] %v2286_v54  ;;  %v2454_v15 = vld [vmem:[#allocation3 + $0x118] sm:$0xff]  ;;  %v2459_v54 = vld [vmem:[#allocation3 + $0x50] sm:$0xff] }
 0x488   : > { %v2096_v57 = vpop.permute.xlu0 %2095  ;;  %2421 = vst [vmem:[#allocation3 + $0x78] sm:$0xf] %v2405_v47 }
 0x48d   : > { %v2284_v31 = vpop.permute.xlu2 %2283  ;;  %v2386_v13 = vpop.permute.xlu1 %2385 }
 0x48e   : > { %v2293_v25 = vsel %vm2285_vm5, %v2282_v24, %v2284_v31  ;;  %v2404_v20 = vsel %vm2403_vm6, %v2386_v13, %v2388_v32  ;;  %v2453_v28 = vld [vmem:[#allocation3 + $0xc0] sm:$0xff]  ;;  %v2450_v24 = vld [vmem:[#allocation3 + $0x90] sm:$0xff] }
 0x48f   : > { %2309 = vst [vmem:[#allocation3 + $0xe8] sm:$0xf0] %v2293_v25  ;;  %v2462_v50 = vld [vmem:[#allocation3 + $0x78] sm:$0xf] }
 0x490   : > { %v4499_v1 = vpop.permute.xlu0 %1904  ;;  %2420 = vst [vmem:[#allocation3 + $0x58] sm:$0xf] %v2404_v20  ;;  %2916 = vmatpush.msk.msrb.mxu3 %vm1576_vm1, %v2462_v50 }
 0x491   : > { %v1915_v33 = vsel %vm1908_vm2, %v4467_v35, %v4499_v1  ;;  %v2671_v35 = vld [vmem:[%s4576_s5] sm:$0xff] }
 0x492   : > { %1931 = vst [vmem:[#allocation3 + $0x70] sm:$0xf0] %v1915_v33  ;;  %2529 = vmatpush.msrb.mxu3 %v2454_v15  ;;  %2674 = vperm.xlu2 %2984, %v2671_v35  }
 0x494   : > { %2530 = vmatpush.msrb.mxu3 %v2446_v11 }
 0x495   : > { %v2094_v51 = vpop.permute.xlu2 %2093  ;;  %v1977_v9 = vpop.permute.xlu1 %1976 }
 0x496   : > { %2531 = vmatpush.msrb.mxu3 %v2438_v29  ;;  %v2104_v19 = vsel %vm2097_vm4, %v4457_v38, %v2094_v51  ;;  %v2105_v14 = vsel %vm2097_vm4, %v2094_v51, %v2096_v57  ;;  %v1986_v21 = vsel %vm1978_vm3, %v1975_v59, %v1977_v9  ;;  %v2464_v38 = vld [vmem:[#allocation3 + $0x40] sm:$0xf]  ;;  %v2460_v49 = vld [vmem:[#allocation3 + $0xe8] sm:$0xff] }
 0x497   : > { %2120 = vst [vmem:[#allocation3 + $0xe0] sm:$0xf0] %v2104_v19  ;;  %v2461_v40 = vld [vmem:[#allocation3 + $0x58] sm:$0xf]  ;;  %v2433_v59 = vld [vmem:[#allocation3 + $0x120] sm:$0xff] }
 0x498   : > { %2121 = vst [vmem:[#allocation3 + $0x88] sm:$0xf0] %v2105_v14  ;;  %2914 = vmatpush.msk.msrb.mxu2 %vm1576_vm1, %v2461_v40  ;;  %2532 = vmatpush.msrb.mxu3 %v2430_v62  ;;  %v1669_v37 = vpop.permute.xlu0 %1668 }
 0x499   : > { %2002 = vst [vmem:[#allocation3 + $0x88] sm:$0xf] %v1986_v21  ;;  %2917 = vmatmul.msk.f32.vlgmr.msrb.gmra.mxu3 %vm2469_vm7, %v4515_v12 }
 0x49a   : > { %2920 = vmatpush.msk.msra.mxu3 %vm1576_vm1, %v2464_v38  ;;  %2509 = vmatpush.msrb.mxu2 %v2453_v28 }
 0x49c   : > { %2569 = vmatpush.msra.mxu3 %v2456_v56  ;;  %2510 = vmatpush.msrb.mxu2 %v2445_v2 }
 0x49d   : > { %v1788_v4 = vpop.permute.xlu2 %1787  ;;  %v1786_v42 = vpop.permute.xlu1 %1785 }
 0x49e   : > { %2570 = vmatpush.msra.mxu3 %v2448_v58  ;;  %2511 = vmatpush.msrb.mxu2 %v2437_v8  ;;  %v1796_v36 = vsel %vm1789_vm0, %v4455_v0, %v1786_v42  ;;  %v1797_v46 = vsel %vm1789_vm0, %v1786_v42, %v1788_v4  ;;  %v2458_v0 = vld [vmem:[#allocation3 + $0x130] sm:$0xff]  ;;  %v2451_v47 = vld [vmem:[#allocation3 + $0xe0] sm:$0xff] }
 0x49f   : > { %1812 = vst [vmem:[#allocation3 + $0x70] sm:$0xf] %v1796_v36 }
 0x4a0   : > { %2571 = vmatpush.msra.mxu3 %v2440_v30  ;;  %1813 = vst [vmem:[#allocation3 + $0x20] sm:$0xf] %v1797_v46  ;;  %2512 = vmatpush.msrb.mxu2 %v2429_v53  ;;  %v2452_v32 = vld [vmem:[#allocation3 + $0x88] sm:$0xff] }
 0x4a1   : > { %2915 = vmatmul.msk.f32.vlgmr.msrb.gmra.mxu2 %vm2469_vm7, %v4515_v12 }
 0x4a2   : > { %2918 = vmatpush.msk.msra.mxu2 %vm1576_vm1, %v2463_v43  ;;  %2572 = vmatpush.msra.mxu3 %v2432_v22 }
 0x4a3   : > { %2921 = vmatmul.msk.f32.vlgmr.msra.gmra.mxu3 %vm2469_vm7, %v4515_v12 }
 0x4a4   : > { %2924 = vmatpush.msk.msrb.mxu3 %vm1576_vm1, %v2466_v52  ;;  %2549 = vmatpush.msra.mxu2 %v2455_v41 }
 0x4a5   : > { %v1667_v48 = vpop.permute.xlu2 %1666  ;;  %v2402_v61 = vpop.permute.xlu1 %2401 }
 0x4a6   : > { %2609 = vmatpush.msrb.mxu3 %v2458_v0  ;;  %2550 = vmatpush.msra.mxu2 %v2447_v10  ;;  %v1677_v55 = vsel %vm1670_vm15, %v4411_v5, %v1667_v48  ;;  %v1678_v45 = vsel %vm1670_vm15, %v1667_v48, %v1669_v37  ;;  %v2411_v60 = vsel %vm2403_vm6, %v4482_v17, %v2402_v61  ;;  %v2457_v5 = vld [vmem:[#allocation3 + $0x68] sm:$0xff]  ;;  %v2443_v31 = vld [vmem:[#allocation3 + $0x70] sm:$0xff] }
 0x4a7   : > { %1693 = vst [vmem:[#allocation3 + $0xf8] sm:$0xf0] %v1677_v55  ;;  %v2449_v17 = vld [vmem:[#allocation3 + $0xa8] sm:$0xff] }
 0x4a8   : > { %2610 = vmatpush.msrb.mxu3 %v2450_v24  ;;  %2551 = vmatpush.msra.mxu2 %v2439_v39  ;;  %1694 = vst [vmem:[#allocation3 + $0x100] sm:$0xf0] %v1678_v45 }
 0x4a9   : > { %2427 = vst [vmem:[#allocation3 + $0x60] sm:$0xf] %v2411_v60 }
 0x4aa   : > { %2611 = vmatpush.msrb.mxu3 %v2442_v34  ;;  %2552 = vmatpush.msra.mxu2 %v2431_v3 }
 0x4ab   : > { %2919 = vmatmul.msk.f32.vlgmr.msra.gmra.mxu2 %vm2469_vm7, %v4515_v12 }
 0x4ac   : > { %2922 = vmatpush.msk.msrb.mxu2 %vm1576_vm1, %v2465_v6  ;;  %2612 = vmatpush.msrb.mxu3 %v2434_v7 }
 0x4ad   : > { %2925 = vmatmul.msk.f32.vlgmr.msrb.gmra.mxu3 %vm2469_vm7, %v4515_v12  ;;  %v1907_v63 = vpop.permute.xlu1 %1906 }
 0x4ae   : > { %2589 = vmatpush.msrb.mxu2 %v2457_v5  ;;  %v1916_v44 = vsel %vm1908_vm2, %v4499_v1, %v1907_v63  ;;  %v2435_v25 = vld [vmem:[#allocation3 + $0xf8] sm:$0xff] }
 0x4af   : > { %1932 = vst [vmem:[#allocation3 + $0x20] sm:$0xf0] %v1916_v44  ;;  %v2436_v13 = vld [vmem:[#allocation3 + $0x100] sm:$0xff] }
 0x4b0   : > { %2590 = vmatpush.msrb.mxu2 %v2449_v17  ;;  %v2468_v26 = vld [vmem:[#allocation3 + $0x60] sm:$0xf] }
 0x4b1   : > { %2928 = vmatpush.msk.msra.mxu3 %vm1576_vm1, %v2468_v26 }
 0x4b2   : > { %2591 = vmatpush.msrb.mxu2 %v2441_v16 }
 0x4b3   : > { %2649 = vmatpush.msra.mxu3 %v2460_v49 }
 0x4b4   : > { %2592 = vmatpush.msrb.mxu2 %v2433_v59 }
 0x4b5   : > { %2923 = vmatmul.msk.f32.vlgmr.msrb.gmra.mxu2 %vm2469_vm7, %v4515_v12  ;;  %2650 = vmatpush.msra.mxu3 %v2452_v32 }
 0x4b6   : > { %2926 = vmatpush.msk.msra.mxu2 %vm1576_vm1, %v2467_v18  ;;  %v2444_v57 = vld [vmem:[#allocation3 + $0x20] sm:$0xff] }
 0x4b7   : > { %2651 = vmatpush.msra.mxu3 %v2444_v57 }
 0x4b8   : > { %2629 = vmatpush.msra.mxu2 %v2459_v54 }
 0x4b9   : > { %2652 = vmatpush.msra.mxu3 %v2436_v13 }
 0x4ba   : > { %2630 = vmatpush.msra.mxu2 %v2451_v47  ;;  %2929 = vmatmul.msk.f32.vlgmr.msra.gmra.mxu3 %vm2469_vm7, %v4515_v12 }
 0x4bb   : > { %v2661_v20 = vpop.permute.xlu1 %2660 }
 0x4bc   : > { %2631 = vmatpush.msra.mxu2 %v2443_v31 }
 0x4be   : > { %2632 = vmatpush.msra.mxu2 %v2435_v25 }
 0x4bf   : > { %2927 = vmatmul.msk.f32.vlgmr.msra.gmra.mxu2 %vm2469_vm7, %v4515_v12 }
 0x4ec   : > { %v2675_v1 = vpop.permute.xlu2 %2674 }
 0x51c   : > { %v2534_v50 = vpop.f32.mrf.mxu3 }
 0x51d   : > { %v2664_v33 = vmul.f32 %v2661_v20, %v2534_v50 }
 0x51f   : > { %v2678_v15 = vadd.f32 %v2675_v1, %v2664_v33 }
 0x521   : > { %v2686_v11 = vmax.f32 %v2678_v15, 0.0 }
 0x523   : > { %2694 = vst [vmem:[%s4558_s18 + $0x8] sm:$0xff] %v2686_v11 }
 0x524   : > { %v2514_v29 = vpop.f32.mrf.mxu2 }
 0x525   : > { %v2663_v51 = vmul.f32 %v2661_v20, %v2514_v29 }
 0x526   : > { %v2574_v9 = vpop.f32.mrf.mxu3 }
 0x527   : > { %v2666_v23 = vmul.f32 %v2661_v20, %v2574_v9  ;;  %v2677_v27 = vadd.f32 %v2675_v1, %v2663_v51 }
 0x529   : > { %v2680_v19 = vadd.f32 %v2675_v1, %v2666_v23  ;;  %v2685_v14 = vmax.f32 %v2677_v27, 0.0 }
 0x52b   : > { %v2688_v21 = vmax.f32 %v2680_v19, 0.0  ;;  %2693 = vst [vmem:[%s4558_s18] sm:$0xff] %v2685_v14 }
 0x52d   : > { %2696 = vst [vmem:[%s4558_s18 + $0x18] sm:$0xff] %v2688_v21 }
 0x52e   : > { %v2554_v62 = vpop.f32.mrf.mxu2 }
 0x52f   : > { %v2665_v12 = vmul.f32 %v2661_v20, %v2554_v62 }
 0x530   : > { %v2614_v40 = vpop.f32.mrf.mxu3 }
 0x531   : > { %v2668_v38 = vmul.f32 %v2661_v20, %v2614_v40  ;;  %v2679_v28 = vadd.f32 %v2675_v1, %v2665_v12 }
 0x533   : > { %v2682_v56 = vadd.f32 %v2675_v1, %v2668_v38  ;;  %v2687_v2 = vmax.f32 %v2679_v28, 0.0 }
 0x535   : > { %v2690_v58 = vmax.f32 %v2682_v56, 0.0  ;;  %2695 = vst [vmem:[%s4558_s18 + $0x10] sm:$0xff] %v2687_v2 }
 0x537   : > { %2698 = vst [vmem:[%s4558_s18 + $0x28] sm:$0xff] %v2690_v58 }
 0x538   : > { %v2594_v35 = vpop.f32.mrf.mxu2 }
 0x539   : > { %v2667_v4 = vmul.f32 %v2661_v20, %v2594_v35 }
 0x53b   : > { %v2681_v8 = vadd.f32 %v2675_v1, %v2667_v4 }
 0x53d   : > { %v2689_v42 = vmax.f32 %v2681_v8, 0.0  ;;  %v2654_v36 = vpop.f32.mrf.mxu3 }
 0x53e   : > { %v2670_v46 = vmul.f32 %v2661_v20, %v2654_v36 }
 0x53f   : > { %2697 = vst [vmem:[%s4558_s18 + $0x20] sm:$0xff] %v2689_v42 }
 0x540   : > { %v2684_v43 = vadd.f32 %v2675_v1, %v2670_v46 }
 0x542   : > { %v2634_v30 = vpop.f32.mrf.mxu2  ;;  %v2692_v52 = vmax.f32 %v2684_v43, 0.0 }
 0x543   : > { %v2669_v53 = vmul.f32 %v2661_v20, %v2634_v30 }
 0x544   : > { %2700 = vst [vmem:[%s4558_s18 + $0x38] sm:$0xff] %v2692_v52 }
 0x545   : > { %v2683_v22 = vadd.f32 %v2675_v1, %v2669_v53 }
 0x547   : > { %v2691_v41 = vmax.f32 %v2683_v22, 0.0 }
 0x549   : > { %2699 = vst [vmem:[%s4558_s18 + $0x30] sm:$0xff] %v2691_v41 }
 0x54a PF: > { %s19_s24 = sadd.s32 1, %s3061_s24  }
 0x54b   : > { %p16_p7 = scmp.ge.s32.totalorder %s19_s24, 4  }
 0x54d   :  { %18 = sbr.rel (!%p16_p7) target bundleno = 2 (0x2), region = 183 }
 0x552   :  { %2722 = vsyncpa [#allocation5], 1 }
 0x553   :  { %2724 = vsyncpa [#allocation5 + $0x1], 1 }
 0x554   :  { %2725 = vsyncpa [#allocation7], 1 }

</bundles_post_ra>
